<compile_context>
chip_gen: v5e
topology: v5e:2x2
jax: 0.10.0
libtpu: 0.0.40
codegen_flags: <defaults>
</compile_context>

<pallas_src>
import jax
import jax.numpy as jnp
from jax.experimental import pallas as pl
from jax.experimental.pallas import tpu as pltpu

# Module constants (from the PyTorch source)
CHANNELS = 1
IMG_SIZE = 28
IMG_SHAPE = (CHANNELS, IMG_SIZE, IMG_SIZE)
LATENT_DIM = 100
N_CLASSES = 10
HIDDEN = 512
OUT_DIM = CHANNELS * IMG_SIZE * IMG_SIZE  # 784
OUT_PAD = 896                             # 7 * 128 lane-dense padded output width


def _round_up(x, m):
    return (x + m - 1) // m * m


def _leaky_relu(x, neg_slope=0.2):
    return jnp.where(x > 0, x, neg_slope * x)


def decoder_kernel(z_ref, lbl_ref,
                   w1z_ref, w1l_ref, b1_ref,
                   w2_ref, b2_ref,
                   w3_ref, b3_ref,
                   w4_ref, b4_ref,
                   o_ref):
    """One batch tile of the decoder MLP: 4 matmuls + LeakyReLU(0.2) + Tanh.

    concat(z, lbl) @ W1 is fused as z @ W1[:100] + lbl @ W1[100:].
    bf16 operands into the MXU, f32 accumulation / activation math.
    Dropout(0.4) -> identity (eval semantics).
    """
    h = (jnp.dot(z_ref[...], w1z_ref[...], preferred_element_type=jnp.float32)
         + jnp.dot(lbl_ref[...], w1l_ref[...], preferred_element_type=jnp.float32)
         + b1_ref[...])
    h = _leaky_relu(h).astype(jnp.bfloat16)

    # Dropout(0.4) -> identity in eval mode
    h = jnp.dot(h, w2_ref[...], preferred_element_type=jnp.float32) + b2_ref[...]
    h = _leaky_relu(h).astype(jnp.bfloat16)

    # Dropout(0.4) -> identity in eval mode
    h = jnp.dot(h, w3_ref[...], preferred_element_type=jnp.float32) + b3_ref[...]
    h = _leaky_relu(h).astype(jnp.bfloat16)

    h = jnp.dot(h, w4_ref[...], preferred_element_type=jnp.float32) + b4_ref[...]
    o_ref[...] = jnp.tanh(h)


def init_decoder_params(key):
    """Deterministic f32 master parameters (PyTorch-style uniform bounds)."""
    dims = [LATENT_DIM + N_CLASSES, HIDDEN, HIDDEN, HIDDEN, OUT_DIM]
    params = []
    for i in range(4):
        fan_in, fan_out = dims[i], dims[i + 1]
        key, kw, kb = jax.random.split(key, 3)
        bound = 1.0 / (fan_in ** 0.5)
        # Stored as (in, out) so the kernel computes x @ W + b directly.
        w = jax.random.uniform(kw, (fan_in, fan_out), jnp.float32, -bound, bound)
        b = jax.random.uniform(kb, (1, fan_out), jnp.float32, -bound, bound)
        params.append((w, b))
    return params


def pack_decoder_params(params_f32):
    """Kernel-ready params: bf16 weights, split W1, zero-padded W4/b4 to 896."""
    (w1, b1), (w2, b2), (w3, b3), (w4, b4) = params_f32
    w1z = w1[:LATENT_DIM].astype(jnp.bfloat16)          # (100, 512)
    w1l = w1[LATENT_DIM:].astype(jnp.bfloat16)          # (10, 512)
    w4p = jnp.zeros((HIDDEN, OUT_PAD), jnp.bfloat16).at[:, :OUT_DIM].set(
        w4.astype(jnp.bfloat16))                        # (512, 896), zero pad
    b4p = jnp.zeros((1, OUT_PAD), jnp.float32).at[:, :OUT_DIM].set(b4)
    return (w1z, w1l, b1,
            w2.astype(jnp.bfloat16), b2,
            w3.astype(jnp.bfloat16), b3,
            w4p, b4p)


def decoder_forward(z, label_embedding, packed_params, *, batch_tile=256):
    """JAX wrapper: pad batch, run the batch-tiled Pallas MLP, slice + reshape to NCHW."""
    B = z.shape[0]
    w1z, w1l, b1, w2, b2, w3, b3, w4p, b4p = packed_params

    # Batch tile: multiple of 16 (bf16 sublane packing); pad B up to a whole
    # number of tiles. Padded rows are zeros and get sliced away at the end.
    tb = min(batch_tile, _round_up(max(B, 1), 16))
    pb = _round_up(B, tb)
    zb = jnp.zeros((pb, LATENT_DIM), jnp.bfloat16).at[:B].set(z.astype(jnp.bfloat16))
    lb = jnp.zeros((pb, N_CLASSES), jnp.bfloat16).at[:B].set(
        label_embedding.astype(jnp.bfloat16))

    # Weights/biases: full-array blocks with a constant index_map -> DMA'd once,
    # VMEM-resident across all batch tiles.
    resident = lambda a: pl.BlockSpec(a.shape, lambda i: (0,) * a.ndim)

    flops = 2 * pb * (LATENT_DIM * HIDDEN + N_CLASSES * HIDDEN
                      + 2 * HIDDEN * HIDDEN + HIDDEN * OUT_PAD)
    param_bytes = sum(int(a.size) * a.dtype.itemsize
                      for a in (w1z, w1l, b1, w2, b2, w3, b3, w4p, b4p))
    bytes_accessed = param_bytes + int(zb.size) * 2 + int(lb.size) * 2 + pb * OUT_PAD * 4

    img_flat = pl.pallas_call(
        decoder_kernel,
        out_shape=jax.ShapeDtypeStruct((pb, OUT_PAD), jnp.float32),
        grid=(pb // tb,),
        in_specs=[
            pl.BlockSpec((tb, LATENT_DIM), lambda i: (i, 0)),
            pl.BlockSpec((tb, N_CLASSES), lambda i: (i, 0)),
            resident(w1z), resident(w1l), resident(b1),
            resident(w2), resident(b2),
            resident(w3), resident(b3),
            resident(w4p), resident(b4p),
        ],
        out_specs=pl.BlockSpec((tb, OUT_PAD), lambda i: (i, 0)),
        compiler_params=pltpu.CompilerParams(
            dimension_semantics=("parallel",),   # shard batch tiles across TCs (v7x)
            vmem_limit_bytes=24 << 20,           # ~2 MB resident weights + tiles
        ),
        cost_estimate=pl.CostEstimate(
            flops=flops,
            transcendentals=pb * OUT_PAD,        # tanh
            bytes_accessed=bytes_accessed),
    )(zb, lb, w1z, w1l, b1, w2, b2, w3, b3, w4p, b4p)

    # Drop batch/output padding, then img.view(B, *img_shape) -> NCHW.
    return img_flat[:B, :OUT_DIM].reshape(B, *IMG_SHAPE)


def decoder_ref(z, label_embedding, params_f32, *, bf16_weights=True):
    """Pure-JAX reference. With bf16_weights=True it mirrors the kernel's
    bf16-operand / f32-accumulate numerics for a tight correctness check."""
    x = jnp.concatenate([z, label_embedding], axis=-1)
    (w1, b1), (w2, b2), (w3, b3), (w4, b4) = params_f32

    def mm(a, w):
        if bf16_weights:
            return jnp.dot(a.astype(jnp.bfloat16), w.astype(jnp.bfloat16),
                           preferred_element_type=jnp.float32)
        return a @ w

    h = _leaky_relu(mm(x, w1) + b1)
    h = _leaky_relu(mm(h, w2) + b2)
    h = _leaky_relu(mm(h, w3) + b3)
    h = jnp.tanh(mm(h, w4) + b4)
    return h.reshape(z.shape[0], *IMG_SHAPE)


if __name__ == "__main__":
    key = jax.random.PRNGKey(0)
    k_params, k_z, k_lbl = jax.random.split(key, 3)

    B = 2
    params_f32 = init_decoder_params(k_params)
    packed = pack_decoder_params(params_f32)

    z = jax.random.normal(k_z, (B, LATENT_DIM), jnp.float32)
    label_embedding = jax.random.normal(k_lbl, (B, N_CLASSES), jnp.float32)

    img = decoder_forward(z, label_embedding, packed)
    img = jax.block_until_ready(img)

    ref = decoder_ref(z, label_embedding, params_f32, bf16_weights=True)
    assert img.shape == (B, CHANNELS, IMG_SIZE, IMG_SIZE), img.shape
    assert jnp.allclose(img, ref, atol=1e-2, rtol=1e-2), "mismatch vs reference"

    print("KERNEL_OK")
</pallas_src>

<mosaic_0001>
module attributes {stable_mosaic.version = 11 : i64} {
  func.func @decoder_kernel(%arg0: i32, %arg1: memref<16x100xbf16, #tpu.memory_space<vmem>>, %arg2: memref<16x10xbf16, #tpu.memory_space<vmem>>, %arg3: memref<100x512xbf16, #tpu.memory_space<vmem>>, %arg4: memref<10x512xbf16, #tpu.memory_space<vmem>>, %arg5: memref<1x512xf32, #tpu.memory_space<vmem>>, %arg6: memref<512x512xbf16, #tpu.memory_space<vmem>>, %arg7: memref<1x512xf32, #tpu.memory_space<vmem>>, %arg8: memref<512x512xbf16, #tpu.memory_space<vmem>>, %arg9: memref<1x512xf32, #tpu.memory_space<vmem>>, %arg10: memref<512x896xbf16, #tpu.memory_space<vmem>>, %arg11: memref<1x896xf32, #tpu.memory_space<vmem>>, %arg12: memref<16x896xf32, #tpu.memory_space<vmem>>) attributes {dimension_semantics = [#tpu.dimension_semantics<parallel>], iteration_bounds = array<i64: 1>, scalar_prefetch = 0 : i64, scratch_operands = 0 : i64, tpu.core_type = #tpu.core_type<tc>, window_params = [{transform_indices = @transform_0, window_bounds = array<i64: 16, 100>}, {transform_indices = @transform_1, window_bounds = array<i64: 16, 10>}, {pipeline_mode = #tpu.pipeline_mode<synchronous>, transform_indices = @transform_2, window_bounds = array<i64: 100, 512>}, {pipeline_mode = #tpu.pipeline_mode<synchronous>, transform_indices = @transform_3, window_bounds = array<i64: 10, 512>}, {pipeline_mode = #tpu.pipeline_mode<synchronous>, transform_indices = @transform_4, window_bounds = array<i64: 1, 512>}, {pipeline_mode = #tpu.pipeline_mode<synchronous>, transform_indices = @transform_5, window_bounds = array<i64: 512, 512>}, {pipeline_mode = #tpu.pipeline_mode<synchronous>, transform_indices = @transform_6, window_bounds = array<i64: 1, 512>}, {pipeline_mode = #tpu.pipeline_mode<synchronous>, transform_indices = @transform_7, window_bounds = array<i64: 512, 512>}, {pipeline_mode = #tpu.pipeline_mode<synchronous>, transform_indices = @transform_8, window_bounds = array<i64: 1, 512>}, {pipeline_mode = #tpu.pipeline_mode<synchronous>, transform_indices = @transform_9, window_bounds = array<i64: 512, 896>}, {pipeline_mode = #tpu.pipeline_mode<synchronous>, transform_indices = @transform_10, window_bounds = array<i64: 1, 896>}, {transform_indices = @transform_11, window_bounds = array<i64: 16, 896>}]} {
    %c0 = arith.constant 0 : index
    %c0_0 = arith.constant 0 : index
    %0 = vector.load %arg1[%c0, %c0_0] : memref<16x100xbf16, #tpu.memory_space<vmem>>, vector<16x100xbf16>
    %c0_1 = arith.constant 0 : index
    %c0_2 = arith.constant 0 : index
    %1 = vector.load %arg3[%c0_1, %c0_2] : memref<100x512xbf16, #tpu.memory_space<vmem>>, vector<100x512xbf16>
    %cst = arith.constant dense<0.000000e+00> : vector<16x512xf32>
    %2 = tpu.matmul %0, %1, %cst {dimension_numbers = #tpu.dot_dimension_numbers<[1], [0], [0], [1], [0, 0, 1, 1], [], []>} : vector<16x100xbf16>, vector<100x512xbf16>, vector<16x512xf32> -> vector<16x512xf32>
    %c0_3 = arith.constant 0 : index
    %c0_4 = arith.constant 0 : index
    %3 = vector.load %arg2[%c0_3, %c0_4] : memref<16x10xbf16, #tpu.memory_space<vmem>>, vector<16x10xbf16>
    %c0_5 = arith.constant 0 : index
    %c0_6 = arith.constant 0 : index
    %4 = vector.load %arg4[%c0_5, %c0_6] : memref<10x512xbf16, #tpu.memory_space<vmem>>, vector<10x512xbf16>
    %cst_7 = arith.constant dense<0.000000e+00> : vector<16x512xf32>
    %5 = tpu.matmul %3, %4, %cst_7 {dimension_numbers = #tpu.dot_dimension_numbers<[1], [0], [0], [1], [0, 0, 1, 1], [], []>} : vector<16x10xbf16>, vector<10x512xbf16>, vector<16x512xf32> -> vector<16x512xf32>
    %6 = arith.addf %2, %5 : vector<16x512xf32>
    %c0_8 = arith.constant 0 : index
    %c0_9 = arith.constant 0 : index
    %7 = vector.load %arg5[%c0_8, %c0_9] : memref<1x512xf32, #tpu.memory_space<vmem>>, vector<1x512xf32>
    %8 = vector.broadcast %7 : vector<1x512xf32> to vector<16x512xf32>
    %9 = arith.addf %6, %8 : vector<16x512xf32>
    %cst_10 = arith.constant 0.000000e+00 : f32
    %10 = vector.broadcast %cst_10 : f32 to vector<16x512xf32>
    %11 = arith.cmpf ogt, %9, %10 : vector<16x512xf32>
    %cst_11 = arith.constant 2.000000e-01 : f32
    %12 = vector.broadcast %cst_11 : f32 to vector<16x512xf32>
    %13 = arith.mulf %12, %9 : vector<16x512xf32>
    %14 = arith.select %11, %9, %13 : vector<16x512xi1>, vector<16x512xf32>
    %15 = arith.truncf %14 : vector<16x512xf32> to vector<16x512xbf16>
    %c0_12 = arith.constant 0 : index
    %c0_13 = arith.constant 0 : index
    %16 = vector.load %arg6[%c0_12, %c0_13] : memref<512x512xbf16, #tpu.memory_space<vmem>>, vector<512x512xbf16>
    %cst_14 = arith.constant dense<0.000000e+00> : vector<16x512xf32>
    %17 = tpu.matmul %15, %16, %cst_14 {dimension_numbers = #tpu.dot_dimension_numbers<[1], [0], [0], [1], [0, 0, 1, 1], [], []>} : vector<16x512xbf16>, vector<512x512xbf16>, vector<16x512xf32> -> vector<16x512xf32>
    %c0_15 = arith.constant 0 : index
    %c0_16 = arith.constant 0 : index
    %18 = vector.load %arg7[%c0_15, %c0_16] : memref<1x512xf32, #tpu.memory_space<vmem>>, vector<1x512xf32>
    %19 = vector.broadcast %18 : vector<1x512xf32> to vector<16x512xf32>
    %20 = arith.addf %17, %19 : vector<16x512xf32>
    %cst_17 = arith.constant 0.000000e+00 : f32
    %21 = vector.broadcast %cst_17 : f32 to vector<16x512xf32>
    %22 = arith.cmpf ogt, %20, %21 : vector<16x512xf32>
    %cst_18 = arith.constant 2.000000e-01 : f32
    %23 = vector.broadcast %cst_18 : f32 to vector<16x512xf32>
    %24 = arith.mulf %23, %20 : vector<16x512xf32>
    %25 = arith.select %22, %20, %24 : vector<16x512xi1>, vector<16x512xf32>
    %26 = arith.truncf %25 : vector<16x512xf32> to vector<16x512xbf16>
    %c0_19 = arith.constant 0 : index
    %c0_20 = arith.constant 0 : index
    %27 = vector.load %arg8[%c0_19, %c0_20] : memref<512x512xbf16, #tpu.memory_space<vmem>>, vector<512x512xbf16>
    %cst_21 = arith.constant dense<0.000000e+00> : vector<16x512xf32>
    %28 = tpu.matmul %26, %27, %cst_21 {dimension_numbers = #tpu.dot_dimension_numbers<[1], [0], [0], [1], [0, 0, 1, 1], [], []>} : vector<16x512xbf16>, vector<512x512xbf16>, vector<16x512xf32> -> vector<16x512xf32>
    %c0_22 = arith.constant 0 : index
    %c0_23 = arith.constant 0 : index
    %29 = vector.load %arg9[%c0_22, %c0_23] : memref<1x512xf32, #tpu.memory_space<vmem>>, vector<1x512xf32>
    %30 = vector.broadcast %29 : vector<1x512xf32> to vector<16x512xf32>
    %31 = arith.addf %28, %30 : vector<16x512xf32>
    %cst_24 = arith.constant 0.000000e+00 : f32
    %32 = vector.broadcast %cst_24 : f32 to vector<16x512xf32>
    %33 = arith.cmpf ogt, %31, %32 : vector<16x512xf32>
    %cst_25 = arith.constant 2.000000e-01 : f32
    %34 = vector.broadcast %cst_25 : f32 to vector<16x512xf32>
    %35 = arith.mulf %34, %31 : vector<16x512xf32>
    %36 = arith.select %33, %31, %35 : vector<16x512xi1>, vector<16x512xf32>
    %37 = arith.truncf %36 : vector<16x512xf32> to vector<16x512xbf16>
    %c0_26 = arith.constant 0 : index
    %c0_27 = arith.constant 0 : index
    %38 = vector.load %arg10[%c0_26, %c0_27] : memref<512x896xbf16, #tpu.memory_space<vmem>>, vector<512x896xbf16>
    %cst_28 = arith.constant dense<0.000000e+00> : vector<16x896xf32>
    %39 = tpu.matmul %37, %38, %cst_28 {dimension_numbers = #tpu.dot_dimension_numbers<[1], [0], [0], [1], [0, 0, 1, 1], [], []>} : vector<16x512xbf16>, vector<512x896xbf16>, vector<16x896xf32> -> vector<16x896xf32>
    %c0_29 = arith.constant 0 : index
    %c0_30 = arith.constant 0 : index
    %40 = vector.load %arg11[%c0_29, %c0_30] : memref<1x896xf32, #tpu.memory_space<vmem>>, vector<1x896xf32>
    %41 = vector.broadcast %40 : vector<1x896xf32> to vector<16x896xf32>
    %42 = arith.addf %39, %41 : vector<16x896xf32>
    %43 = math.tanh %42 : vector<16x896xf32>
    %c0_31 = arith.constant 0 : index
    %c0_32 = arith.constant 0 : index
    %44 = vector.load %arg12[%c0_31, %c0_32] : memref<16x896xf32, #tpu.memory_space<vmem>>, vector<16x896xf32>
    tpu.vector_store %arg12[%c0_31, %c0_32], %43 {strides = array<i32>} : memref<16x896xf32, #tpu.memory_space<vmem>>, vector<16x896xf32>,
    return
  }
  func.func @transform_0(%arg0: i32) -> (i32, i32) {
    %c0_i32 = arith.constant 0 : i32
    %c0_i32_0 = arith.constant 0 : i32
    return %arg0, %c0_i32 : i32, i32
  }
  func.func @transform_1(%arg0: i32) -> (i32, i32) {
    %c0_i32 = arith.constant 0 : i32
    %c0_i32_0 = arith.constant 0 : i32
    return %arg0, %c0_i32 : i32, i32
  }
  func.func @transform_2(%arg0: i32) -> (i32, i32) {
    %c0_i32 = arith.constant 0 : i32
    %c0_i32_0 = arith.constant 0 : i32
    %c0_i32_1 = arith.constant 0 : i32
    return %c0_i32, %c0_i32_0 : i32, i32
  }
  func.func @transform_3(%arg0: i32) -> (i32, i32) {
    %c0_i32 = arith.constant 0 : i32
    %c0_i32_0 = arith.constant 0 : i32
    %c0_i32_1 = arith.constant 0 : i32
    return %c0_i32, %c0_i32_0 : i32, i32
  }
  func.func @transform_4(%arg0: i32) -> (i32, i32) {
    %c0_i32 = arith.constant 0 : i32
    %c0_i32_0 = arith.constant 0 : i32
    %c0_i32_1 = arith.constant 0 : i32
    return %c0_i32, %c0_i32_0 : i32, i32
  }
  func.func @transform_5(%arg0: i32) -> (i32, i32) {
    %c0_i32 = arith.constant 0 : i32
    %c0_i32_0 = arith.constant 0 : i32
    %c0_i32_1 = arith.constant 0 : i32
    return %c0_i32, %c0_i32_0 : i32, i32
  }
  func.func @transform_6(%arg0: i32) -> (i32, i32) {
    %c0_i32 = arith.constant 0 : i32
    %c0_i32_0 = arith.constant 0 : i32
    %c0_i32_1 = arith.constant 0 : i32
    return %c0_i32, %c0_i32_0 : i32, i32
  }
  func.func @transform_7(%arg0: i32) -> (i32, i32) {
    %c0_i32 = arith.constant 0 : i32
    %c0_i32_0 = arith.constant 0 : i32
    %c0_i32_1 = arith.constant 0 : i32
    return %c0_i32, %c0_i32_0 : i32, i32
  }
  func.func @transform_8(%arg0: i32) -> (i32, i32) {
    %c0_i32 = arith.constant 0 : i32
    %c0_i32_0 = arith.constant 0 : i32
    %c0_i32_1 = arith.constant 0 : i32
    return %c0_i32, %c0_i32_0 : i32, i32
  }
  func.func @transform_9(%arg0: i32) -> (i32, i32) {
    %c0_i32 = arith.constant 0 : i32
    %c0_i32_0 = arith.constant 0 : i32
    %c0_i32_1 = arith.constant 0 : i32
    return %c0_i32, %c0_i32_0 : i32, i32
  }
  func.func @transform_10(%arg0: i32) -> (i32, i32) {
    %c0_i32 = arith.constant 0 : i32
    %c0_i32_0 = arith.constant 0 : i32
    %c0_i32_1 = arith.constant 0 : i32
    return %c0_i32, %c0_i32_0 : i32, i32
  }
  func.func @transform_11(%arg0: i32) -> (i32, i32) {
    %c0_i32 = arith.constant 0 : i32
    %c0_i32_0 = arith.constant 0 : i32
    return %arg0, %c0_i32 : i32, i32
  }
}

</mosaic_0001>

<bundles_post_ra>
// kernel: tpu_custom_call.1
= control target key start
LH: loop header
LB: loop body
LE: loop exit
PB: predicated region body
PF: predicated region fallthrough
CT: control target
= control target key end

     0   :  { %16 = vsyncpa [#allocation3], 0  ;;  %s7634_s0 = inlined_call_operand.hbm [shape: bf16[16,100], index: 0, kind: input, shape index: {}]   ;;  %s7635_s1 = inlined_call_operand.hbm [shape: bf16[16,10], index: 1, kind: input, shape index: {}]   ;;  %s7636_s2 = inlined_call_operand.hbm [shape: bf16[100,512], index: 2, kind: input, shape index: {}]   ;;  %s7637_s3 = inlined_call_operand.hbm [shape: bf16[10,512], index: 3, kind: input, shape index: {}]   ;;  %s7638_s4 = inlined_call_operand.hbm [shape: f32[1,512], index: 4, kind: input, shape index: {}]   ;;  %s7639_s5 = inlined_call_operand.hbm [shape: bf16[512,512], index: 5, kind: input, shape index: {}]   ;;  %s7640_s6 = inlined_call_operand.hbm [shape: f32[1,512], index: 6, kind: input, shape index: {}]   ;;  %s7641_s7 = inlined_call_operand.hbm [shape: bf16[512,512], index: 7, kind: input, shape index: {}]   ;;  %s7642_s8 = inlined_call_operand.hbm [shape: f32[1,512], index: 8, kind: input, shape index: {}]   ;;  %s7643_s9 = inlined_call_operand.hbm [shape: bf16[512,896], index: 9, kind: input, shape index: {}]   ;;  %s7644_s10 = inlined_call_operand.vmem [shape: f32[1,896], index: 10, kind: input, shape index: {}]   ;;  %s7645_s11 = inlined_call_operand.hbm [shape: f32[16,896], index: 11, kind: output, shape index: {}]  }
   0x1   :  { %17 = vsyncpa [#allocation6], 0 }
   0x2   :  { %18 = vsyncpa [#allocation9], 0 }
   0x3   :  { %19 = vsyncpa [#allocation12], 0 }
   0x4   :  { %20 = vsyncpa [#allocation15], 0 }
   0x5   :  { %21 = vsyncpa [#allocation18], 0 }
   0x6   :  { %22 = vsyncpa [#allocation4], 0  ;;  %s40_s19 = sshll.u32 %s7635_s1, 4  ;;  %s7383_s20 = smov [#allocation5]   ;;  %s41_s19 = int_to_ptr.hbm [resolvable:$true] %s40_s19 }
   0x7   :  { %s42_s21 = sshll.u32 %s7383_s20, 4  ;;  %s7384_s22 = smov 64   ;;  %s43_s21 = int_to_ptr.vmem [resolvable:$true] %s42_s21 }
   0x8   :  { %s7385_s23 = smov 4   ;;  %s66_s26 = sshll.u32 %s7637_s3, 4  ;;  %s67_s26 = int_to_ptr.hbm [resolvable:$true] %s66_s26 }
   0x9   :  { %48 = dma.hbm_to_vmem [thread:$0]  %s41_s19, 128, %s43_s21, [#allocation6], %s7384_s22, %s7384_s22, %s7385_s23  }
   0xa   :  { %s7386_s27 = smov [#allocation8]   ;;  %s90_s1 = sshll.u32 %s7639_s5, 4  ;;  %s91_s1 = int_to_ptr.hbm [resolvable:$true] %s90_s1 }
   0xb   :  { %s68_s28 = sshll.u32 %s7386_s27, 4  ;;  %s7387_s12 = smov 256   ;;  %s69_s28 = int_to_ptr.vmem [resolvable:$true] %s68_s28 }
   0xc   :  { %s7388_s13 = smov 16   ;;  %s114_s16 = sshll.u32 %s7641_s7, 4  ;;  %s115_s16 = int_to_ptr.hbm [resolvable:$true] %s114_s16 }
   0xd   :  { %74 = dma.hbm_to_vmem [thread:$0]  %s67_s26, 512, %s69_s28, [#allocation9], %s7387_s12, %s7387_s12, %s7388_s13  }
   0xe   :  { %s7389_s17 = smov [#allocation11]   ;;  %s7390_s3 = smov [#allocation14]  }
   0xf   :  { %s92_s18 = sshll.u32 %s7389_s17, 4  ;;  %s116_s19 = sshll.u32 %s7390_s3, 4  ;;  %s93_s18 = int_to_ptr.vmem [resolvable:$true] %s92_s18  ;;  %s117_s19 = int_to_ptr.vmem [resolvable:$true] %s116_s19 }
  0x10   :  { %98 = dma.hbm_to_vmem [thread:$0]  %s91_s1, 16384, %s93_s18, [#allocation12], %s7387_s12, %s7387_s12, %s7388_s13  }
  0x11   :  { %s27_s5 = sshll.u32 %s7634_s0, 4  ;;  %s53_s26 = sshll.u32 %s7636_s2, 4  ;;  %s28_s5 = int_to_ptr.hbm [resolvable:$true] %s27_s5  ;;  %s54_s26 = int_to_ptr.hbm [resolvable:$true] %s53_s26 }
  0x12   :  { %122 = dma.hbm_to_vmem [thread:$0]  %s115_s16, 16384, %s117_s19, [#allocation15], %s7387_s12, %s7387_s12, %s7388_s13  }
  0x13   :  { %s7391_s27 = smov [#allocation2]   ;;  %s7392_s28 = smov [#allocation7]  }
  0x14   :  { %s29_s7 = sshll.u32 %s7391_s27, 4  ;;  %s55_s29 = sshll.u32 %s7392_s28, 4  ;;  %s30_s7 = int_to_ptr.vmem [resolvable:$true] %s29_s7  ;;  %s56_s29 = int_to_ptr.vmem [resolvable:$true] %s55_s29 }
  0x15   :  { %35 = dma.hbm_to_vmem [thread:$0]  %s28_s5, 128, %s30_s7, [#allocation3], %s7384_s22, %s7384_s22, %s7385_s23  }
  0x16   :  { %s80_s0 = sshll.u32 %s7638_s4, 4  ;;  %s104_s2 = sshll.u32 %s7640_s6, 4  ;;  %s81_s0 = int_to_ptr.hbm [resolvable:$true] %s80_s0  ;;  %s105_s2 = int_to_ptr.hbm [resolvable:$true] %s104_s2 }
  0x17   :  { %61 = dma.hbm_to_vmem [thread:$0]  %s54_s26, 3328, %s56_s29, [#allocation6], %s7387_s12, %s7387_s12, %s7388_s13  }
  0x18   :  { %s7393_s16 = smov [#allocation10]   ;;  %s7394_s18 = smov [#allocation13]  }
  0x19   :  { %s82_s17 = sshll.u32 %s7393_s16, 4  ;;  %s106_s22 = sshll.u32 %s7394_s18, 4  ;;  %s83_s17 = int_to_ptr.vmem [resolvable:$true] %s82_s17  ;;  %s107_s22 = int_to_ptr.vmem [resolvable:$true] %s106_s22 }
  0x1a   :  { %85 = dma.hbm_to_vmem [thread:$0]  %s81_s0, 64, %s83_s17, [#allocation9]  }
  0x1b   :  { %s128_s19 = sshll.u32 %s7642_s8, 4  ;;  %s138_s13 = sshll.u32 %s7643_s9, 4  ;;  %s129_s19 = int_to_ptr.hbm [resolvable:$true] %s128_s19  ;;  %s139_s13 = int_to_ptr.hbm [resolvable:$true] %s138_s13 }
  0x1c   :  { %109 = dma.hbm_to_vmem [thread:$0]  %s105_s2, 64, %s107_s22, [#allocation12]  }
  0x1d   :  { %s7395_s20 = smov [#allocation16]   ;;  %s7396_s21 = smov [#allocation17]  }
  0x1e   :  { %s130_s6 = sshll.u32 %s7395_s20, 4  ;;  %s140_s5 = sshll.u32 %s7396_s21, 4  ;;  %s131_s6 = int_to_ptr.vmem [resolvable:$true] %s130_s6  ;;  %s141_s5 = int_to_ptr.vmem [resolvable:$true] %s140_s5 }
  0x1f   :  { %133 = dma.hbm_to_vmem [thread:$0]  %s129_s19, 64, %s131_s6, [#allocation15]  }
  0x20   :  { %s7397_s24 = smov 448   ;;  %s7398_s25 = smov 28  }
  0x21   :  { %146 = dma.hbm_to_vmem [thread:$0]  %s139_s13, 28672, %s141_s5, [#allocation18], %s7397_s24, %s7397_s24, %s7398_s25  }
  0x22   :  { %7369 = dma.done.wait [#allocation3], 128  }
  0x23   :  { %7370 = vsyncadd [#allocation3], 4294967168 }
  0x24   :  { %7371 = dma.done.wait [#allocation6], 3456  }
  0x25   :  { %7372 = vsyncadd [#allocation6], 4294963840 }
  0x26   :  { %7373 = dma.done.wait [#allocation9], 576  }
  0x27   :  { %7374 = vsyncadd [#allocation9], 4294966720 }
  0x28   :  { %7375 = dma.done.wait [#allocation12], 16448  }
  0x29   :  { %7376 = vsyncadd [#allocation12], 4294950848 }
  0x2a   :  { %7377 = dma.done.wait [#allocation15], 16448  }
  0x2b   :  { %7378 = vsyncadd [#allocation15], 4294950848 }
  0x2c   :  { %7379 = dma.done.wait [#allocation18], 28672  }
  0x2d   :  { %7380 = vsyncadd [#allocation18], 4294938624  ;;  %vm249_vm0 = vcmask 1044480   ;;  %vm457_vm1 = vcmask 1041408   ;;  %vm245_vm2 = vcmask 80896   ;;  %v6573_v27 = vld [vmem:[#allocation5] sm:$0xff] }
  0x2e   :  { %v4506_v0 = vld [vmem:[#allocation8] sm:$0xf]  ;;  %v6576_v1 = vld [vmem:[#allocation8 + $0xc] sm:$0x10]  ;;  %v6574_v2 = vld [vmem:[#allocation8 + $0x4] sm:$0xf] }
  0x2f   :  { %v4507_v3 = vor.u32 %v6576_v1, %v4506_v0  ;;  %v4508_v4 = vld [vmem:[#allocation8 + $0x10] sm:$0x10]  ;;  %v4514_v5 = vld [vmem:[#allocation8 + $0x8] sm:$0xf]  ;;  %v6577_v6 = vld [vmem:[#allocation8 + $0x14] sm:$0x10] }
  0x30   :  { %v4511_v7 = vor.u32 %v6574_v2, %v4508_v4  ;;  %v4515_v8 = vor.u32 %v6577_v6, %v4514_v5  ;;  %v6575_v9 = vld [vmem:[#allocation8 + $0xc] sm:$0xf]  ;;  %v4516_v10 = vld [vmem:[#allocation8 + $0x18] sm:$0x10]  ;;  %v216_v11 = vld [vmem:[#allocation7 + $0xc0] sm:$0x33] }
  0x31   :  { %v251_v12 = vsel %vm249_vm0, %v4507_v3, 0  ;;  %v4519_v13 = vor.u32 %v6575_v9, %v4516_v10  ;;  %v397_v14 = vunpack.c.l.b16 %v216_v11  ;;  %v398_v15 = vunpack.c.h.b16 %v216_v11  ;;  %v217_v16 = vld [vmem:[#allocation7 + $0xc8] sm:$0x33]  ;;  %v4610_v17 = vld [vmem:[#allocation7 + $0xa0] sm:$0xf]  ;;  %s4482_s28 = sshll.u32 %s7645_s11, 4  ;;  %s4483_s28 = int_to_ptr.hbm [resolvable:$true] %s4482_s28 }
  0x32   :  { %269 = vmatpush.bf16.msra.mxu0 %v251_v12  ;;  %v254_v18 = vsel %vm249_vm0, %v4511_v7, 0  ;;  %v257_v19 = vsel %vm249_vm0, %v4515_v8, 0  ;;  %v399_v20 = vunpack.c.l.b16 %v217_v16  ;;  %v400_v21 = vunpack.c.h.b16 %v217_v16  ;;  %v6571_v22 = vld [vmem:[#allocation7 + $0xac] sm:$0xf0]  ;;  %v6569_v23 = vld [vmem:[#allocation7 + $0xa4] sm:$0xf] }
  0x33   :  { %283 = vmatpush.bf16.msra.mxu1 %v254_v18  ;;  %297 = vmatpush.bf16.msra.mxu2 %v257_v19  ;;  %v260_v24 = vsel %vm249_vm0, %v4519_v13, 0  ;;  %v425_v25 = vpack.c.b16 %v397_v14, %v397_v14  ;;  %v426_v26 = vpack.c.b16 %v398_v15, %v398_v15  ;;  %v4612_v28 = vld [vmem:[#allocation7 + $0xb0] sm:$0xf0]  ;;  %v4618_v29 = vld [vmem:[#allocation7 + $0xa8] sm:$0xf]  ;;  %v4611_v39 = vor.u32 %v6571_v22, %v4610_v17  ;;  %s7400_s29 = smov 896  }
  0x34   :  { %311 = vmatpush.bf16.msra.mxu3 %v260_v24  ;;  %v427_v30 = vpack.c.b16 %v399_v20, %v399_v20  ;;  %v428_v31 = vpack.c.b16 %v400_v21, %v400_v21  ;;  %v6572_v32 = vld [vmem:[#allocation7 + $0xb4] sm:$0xf0]  ;;  %v6570_v33 = vld [vmem:[#allocation7 + $0xac] sm:$0xf]  ;;  %v4620_v34 = vld [vmem:[#allocation7 + $0xb8] sm:$0xf0]  ;;  %v4615_v40 = vor.u32 %v6569_v23, %v4612_v28 }
  0x35   :  { %v459_v35 = vsel %vm457_vm1, %v425_v25, 0  ;;  %v462_v36 = vsel %vm457_vm1, %v426_v26, 0  ;;  %4520 = vmatmul.msk.bf16.vlgmr.msra.gmra.mxu0 %vm245_vm2, %v6573_v27  ;;  %v4594_v41 = vld [vmem:[#allocation7 + $0x80] sm:$0xf]  ;;  %v6567_v42 = vld [vmem:[#allocation7 + $0x8c] sm:$0xf0]  ;;  %v4619_v43 = vor.u32 %v6572_v32, %v4618_v29  ;;  %v4623_v44 = vor.u32 %v6570_v33, %v4620_v34 }
  0x36   :  { %471 = vmatpush.bf16.msrb.mxu0 %v459_v35  ;;  %v465_v37 = vsel %vm457_vm1, %v427_v30, 0  ;;  %v468_v38 = vsel %vm457_vm1, %v428_v31, 0  ;;  %v6565_v45 = vld [vmem:[#allocation7 + $0x84] sm:$0xf]  ;;  %v4596_v46 = vld [vmem:[#allocation7 + $0x90] sm:$0xf0]  ;;  %4522 = vmatmul.msk.bf16.vlgmr.msra.gmra.mxu2 %vm245_vm2, %v6573_v27  ;;  %v4595_v51 = vor.u32 %v6567_v42, %v4594_v41 }
  0x37   :  { %485 = vmatpush.bf16.msrb.mxu1 %v462_v36  ;;  %499 = vmatpush.bf16.msrb.mxu2 %v465_v37  ;;  %v4602_v47 = vld [vmem:[#allocation7 + $0x88] sm:$0xf]  ;;  %v6568_v48 = vld [vmem:[#allocation7 + $0x94] sm:$0xf0]  ;;  %v6566_v49 = vld [vmem:[#allocation7 + $0x8c] sm:$0xf]  ;;  %v4599_v52 = vor.u32 %v6565_v45, %v4596_v46 }
  0x38   :  { %513 = vmatpush.bf16.msrb.mxu3 %v468_v38  ;;  %v4604_v50 = vld [vmem:[#allocation7 + $0x98] sm:$0xf0]  ;;  %4521 = vmatmul.msk.bf16.vlgmr.msra.gmra.mxu1 %vm245_vm2, %v6573_v27  ;;  %v4578_v53 = vld [vmem:[#allocation7 + $0x60] sm:$0xf]  ;;  %v6563_v54 = vld [vmem:[#allocation7 + $0x6c] sm:$0xf0]  ;;  %v4603_v55 = vor.u32 %v6568_v48, %v4602_v47 }
  0x39   :  { %4523 = vmatmul.msk.bf16.vlgmr.msra.gmra.mxu3 %vm245_vm2, %v6573_v27  ;;  %v4607_v56 = vor.u32 %v6566_v49, %v4604_v50  ;;  %v6561_v57 = vld [vmem:[#allocation7 + $0x64] sm:$0xf]  ;;  %v4580_v58 = vld [vmem:[#allocation7 + $0x70] sm:$0xf0]  ;;  %v4586_v59 = vld [vmem:[#allocation7 + $0x68] sm:$0xf]  ;;  %v4579_v63 = vor.u32 %v6563_v54, %v4578_v53 }
  0x3a   :  { %472 = vmatpush.bf16.msrb.mxu0 %v4611_v39  ;;  %v6564_v60 = vld [vmem:[#allocation7 + $0x74] sm:$0xf0]  ;;  %v6562_v61 = vld [vmem:[#allocation7 + $0x6c] sm:$0xf]  ;;  %v4588_v62 = vld [vmem:[#allocation7 + $0x78] sm:$0xf0]  ;;  %v4583_v0 = vor.u32 %v6561_v57, %v4580_v58 }
  0x3b   :  { %486 = vmatpush.bf16.msrb.mxu1 %v4615_v40  ;;  %500 = vmatpush.bf16.msrb.mxu2 %v4619_v43  ;;  %v4562_v1 = vld [vmem:[#allocation7 + $0x40] sm:$0xf]  ;;  %v6559_v2 = vld [vmem:[#allocation7 + $0x4c] sm:$0xf0]  ;;  %v4587_v3 = vor.u32 %v6564_v60, %v4586_v59  ;;  %v4591_v4 = vor.u32 %v6562_v61, %v4588_v62  ;;  %v6557_v5 = vld [vmem:[#allocation7 + $0x44] sm:$0xf] }
  0x3c   :  { %514 = vmatpush.bf16.msrb.mxu3 %v4623_v44  ;;  %v4564_v6 = vld [vmem:[#allocation7 + $0x50] sm:$0xf0]  ;;  %v4570_v7 = vld [vmem:[#allocation7 + $0x48] sm:$0xf]  ;;  %v6560_v8 = vld [vmem:[#allocation7 + $0x54] sm:$0xf0]  ;;  %v4563_v11 = vor.u32 %v6559_v2, %v4562_v1 }
  0x3d   :  { %v6558_v9 = vld [vmem:[#allocation7 + $0x4c] sm:$0xf]  ;;  %v4572_v10 = vld [vmem:[#allocation7 + $0x58] sm:$0xf0]  ;;  %v4567_v12 = vor.u32 %v6557_v5, %v4564_v6  ;;  %v4546_v13 = vld [vmem:[#allocation7 + $0x20] sm:$0xf]  ;;  %v4571_v15 = vor.u32 %v6560_v8, %v4570_v7 }
  0x3e   :  { %473 = vmatpush.bf16.msrb.mxu0 %v4595_v51  ;;  %v6555_v14 = vld [vmem:[#allocation7 + $0x2c] sm:$0xf0]  ;;  %v4575_v16 = vor.u32 %v6558_v9, %v4572_v10  ;;  %v6553_v17 = vld [vmem:[#allocation7 + $0x24] sm:$0xf]  ;;  %v4548_v18 = vld [vmem:[#allocation7 + $0x30] sm:$0xf0] }
  0x3f   :  { %487 = vmatpush.bf16.msrb.mxu1 %v4599_v52  ;;  %501 = vmatpush.bf16.msrb.mxu2 %v4603_v55  ;;  %v4554_v19 = vld [vmem:[#allocation7 + $0x28] sm:$0xf]  ;;  %v6556_v20 = vld [vmem:[#allocation7 + $0x34] sm:$0xf0]  ;;  %v6554_v21 = vld [vmem:[#allocation7 + $0x2c] sm:$0xf]  ;;  %v4547_v23 = vor.u32 %v6555_v14, %v4546_v13  ;;  %v4551_v24 = vor.u32 %v6553_v17, %v4548_v18 }
  0x40   :  { %515 = vmatpush.bf16.msrb.mxu3 %v4607_v56  ;;  %v4556_v22 = vld [vmem:[#allocation7 + $0x38] sm:$0xf0]  ;;  %v4530_v25 = vld [vmem:[#allocation7] sm:$0xf]  ;;  %v6551_v26 = vld [vmem:[#allocation7 + $0xc] sm:$0xf0]  ;;  %v4555_v28 = vor.u32 %v6556_v20, %v4554_v19 }
  0x41   :  { %v6549_v27 = vld [vmem:[#allocation7 + $0x4] sm:$0xf]  ;;  %v4559_v29 = vor.u32 %v6554_v21, %v4556_v22  ;;  %v4532_v30 = vld [vmem:[#allocation7 + $0x10] sm:$0xf0]  ;;  %v4538_v31 = vld [vmem:[#allocation7 + $0x8] sm:$0xf]  ;;  %v4531_v39 = vor.u32 %v6551_v26, %v4530_v25 }
  0x42   :  { %474 = vmatpush.bf16.msrb.mxu0 %v4579_v63  ;;  %v6552_v32 = vld [vmem:[#allocation7 + $0x14] sm:$0xf0]  ;;  %v6550_v33 = vld [vmem:[#allocation7 + $0xc] sm:$0xf]  ;;  %v4540_v34 = vld [vmem:[#allocation7 + $0x18] sm:$0xf0]  ;;  %v4535_v40 = vor.u32 %v6549_v27, %v4532_v30 }
  0x43   :  { %488 = vmatpush.bf16.msrb.mxu1 %v4583_v0  ;;  %502 = vmatpush.bf16.msrb.mxu2 %v4587_v3  ;;  %v4742_v35 = vld [vmem:[#allocation11 + $0xe0] sm:$0xf]  ;;  %v6608_v36 = vld [vmem:[#allocation11 + $0xec] sm:$0xf0]  ;;  %v4539_v41 = vor.u32 %v6552_v32, %v4538_v31  ;;  %v4543_v42 = vor.u32 %v6550_v33, %v4540_v34  ;;  %vm453_vm3 = vcmask 818176   ;;  %s7401_s30 = smov 56  }
  0x44   :  { %516 = vmatpush.bf16.msrb.mxu3 %v4591_v4  ;;  %v4870_v37 = vld [vmem:[#allocation11 + $0x1e0] sm:$0xf]  ;;  %v6640_v38 = vld [vmem:[#allocation11 + $0x1ec] sm:$0xf0]  ;;  %v4743_v46 = vor.u32 %v6608_v36, %v4742_v35 }
  0x45   :  { %v6548_v43 = vld [vmem:[#allocation2] sm:$0xff]  ;;  %v4871_v47 = vor.u32 %v6640_v38, %v4870_v37  ;;  %v6672_v48 = vld [vmem:[#allocation11 + $0x2ec] sm:$0xf0] }
  0x46   :  { %475 = vmatpush.bf16.msrb.mxu0 %v4563_v11  ;;  %v4726_v44 = vld [vmem:[#allocation11 + $0xc0] sm:$0xf]  ;;  %v6704_v50 = vld [vmem:[#allocation11 + $0x3ec] sm:$0xf0] }
  0x47   :  { %489 = vmatpush.bf16.msrb.mxu1 %v4567_v12  ;;  %503 = vmatpush.bf16.msrb.mxu2 %v4571_v15  ;;  %v4998_v45 = vld [vmem:[#allocation11 + $0x2e0] sm:$0xf]  ;;  %v6604_v51 = vld [vmem:[#allocation11 + $0xcc] sm:$0xf0] }
  0x48   :  { %517 = vmatpush.bf16.msrb.mxu3 %v4575_v16  ;;  %v5126_v49 = vld [vmem:[#allocation11 + $0x3e0] sm:$0xf]  ;;  %v6636_v53 = vld [vmem:[#allocation11 + $0x1cc] sm:$0xf0]  ;;  %v4999_v54 = vor.u32 %v6672_v48, %v4998_v45  ;;  %v4727_v58 = vor.u32 %v6604_v51, %v4726_v44 }
  0x49   :  { %v4854_v52 = vld [vmem:[#allocation11 + $0x1c0] sm:$0xf]  ;;  %v5127_v55 = vor.u32 %v6704_v50, %v5126_v49  ;;  %v6668_v60 = vld [vmem:[#allocation11 + $0x2cc] sm:$0xf0] }
  0x4a   :  { %476 = vmatpush.bf16.msrb.mxu0 %v4547_v23  ;;  %v4710_v56 = vld [vmem:[#allocation11 + $0xa0] sm:$0xf]  ;;  %v4855_v59 = vor.u32 %v6636_v53, %v4854_v52  ;;  %v6700_v62 = vld [vmem:[#allocation11 + $0x3cc] sm:$0xf0] }
  0x4b   :  { %490 = vmatpush.bf16.msrb.mxu1 %v4551_v24  ;;  %504 = vmatpush.bf16.msrb.mxu2 %v4555_v28  ;;  %v4982_v57 = vld [vmem:[#allocation11 + $0x2c0] sm:$0xf]  ;;  %v6600_v63 = vld [vmem:[#allocation11 + $0xac] sm:$0xf0] }
  0x4c   :  { %518 = vmatpush.bf16.msrb.mxu3 %v4559_v29  ;;  %v5110_v61 = vld [vmem:[#allocation11 + $0x3c0] sm:$0xf]  ;;  %v6632_v1 = vld [vmem:[#allocation11 + $0x1ac] sm:$0xf0]  ;;  %v4983_v2 = vor.u32 %v6668_v60, %v4982_v57  ;;  %v4711_v6 = vor.u32 %v6600_v63, %v4710_v56  ;;  %v4744_v60 = vld [vmem:[#allocation11 + $0xf0] sm:$0xf0] }
  0x4d   :  { %v4838_v0 = vld [vmem:[#allocation11 + $0x1a0] sm:$0xf]  ;;  %v5111_v3 = vor.u32 %v6700_v62, %v5110_v61  ;;  %v6664_v8 = vld [vmem:[#allocation11 + $0x2ac] sm:$0xf0]  ;;  %v6638_v63 = vld [vmem:[#allocation11 + $0x1e4] sm:$0xf] }
  0x4e   :  { %477 = vmatpush.bf16.msrb.mxu0 %v4531_v39  ;;  %v4694_v4 = vld [vmem:[#allocation11 + $0x80] sm:$0xf]  ;;  %v4839_v7 = vor.u32 %v6632_v1, %v4838_v0  ;;  %v6696_v10 = vld [vmem:[#allocation11 + $0x3ac] sm:$0xf0]  ;;  %v4872_v0 = vld [vmem:[#allocation11 + $0x1f0] sm:$0xf0] }
  0x4f   :  { %491 = vmatpush.bf16.msrb.mxu1 %v4535_v40  ;;  %505 = vmatpush.bf16.msrb.mxu2 %v4539_v41  ;;  %v4966_v5 = vld [vmem:[#allocation11 + $0x2a0] sm:$0xf]  ;;  %v6596_v11 = vld [vmem:[#allocation11 + $0x8c] sm:$0xf0]  ;;  %v4875_v1 = vor.u32 %v6638_v63, %v4872_v0  ;;  %v4664_v63 = vld [vmem:[#allocation11 + $0x50] sm:$0xf0] }
  0x50   :  { %519 = vmatpush.bf16.msrb.mxu3 %v4543_v42  ;;  %v5094_v9 = vld [vmem:[#allocation11 + $0x3a0] sm:$0xf]  ;;  %v6628_v13 = vld [vmem:[#allocation11 + $0x18c] sm:$0xf0]  ;;  %v4967_v14 = vor.u32 %v6664_v8, %v4966_v5  ;;  %v4695_v18 = vor.u32 %v6596_v11, %v4694_v4  ;;  %v4728_v8 = vld [vmem:[#allocation11 + $0xd0] sm:$0xf0] }
  0x51   :  { %4624 = vmatmul.msk.bf16.vlgmr.msrb.gmra.mxu0 %vm453_vm3, %v6548_v43  ;;  %v4822_v12 = vld [vmem:[#allocation11 + $0x180] sm:$0xf]  ;;  %v5095_v15 = vor.u32 %v6696_v10, %v5094_v9  ;;  %v6660_v20 = vld [vmem:[#allocation11 + $0x28c] sm:$0xf0]  ;;  %v6634_v11 = vld [vmem:[#allocation11 + $0x1c4] sm:$0xf] }
  0x52   :  { %1350 = vmatpush.bf16.msra.mxu0 %v4743_v46  ;;  %4625 = vmatmul.msk.bf16.vlgmr.msrb.gmra.mxu1 %vm453_vm3, %v6548_v43  ;;  %v4678_v16 = vld [vmem:[#allocation11 + $0x60] sm:$0xf]  ;;  %v4823_v19 = vor.u32 %v6628_v13, %v4822_v12  ;;  %v6692_v22 = vld [vmem:[#allocation11 + $0x38c] sm:$0xf0]  ;;  %v4856_v12 = vld [vmem:[#allocation11 + $0x1d0] sm:$0xf0] }
  0x53   :  { %1364 = vmatpush.bf16.msra.mxu1 %v4871_v47  ;;  %4626 = vmatmul.msk.bf16.vlgmr.msrb.gmra.mxu2 %vm453_vm3, %v6548_v43  ;;  %v4950_v17 = vld [vmem:[#allocation11 + $0x280] sm:$0xf]  ;;  %v6592_v23 = vld [vmem:[#allocation11 + $0x6c] sm:$0xf0]  ;;  %v6618_v0 = vld [vmem:[#allocation11 + $0x144] sm:$0xf] }
  0x54   :  { %4627 = vmatmul.msk.bf16.vlgmr.msrb.gmra.mxu3 %vm453_vm3, %v6548_v43  ;;  %1378 = vmatpush.bf16.msra.mxu2 %v4999_v54  ;;  %v5078_v21 = vld [vmem:[#allocation11 + $0x380] sm:$0xf]  ;;  %v6624_v25 = vld [vmem:[#allocation11 + $0x16c] sm:$0xf0]  ;;  %v4951_v26 = vor.u32 %v6660_v20, %v4950_v17  ;;  %v4679_v28 = vor.u32 %v6592_v23, %v4678_v16  ;;  %v6670_v20 = vld [vmem:[#allocation11 + $0x2e4] sm:$0xf] }
  0x55   :  { %1392 = vmatpush.bf16.msra.mxu3 %v5127_v55  ;;  %v4806_v24 = vld [vmem:[#allocation11 + $0x160] sm:$0xf]  ;;  %v5079_v27 = vor.u32 %v6692_v22, %v5078_v21  ;;  %v6588_v31 = vld [vmem:[#allocation11 + $0x4c] sm:$0xf0]  ;;  %v5000_v21 = vld [vmem:[#allocation11 + $0x2f0] sm:$0xf0] }
  0x56   :  { %1351 = vmatpush.bf16.msra.mxu0 %v4727_v58  ;;  %v4807_v29 = vor.u32 %v6624_v25, %v4806_v24  ;;  %v4662_v30 = vld [vmem:[#allocation11 + $0x40] sm:$0xf]  ;;  %v6620_v33 = vld [vmem:[#allocation11 + $0x14c] sm:$0xf0]  ;;  %v6702_v22 = vld [vmem:[#allocation11 + $0x3e4] sm:$0xf]  ;;  %v5003_v23 = vor.u32 %v6670_v20, %v5000_v21 }
  0x57   :  { %1365 = vmatpush.bf16.msra.mxu1 %v4855_v59  ;;  %v4790_v32 = vld [vmem:[#allocation11 + $0x140] sm:$0xf]  ;;  %v4663_v34 = vor.u32 %v6588_v31, %v4662_v30  ;;  %v6656_v37 = vld [vmem:[#allocation11 + $0x26c] sm:$0xf0]  ;;  %v6606_v59 = vld [vmem:[#allocation11 + $0xe4] sm:$0xf] }
  0x58   :  { %1379 = vmatpush.bf16.msra.mxu2 %v4983_v2  ;;  %v4791_v35 = vor.u32 %v6620_v33, %v4790_v32  ;;  %v4934_v36 = vld [vmem:[#allocation11 + $0x260] sm:$0xf]  ;;  %v6688_v40 = vld [vmem:[#allocation11 + $0x36c] sm:$0xf0]  ;;  %v4747_v62 = vor.u32 %v6606_v59, %v4744_v60  ;;  %v5128_v24 = vld [vmem:[#allocation11 + $0x3f0] sm:$0xf0] }
  0x59   :  { %1393 = vmatpush.bf16.msra.mxu3 %v5111_v3  ;;  %v5062_v38 = vld [vmem:[#allocation11 + $0x360] sm:$0xf]  ;;  %v4935_v39 = vor.u32 %v6656_v37, %v4934_v36  ;;  %v6584_v42 = vld [vmem:[#allocation11 + $0x2c] sm:$0xf0]  ;;  %v6598_v25 = vld [vmem:[#allocation11 + $0xa4] sm:$0xf] }
  0x5a   :  { %1352 = vmatpush.bf16.msra.mxu0 %v4711_v6  ;;  %v4646_v41 = vld [vmem:[#allocation11 + $0x20] sm:$0xf]  ;;  %v5063_v43 = vor.u32 %v6688_v40, %v5062_v38  ;;  %v6616_v46 = vld [vmem:[#allocation11 + $0x12c] sm:$0xf0]  ;;  %v4840_v30 = vld [vmem:[#allocation11 + $0x1b0] sm:$0xf0] }
  0x5b   :  { %1366 = vmatpush.bf16.msra.mxu1 %v4839_v7  ;;  %v4647_v44 = vor.u32 %v6584_v42, %v4646_v41  ;;  %v4774_v45 = vld [vmem:[#allocation11 + $0x120] sm:$0xf]  ;;  %v6652_v49 = vld [vmem:[#allocation11 + $0x24c] sm:$0xf0]  ;;  %v6602_v7 = vld [vmem:[#allocation11 + $0xc4] sm:$0xf] }
  0x5c   :  { %1380 = vmatpush.bf16.msra.mxu2 %v4967_v14  ;;  %v4918_v47 = vld [vmem:[#allocation11 + $0x240] sm:$0xf]  ;;  %v4775_v48 = vor.u32 %v6616_v46, %v4774_v45  ;;  %v6684_v51 = vld [vmem:[#allocation11 + $0x34c] sm:$0xf0]  ;;  %v4731_v10 = vor.u32 %v6602_v7, %v4728_v8  ;;  %v4859_v14 = vor.u32 %v6634_v11, %v4856_v12  ;;  %v6666_v31 = vld [vmem:[#allocation11 + $0x2c4] sm:$0xf] }
  0x5d   :  { %1394 = vmatpush.bf16.msra.mxu3 %v5095_v15  ;;  %v5046_v50 = vld [vmem:[#allocation11 + $0x340] sm:$0xf]  ;;  %v4919_v52 = vor.u32 %v6652_v49, %v4918_v47  ;;  %v6580_v55 = vld [vmem:[#allocation11 + $0xc] sm:$0xf0]  ;;  %v4984_v33 = vld [vmem:[#allocation11 + $0x2d0] sm:$0xf0] }
  0x5e   :  { %1353 = vmatpush.bf16.msra.mxu0 %v4695_v18  ;;  %v5047_v53 = vor.u32 %v6684_v51, %v5046_v50  ;;  %v4630_v54 = vld [vmem:[#allocation11] sm:$0xf]  ;;  %v6612_v58 = vld [vmem:[#allocation11 + $0x10c] sm:$0xf0]  ;;  %v4987_v36 = vor.u32 %v6666_v31, %v4984_v33  ;;  %v6594_v38 = vld [vmem:[#allocation11 + $0x84] sm:$0xf] }
  0x5f   :  { %1367 = vmatpush.bf16.msra.mxu1 %v4823_v19  ;;  %v4758_v56 = vld [vmem:[#allocation11 + $0x100] sm:$0xf]  ;;  %v4631_v57 = vor.u32 %v6580_v55, %v4630_v54  ;;  %v6648_v3 = vld [vmem:[#allocation11 + $0x22c] sm:$0xf0]  ;;  %v6626_v40 = vld [vmem:[#allocation11 + $0x184] sm:$0xf] }
  0x60   :  { %1381 = vmatpush.bf16.msra.mxu2 %v4951_v26  ;;  %v4759_v61 = vor.u32 %v6612_v58, %v4758_v56  ;;  %v4902_v2 = vld [vmem:[#allocation11 + $0x220] sm:$0xf]  ;;  %v6680_v6 = vld [vmem:[#allocation11 + $0x32c] sm:$0xf0]  ;;  %v4712_v26 = vld [vmem:[#allocation11 + $0xb0] sm:$0xf0] }
  0x61   :  { %1395 = vmatpush.bf16.msra.mxu3 %v5079_v27  ;;  %v5030_v4 = vld [vmem:[#allocation11 + $0x320] sm:$0xf]  ;;  %v4903_v5 = vor.u32 %v6648_v3, %v4902_v2  ;;  %v6644_v15 = vld [vmem:[#allocation11 + $0x20c] sm:$0xf0]  ;;  %v5131_v27 = vor.u32 %v6702_v22, %v5128_v24  ;;  %v4824_v42 = vld [vmem:[#allocation11 + $0x190] sm:$0xf0] }
  0x62   :  { %1354 = vmatpush.bf16.msra.mxu0 %v4679_v28  ;;  %v5031_v9 = vor.u32 %v6680_v6, %v5030_v4  ;;  %v4886_v13 = vld [vmem:[#allocation11 + $0x200] sm:$0xf]  ;;  %v6676_v17 = vld [vmem:[#allocation11 + $0x30c] sm:$0xf0]  ;;  %v4715_v28 = vor.u32 %v6598_v25, %v4712_v26  ;;  %v4968_v45 = vld [vmem:[#allocation11 + $0x2b0] sm:$0xf0] }
  0x63   :  { %1368 = vmatpush.bf16.msra.mxu1 %v4807_v29  ;;  %v5014_v16 = vld [vmem:[#allocation11 + $0x300] sm:$0xf]  ;;  %v4887_v18 = vor.u32 %v6644_v15, %v4886_v13  ;;  %v6630_v29 = vld [vmem:[#allocation11 + $0x1a4] sm:$0xf]  ;;  %v4680_v51 = vld [vmem:[#allocation11 + $0x70] sm:$0xf0] }
  0x64   :  { %1382 = vmatpush.bf16.msra.mxu2 %v4935_v39  ;;  %v5015_v19 = vor.u32 %v6676_v17, %v5014_v16  ;;  %v4843_v32 = vor.u32 %v6630_v29, %v4840_v30  ;;  %v4696_v39 = vld [vmem:[#allocation11 + $0x90] sm:$0xf0]  ;;  %v6694_v47 = vld [vmem:[#allocation11 + $0x3a4] sm:$0xf] }
  0x65   :  { %1396 = vmatpush.bf16.msra.mxu3 %v5063_v43  ;;  %v4699_v41 = vor.u32 %v6594_v38, %v4696_v39  ;;  %v4827_v43 = vor.u32 %v6626_v40, %v4824_v42  ;;  %v6590_v50 = vld [vmem:[#allocation11 + $0x64] sm:$0xf]  ;;  %v4808_v54 = vld [vmem:[#allocation11 + $0x170] sm:$0xf0] }
  0x66   :  { %1355 = vmatpush.bf16.msra.mxu0 %v4663_v34  ;;  %v6698_v34 = vld [vmem:[#allocation11 + $0x3c4] sm:$0xf]  ;;  %v5080_v60 = vld [vmem:[#allocation11 + $0x390] sm:$0xf0] }
  0x67   :  { %1369 = vmatpush.bf16.msra.mxu1 %v4791_v35  ;;  %v5112_v35 = vld [vmem:[#allocation11 + $0x3d0] sm:$0xf0]  ;;  %v6658_v56 = vld [vmem:[#allocation11 + $0x284] sm:$0xf] }
  0x68   :  { %1383 = vmatpush.bf16.msra.mxu2 %v4919_v52  ;;  %v5115_v37 = vor.u32 %v6698_v34, %v5112_v35  ;;  %v6622_v52 = vld [vmem:[#allocation11 + $0x164] sm:$0xf]  ;;  %v4792_v2 = vld [vmem:[#allocation11 + $0x150] sm:$0xf0] }
  0x69   :  { %1397 = vmatpush.bf16.msra.mxu3 %v5047_v53  ;;  %v4683_v53 = vor.u32 %v6590_v50, %v4680_v51  ;;  %v4811_v55 = vor.u32 %v6622_v52, %v4808_v54  ;;  %v6690_v58 = vld [vmem:[#allocation11 + $0x384] sm:$0xf]  ;;  %v4795_v3 = vor.u32 %v6618_v0, %v4792_v2  ;;  %v5064_v8 = vld [vmem:[#allocation11 + $0x370] sm:$0xf0] }
  0x6a   :  { %1356 = vmatpush.bf16.msra.mxu0 %v4647_v44  ;;  %v6662_v44 = vld [vmem:[#allocation11 + $0x2a4] sm:$0xf]  ;;  %v4648_v11 = vld [vmem:[#allocation11 + $0x30] sm:$0xf0] }
  0x6b   :  { %1370 = vmatpush.bf16.msra.mxu1 %v4775_v48  ;;  %v4971_v46 = vor.u32 %v6662_v44, %v4968_v45  ;;  %v5096_v48 = vld [vmem:[#allocation11 + $0x3b0] sm:$0xf0]  ;;  %v6654_v4 = vld [vmem:[#allocation11 + $0x264] sm:$0xf] }
  0x6c   :  { %1384 = vmatpush.bf16.msra.mxu2 %v4903_v5  ;;  %v5099_v49 = vor.u32 %v6694_v47, %v5096_v48  ;;  %v4936_v5 = vld [vmem:[#allocation11 + $0x270] sm:$0xf0]  ;;  %v6686_v6 = vld [vmem:[#allocation11 + $0x364] sm:$0xf] }
  0x6d   :  { %1398 = vmatpush.bf16.msra.mxu3 %v5031_v9  ;;  %v4939_v7 = vor.u32 %v6654_v4, %v4936_v5  ;;  %v5067_v9 = vor.u32 %v6686_v6, %v5064_v8  ;;  %v6614_v12 = vld [vmem:[#allocation11 + $0x124] sm:$0xf]  ;;  %v4776_v16 = vld [vmem:[#allocation11 + $0x130] sm:$0xf0]  ;;  %v6609_v4 = vld [vmem:[#allocation11 + $0xf4] sm:$0xf0] }
  0x6e   :  { %1357 = vmatpush.bf16.msra.mxu0 %v4631_v57  ;;  %v4952_v57 = vld [vmem:[#allocation11 + $0x290] sm:$0xf0]  ;;  %v4779_v17 = vor.u32 %v6614_v12, %v4776_v16  ;;  %v6682_v20 = vld [vmem:[#allocation11 + $0x344] sm:$0xf]  ;;  %v4878_v5 = vld [vmem:[#allocation11 + $0x1e8] sm:$0xf] }
  0x6f   :  { %1371 = vmatpush.bf16.msra.mxu1 %v4759_v61  ;;  %v4955_v59 = vor.u32 %v6658_v56, %v4952_v57  ;;  %v5083_v61 = vor.u32 %v6690_v58, %v5080_v60  ;;  %v5048_v22 = vld [vmem:[#allocation11 + $0x350] sm:$0xf0]  ;;  %v6578_v24 = vld [vmem:[#allocation11 + $0x4] sm:$0xf] }
  0x70   :  { %1385 = vmatpush.bf16.msra.mxu2 %v4887_v18  ;;  %v6650_v18 = vld [vmem:[#allocation11 + $0x244] sm:$0xf]  ;;  %v4632_v25 = vld [vmem:[#allocation11 + $0x10] sm:$0xf0] }
  0x71   :  { %1399 = vmatpush.bf16.msra.mxu3 %v5015_v19  ;;  %v4920_v19 = vld [vmem:[#allocation11 + $0x250] sm:$0xf0]  ;;  %v6610_v26 = vld [vmem:[#allocation11 + $0x104] sm:$0xf] }
  0x72   :  { %1406 = vmatpush.bf16.msrb.mxu0 %v4747_v62  ;;  %v6586_v62 = vld [vmem:[#allocation11 + $0x44] sm:$0xf]  ;;  %v4923_v21 = vor.u32 %v6650_v18, %v4920_v19  ;;  %v4904_v31 = vld [vmem:[#allocation11 + $0x230] sm:$0xf0] }
  0x73   :  { %1420 = vmatpush.bf16.msrb.mxu1 %v4875_v1  ;;  %v4667_v1 = vor.u32 %v6586_v62, %v4664_v63  ;;  %v6646_v30 = vld [vmem:[#allocation11 + $0x224] sm:$0xf]  ;;  %v5032_v33 = vld [vmem:[#allocation11 + $0x330] sm:$0xf0] }
  0x74   :  { %1434 = vmatpush.bf16.msrb.mxu2 %v5003_v23  ;;  %v5051_v23 = vor.u32 %v6682_v20, %v5048_v22  ;;  %v4907_v34 = vor.u32 %v6646_v30, %v4904_v31  ;;  %v6642_v38 = vld [vmem:[#allocation11 + $0x204] sm:$0xf]  ;;  %v4888_v39 = vld [vmem:[#allocation11 + $0x210] sm:$0xf0]  ;;  %v6637_v30 = vld [vmem:[#allocation11 + $0x1d4] sm:$0xf0] }
  0x75   :  { %1448 = vmatpush.bf16.msrb.mxu3 %v5131_v27  ;;  %v4635_v27 = vor.u32 %v6578_v24, %v4632_v25  ;;  %v4891_v42 = vor.u32 %v6642_v38, %v4888_v39  ;;  %v5016_v44 = vld [vmem:[#allocation11 + $0x310] sm:$0xf0]  ;;  %v6605_v24 = vld [vmem:[#allocation11 + $0xd4] sm:$0xf0]  ;;  %v4862_v25 = vld [vmem:[#allocation11 + $0x1c8] sm:$0xf] }
  0x76   :  { %1407 = vmatpush.bf16.msrb.mxu0 %v4731_v10  ;;  %v6582_v10 = vld [vmem:[#allocation11 + $0x24] sm:$0xf]  ;;  %v5006_v31 = vld [vmem:[#allocation11 + $0x2e8] sm:$0xf] }
  0x77   :  { %1421 = vmatpush.bf16.msrb.mxu1 %v4859_v14  ;;  %v4651_v15 = vor.u32 %v6582_v10, %v4648_v11  ;;  %v6641_v10 = vld [vmem:[#allocation11 + $0x1f4] sm:$0xf0] }
  0x78   :  { %1435 = vmatpush.bf16.msrb.mxu2 %v4987_v36  ;;  %v4879_v16 = vor.u32 %v6641_v10, %v4878_v5  ;;  %v6593_v10 = vld [vmem:[#allocation11 + $0x74] sm:$0xf0] }
  0x79   :  { %1449 = vmatpush.bf16.msrb.mxu3 %v5115_v37 }
  0x7a   :  { %1408 = vmatpush.bf16.msrb.mxu0 %v4715_v28  ;;  %v4760_v28 = vld [vmem:[#allocation11 + $0x110] sm:$0xf0] }
  0x7b   :  { %1422 = vmatpush.bf16.msrb.mxu1 %v4843_v32  ;;  %v4763_v29 = vor.u32 %v6610_v26, %v4760_v28  ;;  %v6678_v32 = vld [vmem:[#allocation11 + $0x324] sm:$0xf] }
  0x7c   :  { %1436 = vmatpush.bf16.msrb.mxu2 %v4971_v46  ;;  %v5035_v35 = vor.u32 %v6678_v32, %v5032_v33  ;;  %v6673_v32 = vld [vmem:[#allocation11 + $0x2f4] sm:$0xf0]  ;;  %v5134_v33 = vld [vmem:[#allocation11 + $0x3e8] sm:$0xf] }
  0x7d   :  { %1450 = vmatpush.bf16.msrb.mxu3 %v5099_v49  ;;  %v526_v49 = vld [vmem:[#allocation10] sm:$0xf] }
  0x7e   :  { %1409 = vmatpush.bf16.msrb.mxu0 %v4699_v41  ;;  %v528_v52 = vperm.slane %v526_v49, 0  ;;  %v529_v54 = vperm.slane %v526_v49, 1  ;;  %v531_v62 = vperm.slane %v526_v49, 3 }
  0x7f   :  { %1423 = vmatpush.bf16.msrb.mxu1 %v4827_v43  ;;  %v6674_v43 = vld [vmem:[#allocation11 + $0x304] sm:$0xf] }
  0x80   :  { %1437 = vmatpush.bf16.msrb.mxu2 %v4955_v59  ;;  %v5019_v45 = vor.u32 %v6674_v43, %v5016_v44  ;;  %v4846_v43 = vld [vmem:[#allocation11 + $0x1a8] sm:$0xf]  ;;  %v6633_v44 = vld [vmem:[#allocation11 + $0x1b4] sm:$0xf0] }
  0x81   :  { %1451 = vmatpush.bf16.msrb.mxu3 %v5083_v61  ;;  %v530_v61 = vperm.slane %v526_v49, 2 }
  0x82   :  { %1410 = vmatpush.bf16.msrb.mxu0 %v4683_v53 }
  0x83   :  { %1424 = vmatpush.bf16.msrb.mxu1 %v4811_v55 }
  0x84   :  { %1438 = vmatpush.bf16.msrb.mxu2 %v4939_v7 }
  0x85   :  { %1452 = vmatpush.bf16.msrb.mxu3 %v5067_v9 }
  0x86   :  { %1411 = vmatpush.bf16.msrb.mxu0 %v4667_v1 }
  0x87   :  { %1425 = vmatpush.bf16.msrb.mxu1 %v4795_v3  ;;  %v4750_v3 = vld [vmem:[#allocation11 + $0xe8] sm:$0xf] }
  0x88   :  { %1439 = vmatpush.bf16.msrb.mxu2 %v4923_v21 }
  0x89   :  { %1453 = vmatpush.bf16.msrb.mxu3 %v5051_v23  ;;  %v4734_v23 = vld [vmem:[#allocation11 + $0xc8] sm:$0xf] }
  0x8a   :  { %1412 = vmatpush.bf16.msrb.mxu0 %v4651_v15  ;;  %v4751_v15 = vor.u32 %v6609_v4, %v4750_v3  ;;  %v4974_v3 = vld [vmem:[#allocation11 + $0x2a8] sm:$0xf] }
  0x8b   :  { %1426 = vmatpush.bf16.msrb.mxu1 %v4779_v17 }
  0x8c   :  { %1440 = vmatpush.bf16.msrb.mxu2 %v4907_v34  ;;  %v6705_v34 = vld [vmem:[#allocation11 + $0x3f4] sm:$0xf0] }
  0x8d   :  { %1454 = vmatpush.bf16.msrb.mxu3 %v5035_v35  ;;  %v4718_v35 = vld [vmem:[#allocation11 + $0xa8] sm:$0xf] }
  0x8e   :  { %1413 = vmatpush.bf16.msrb.mxu0 %v4635_v27 }
  0x8f   :  { %1427 = vmatpush.bf16.msrb.mxu1 %v4763_v29 }
  0x90   :  { %1441 = vmatpush.bf16.msrb.mxu2 %v4891_v42  ;;  %v4863_v42 = vor.u32 %v6637_v30, %v4862_v25  ;;  %v6657_v30 = vld [vmem:[#allocation11 + $0x274] sm:$0xf0] }
  0x91   :  { %1455 = vmatpush.bf16.msrb.mxu3 %v5019_v45 }
  0xb2   :  { %v271_v13 = vpop.f32.mrf.mxu0 }
  0xb5   :  { %v285_v14 = vpop.f32.mrf.mxu1 }
  0xb9   :  { %v299_v36 = vpop.f32.mrf.mxu2 }
  0xba   :  { %v273_v40 = vpop.f32.mrf.mxu0 }
  0xbc   :  { %v313_v37 = vpop.f32.mrf.mxu3 }
  0xbd   :  { %v287_v41 = vpop.f32.mrf.mxu1 }
  0xc1   :  { %v301_v46 = vpop.f32.mrf.mxu2 }
  0xc4   :  { %v315_v47 = vpop.f32.mrf.mxu3 }
  0xce   :  { %v479_v48 = vpop.f32.mrf.mxu0 }
  0xcf   :  { %v493_v50 = vpop.f32.mrf.mxu1  ;;  %v480_v51 = vadd.f32 %v479_v48, %v271_v13  ;;  %v5135_v48 = vor.u32 %v6705_v34, %v5134_v33 }
  0xd0   :  { %v494_v53 = vadd.f32 %v493_v50, %v285_v14 }
  0xd1   :  { %v536_v55 = vadd.f32 %v528_v52, %v480_v51 }
  0xd2   :  { %v537_v56 = vadd.f32 %v529_v54, %v494_v53 }
  0xd3   :  { %v552_v6 = vmul.f32 0.2, %v536_v55  ;;  %vm544_vm4 = vcmp.gt.f32.partialorder %v536_v55, 0.0 }
  0xd4   :  { %v553_v7 = vmul.f32 0.2, %v537_v56  ;;  %vm545_vm5 = vcmp.gt.f32.partialorder %v537_v56, 0.0 }
  0xd5   :  { %v560_v17 = vsel %vm544_vm4, %v536_v55, %v552_v6  ;;  %v6669_v55 = vld [vmem:[#allocation11 + $0x2d4] sm:$0xf0] }
  0xd6   :  { %v507_v57 = vpop.f32.mrf.mxu2  ;;  %v481_v59 = vpop.f32.mrf.mxu0  ;;  %v561_v18 = vsel %vm545_vm5, %v537_v56, %v553_v7  ;;  %v6665_v6 = vld [vmem:[#allocation11 + $0x2b4] sm:$0xf0]  ;;  %v5102_v7 = vld [vmem:[#allocation11 + $0x3a8] sm:$0xf] }
  0xd7   :  { %v521_v58 = vpop.f32.mrf.mxu3  ;;  %v495_v60 = vpop.f32.mrf.mxu1  ;;  %v482_v63 = vadd.f32 %v481_v59, %v273_v40  ;;  %v508_v1 = vadd.f32 %v507_v57, %v299_v36  ;;  %v6601_v40 = vld [vmem:[#allocation11 + $0xb4] sm:$0xf0]  ;;  %v5118_v59 = vld [vmem:[#allocation11 + $0x3c8] sm:$0xf] }
  0xd8   :  { %v496_v0 = vadd.f32 %v495_v60, %v287_v41  ;;  %v522_v2 = vadd.f32 %v521_v58, %v313_v37  ;;  %v4735_v41 = vor.u32 %v6605_v24, %v4734_v23  ;;  %v4719_v49 = vor.u32 %v6601_v40, %v4718_v35  ;;  %v6701_v60 = vld [vmem:[#allocation11 + $0x3d4] sm:$0xf0]  ;;  %v4798_v23 = vld [vmem:[#allocation11 + $0x148] sm:$0xf] }
  0xd9   :  { %v540_v8 = vadd.f32 %v528_v52, %v482_v63  ;;  %v538_v13 = vadd.f32 %v530_v61, %v508_v1  ;;  %v4847_v58 = vor.u32 %v6633_v44, %v4846_v43  ;;  %v4830_v63 = vld [vmem:[#allocation11 + $0x188] sm:$0xf]  ;;  %v6621_v24 = vld [vmem:[#allocation11 + $0x154] sm:$0xf0] }
  0xda   :  { %v541_v9 = vadd.f32 %v529_v54, %v496_v0  ;;  %v539_v14 = vadd.f32 %v531_v62, %v522_v2  ;;  %v4990_v54 = vld [vmem:[#allocation11 + $0x2c8] sm:$0xf]  ;;  %v6629_v0 = vld [vmem:[#allocation11 + $0x194] sm:$0xf0]  ;;  %v5119_v2 = vor.u32 %v6701_v60, %v5118_v59  ;;  %v4799_v34 = vor.u32 %v6621_v24, %v4798_v23  ;;  %v6631_v23 = vld [vmem:[#allocation11 + $0x1ac] sm:$0xf] }
  0xdb   :  { %vm548_vm6 = vcmp.gt.f32.partialorder %v540_v8, 0.0  ;;  %v556_v11 = vmul.f32 0.2, %v540_v8  ;;  %v554_v36 = vmul.f32 0.2, %v538_v13  ;;  %vm546_vm8 = vcmp.gt.f32.partialorder %v538_v13, 0.0 }
  0xdc   :  { %vm549_vm7 = vcmp.gt.f32.partialorder %v541_v9, 0.0  ;;  %v557_v12 = vmul.f32 0.2, %v541_v9  ;;  %v555_v37 = vmul.f32 0.2, %v539_v14  ;;  %vm547_vm9 = vcmp.gt.f32.partialorder %v539_v14, 0.0 }
  0xdd   :  { %v564_v19 = vsel %vm548_vm6, %v540_v8, %v556_v11  ;;  %v562_v50 = vsel %vm546_vm8, %v538_v13, %v554_v36  ;;  %v4991_v1 = vor.u32 %v6669_v55, %v4990_v54  ;;  %v4831_v5 = vor.u32 %v6629_v0, %v4830_v63  ;;  %v6697_v8 = vld [vmem:[#allocation11 + $0x3b4] sm:$0xf0]  ;;  %v4814_v11 = vld [vmem:[#allocation11 + $0x168] sm:$0xf]  ;;  %v6639_v55 = vld [vmem:[#allocation11 + $0x1ec] sm:$0xf] }
  0xde   :  { %v565_v20 = vsel %vm549_vm7, %v541_v9, %v557_v12  ;;  %v509_v21 = vpop.f32.mrf.mxu2  ;;  %v7514_v28 = vpack.c.bf16 %v564_v19, %v560_v17  ;;  %v563_v51 = vsel %vm547_vm9, %v539_v14, %v555_v37  ;;  %v4686_v9 = vld [vmem:[#allocation11 + $0x68] sm:$0xf]  ;;  %v6625_v12 = vld [vmem:[#allocation11 + $0x174] sm:$0xf0]  ;;  %v4975_v13 = vor.u32 %v6665_v6, %v4974_v3  ;;  %v6603_v3 = vld [vmem:[#allocation11 + $0xcc] sm:$0xf] }
  0xdf   :  { %v523_v22 = vpop.f32.mrf.mxu3  ;;  %v510_v26 = vadd.f32 %v509_v21, %v301_v46  ;;  %v7516_v29 = vpack.c.bf16 %v565_v20, %v561_v18  ;;  %v5103_v14 = vor.u32 %v6697_v8, %v5102_v7  ;;  %v5086_v17 = vld [vmem:[#allocation11 + $0x388] sm:$0xf]  ;;  %v6693_v18 = vld [vmem:[#allocation11 + $0x394] sm:$0xf0]  ;;  %v4687_v19 = vor.u32 %v6593_v10, %v4686_v9  ;;  %v4864_v8 = vld [vmem:[#allocation11 + $0x1d8] sm:$0xf0] }
  0xe0   :  { %v524_v27 = vadd.f32 %v523_v22, %v315_v47  ;;  %1358 = vmatmul.bf16.vlgmr.msra.gmra.mxu0 %v7514_v28  ;;  %v5007_v47 = vor.u32 %v6673_v32, %v5006_v31  ;;  %v4815_v20 = vor.u32 %v6625_v12, %v4814_v11  ;;  %v4670_v21 = vld [vmem:[#allocation11 + $0x48] sm:$0xf]  ;;  %v6589_v22 = vld [vmem:[#allocation11 + $0x54] sm:$0xf0]  ;;  %v4848_v24 = vld [vmem:[#allocation11 + $0x1b8] sm:$0xf0] }
  0xe1   :  { %v542_v38 = vadd.f32 %v530_v61, %v510_v26  ;;  %1372 = vmatmul.bf16.vlgmr.msra.gmra.mxu1 %v7516_v29  ;;  %1462 = vmatpush.bf16.msra.mxu0 %v4751_v15  ;;  %v4702_v61 = vld [vmem:[#allocation11 + $0x88] sm:$0xf]  ;;  %v5087_v26 = vor.u32 %v6693_v18, %v5086_v17  ;;  %v6689_v32 = vld [vmem:[#allocation11 + $0x374] sm:$0xf0]  ;;  %v4671_v33 = vor.u32 %v6589_v22, %v4670_v21  ;;  %v4720_v22 = vld [vmem:[#allocation11 + $0xb8] sm:$0xf0] }
  0xe2   :  { %v543_v39 = vadd.f32 %v531_v62, %v524_v27  ;;  %1476 = vmatpush.bf16.msra.mxu1 %v4879_v16  ;;  %v6597_v62 = vld [vmem:[#allocation11 + $0x94] sm:$0xf0]  ;;  %v4958_v15 = vld [vmem:[#allocation11 + $0x288] sm:$0xf] }
  0xe3   :  { %vm550_vm10 = vcmp.gt.f32.partialorder %v542_v38, 0.0  ;;  %v558_v45 = vmul.f32 0.2, %v542_v38  ;;  %v4703_v4 = vor.u32 %v6597_v62, %v4702_v61  ;;  %v6661_v16 = vld [vmem:[#allocation11 + $0x294] sm:$0xf0] }
  0xe4   :  { %vm551_vm11 = vcmp.gt.f32.partialorder %v543_v39, 0.0  ;;  %v559_v46 = vmul.f32 0.2, %v543_v39  ;;  %v4959_v25 = vor.u32 %v6661_v16, %v4958_v15  ;;  %v4942_v27 = vld [vmem:[#allocation11 + $0x268] sm:$0xf] }
  0xe5   :  { %v566_v52 = vsel %vm550_vm10, %v542_v38, %v558_v45  ;;  %1463 = vmatpush.bf16.msra.mxu0 %v4735_v41  ;;  %v5070_v31 = vld [vmem:[#allocation11 + $0x368] sm:$0xf]  ;;  %v6585_v36 = vld [vmem:[#allocation11 + $0x34] sm:$0xf0]  ;;  %v6703_v15 = vld [vmem:[#allocation11 + $0x3ec] sm:$0xf] }
  0xe6   :  { %v567_v53 = vsel %vm551_vm11, %v543_v39, %v559_v46  ;;  %1477 = vmatpush.bf16.msra.mxu1 %v4863_v42  ;;  %v7520_v56 = vpack.c.bf16 %v566_v52, %v562_v50  ;;  %v4654_v35 = vld [vmem:[#allocation11 + $0x28] sm:$0xf]  ;;  %v6617_v38 = vld [vmem:[#allocation11 + $0x134] sm:$0xf0]  ;;  %v4943_v39 = vor.u32 %v6657_v30, %v4942_v27  ;;  %v5071_v40 = vor.u32 %v6689_v32, %v5070_v31  ;;  %v4752_v52 = vld [vmem:[#allocation11 + $0xf8] sm:$0xf0] }
  0xe7   :  { %v7522_v57 = vpack.c.bf16 %v567_v53, %v563_v51  ;;  %v4782_v37 = vld [vmem:[#allocation11 + $0x128] sm:$0xf]  ;;  %v6653_v42 = vld [vmem:[#allocation11 + $0x254] sm:$0xf0]  ;;  %v4655_v45 = vor.u32 %v6585_v36, %v4654_v35  ;;  %v6607_v51 = vld [vmem:[#allocation11 + $0xec] sm:$0xf] }
  0xe8   :  { %1386 = vmatmul.bf16.vlgmr.msra.gmra.mxu2 %v7520_v56  ;;  %v4926_v41 = vld [vmem:[#allocation11 + $0x248] sm:$0xf]  ;;  %v6685_v44 = vld [vmem:[#allocation11 + $0x354] sm:$0xf0]  ;;  %v4783_v46 = vor.u32 %v6617_v38, %v4782_v37  ;;  %v5136_v16 = vld [vmem:[#allocation11 + $0x3f8] sm:$0xf0] }
  0xe9   :  { %1400 = vmatmul.bf16.vlgmr.msra.gmra.mxu3 %v7522_v57  ;;  %1490 = vmatpush.bf16.msra.mxu2 %v5007_v47  ;;  %v5054_v43 = vld [vmem:[#allocation11 + $0x348] sm:$0xf]  ;;  %v6613_v50 = vld [vmem:[#allocation11 + $0x114] sm:$0xf0]  ;;  %v4927_v53 = vor.u32 %v6653_v42, %v4926_v41  ;;  %v6667_v27 = vld [vmem:[#allocation11 + $0x2cc] sm:$0xf] }
  0xea   :  { %1504 = vmatpush.bf16.msra.mxu3 %v5135_v48  ;;  %1464 = vmatpush.bf16.msra.mxu0 %v4719_v49  ;;  %v4638_v47 = vld [vmem:[#allocation11 + $0x8] sm:$0xf]  ;;  %v6581_v48 = vld [vmem:[#allocation11 + $0x14] sm:$0xf0]  ;;  %v5055_v54 = vor.u32 %v6685_v44, %v5054_v43  ;;  %v4992_v30 = vld [vmem:[#allocation11 + $0x2d8] sm:$0xf0] }
  0xeb   :  { %1478 = vmatpush.bf16.msra.mxu1 %v4847_v58  ;;  %v4766_v49 = vld [vmem:[#allocation11 + $0x108] sm:$0xf]  ;;  %v4880_v58 = vld [vmem:[#allocation11 + $0x1f8] sm:$0xf0]  ;;  %v6649_v60 = vld [vmem:[#allocation11 + $0x234] sm:$0xf0]  ;;  %v4639_v63 = vor.u32 %v6581_v48, %v4638_v47 }
  0xec   :  { %v4910_v59 = vld [vmem:[#allocation11 + $0x228] sm:$0xf]  ;;  %v6681_v62 = vld [vmem:[#allocation11 + $0x334] sm:$0xf0]  ;;  %v4767_v0 = vor.u32 %v6613_v50, %v4766_v49  ;;  %v6699_v31 = vld [vmem:[#allocation11 + $0x3cc] sm:$0xf] }
  0xed   :  { %1491 = vmatpush.bf16.msra.mxu2 %v4991_v1  ;;  %v5038_v61 = vld [vmem:[#allocation11 + $0x328] sm:$0xf]  ;;  %v4755_v1 = vor.u32 %v6607_v51, %v4752_v52  ;;  %v4911_v6 = vor.u32 %v6649_v60, %v4910_v59  ;;  %v6645_v10 = vld [vmem:[#allocation11 + $0x214] sm:$0xf0]  ;;  %v5120_v32 = vld [vmem:[#allocation11 + $0x3d8] sm:$0xf0] }
  0xee   :  { %1505 = vmatpush.bf16.msra.mxu3 %v5119_v2  ;;  %1465 = vmatpush.bf16.msra.mxu0 %v4703_v4  ;;  %v4883_v2 = vor.u32 %v6639_v55, %v4880_v58  ;;  %v4736_v4 = vld [vmem:[#allocation11 + $0xd8] sm:$0xf0]  ;;  %v5039_v7 = vor.u32 %v6681_v62, %v5038_v61  ;;  %v4894_v9 = vld [vmem:[#allocation11 + $0x208] sm:$0xf]  ;;  %v6677_v12 = vld [vmem:[#allocation11 + $0x314] sm:$0xf0] }
  0xef   :  { %1479 = vmatpush.bf16.msra.mxu1 %v4831_v5  ;;  %v6635_v5 = vld [vmem:[#allocation11 + $0x1cc] sm:$0xf]  ;;  %v5022_v11 = vld [vmem:[#allocation11 + $0x308] sm:$0xf]  ;;  %v4739_v17 = vor.u32 %v6603_v3, %v4736_v4  ;;  %v4704_v36 = vld [vmem:[#allocation11 + $0x98] sm:$0xf0] }
  0xf0   :  { %1414 = vmatmul.bf16.vlgmr.msrb.gmra.mxu0 %v7514_v28  ;;  %v4867_v18 = vor.u32 %v6635_v5, %v4864_v8  ;;  %v5023_v21 = vor.u32 %v6677_v12, %v5022_v11  ;;  %v6595_v35 = vld [vmem:[#allocation11 + $0x8c] sm:$0xf]  ;;  %v4832_v38 = vld [vmem:[#allocation11 + $0x198] sm:$0xf0] }
  0xf1   :  { %1492 = vmatpush.bf16.msra.mxu2 %v4975_v13  ;;  %1428 = vmatmul.bf16.vlgmr.msrb.gmra.mxu1 %v7516_v29  ;;  %v6671_v13 = vld [vmem:[#allocation11 + $0x2ec] sm:$0xf]  ;;  %v4976_v42 = vld [vmem:[#allocation11 + $0x2b8] sm:$0xf0] }
  0xf2   :  { %1506 = vmatpush.bf16.msra.mxu3 %v5103_v14  ;;  %1466 = vmatpush.bf16.msra.mxu0 %v4687_v19  ;;  %v5008_v14 = vld [vmem:[#allocation11 + $0x2f8] sm:$0xf0]  ;;  %v6599_v19 = vld [vmem:[#allocation11 + $0xac] sm:$0xf] }
  0xf3   :  { %1480 = vmatpush.bf16.msra.mxu1 %v4815_v20  ;;  %v4895_v20 = vor.u32 %v6645_v10, %v4894_v9  ;;  %v6627_v37 = vld [vmem:[#allocation11 + $0x18c] sm:$0xf]  ;;  %v5104_v44 = vld [vmem:[#allocation11 + $0x3b8] sm:$0xf0] }
  0xf4   :  { %v6663_v41 = vld [vmem:[#allocation11 + $0x2ac] sm:$0xf]  ;;  %v4688_v48 = vld [vmem:[#allocation11 + $0x78] sm:$0xf0] }
  0xf5   :  { %1493 = vmatpush.bf16.msra.mxu2 %v4959_v25  ;;  %v5011_v25 = vor.u32 %v6671_v13, %v5008_v14  ;;  %v6695_v43 = vld [vmem:[#allocation11 + $0x3ac] sm:$0xf]  ;;  %v4816_v50 = vld [vmem:[#allocation11 + $0x178] sm:$0xf0]  ;;  %v4979_v51 = vor.u32 %v6663_v41, %v4976_v42  ;;  %v5238_v41 = vld [vmem:[#allocation14 + $0xc0] sm:$0xf] }
  0xf6   :  { %1507 = vmatpush.bf16.msra.mxu3 %v5087_v26  ;;  %1467 = vmatpush.bf16.msra.mxu0 %v4671_v33  ;;  %v5139_v26 = vor.u32 %v6703_v15, %v5136_v16  ;;  %v4723_v33 = vor.u32 %v6599_v19, %v4720_v22  ;;  %v6591_v47 = vld [vmem:[#allocation11 + $0x6c] sm:$0xf]  ;;  %v5107_v52 = vor.u32 %v6695_v43, %v5104_v44  ;;  %v5088_v58 = vld [vmem:[#allocation11 + $0x398] sm:$0xf0] }
  0xf7   :  { %1481 = vmatpush.bf16.msra.mxu1 %v4799_v34  ;;  %v4851_v34 = vor.u32 %v6631_v23, %v4848_v24  ;;  %v6623_v49 = vld [vmem:[#allocation11 + $0x16c] sm:$0xf]  ;;  %v4691_v59 = vor.u32 %v6591_v47, %v4688_v48  ;;  %v4672_v62 = vld [vmem:[#allocation11 + $0x58] sm:$0xf0]  ;;  %v6764_v47 = vld [vmem:[#allocation14 + $0x1cc] sm:$0xf0] }
  0xf8   :  { %1442 = vmatmul.bf16.vlgmr.msrb.gmra.mxu2 %v7520_v56  ;;  %v6691_v55 = vld [vmem:[#allocation11 + $0x38c] sm:$0xf]  ;;  %v4819_v60 = vor.u32 %v6623_v49, %v4816_v50  ;;  %v4944_v4 = vld [vmem:[#allocation11 + $0x278] sm:$0xf0] }
  0xf9   :  { %1456 = vmatmul.bf16.vlgmr.msrb.gmra.mxu3 %v7522_v57  ;;  %1494 = vmatpush.bf16.msra.mxu2 %v4943_v39  ;;  %v4995_v39 = vor.u32 %v6667_v27, %v4992_v30  ;;  %v6587_v61 = vld [vmem:[#allocation11 + $0x4c] sm:$0xf]  ;;  %v4656_v10 = vld [vmem:[#allocation11 + $0x38] sm:$0xf0] }
  0xfa   :  { %1508 = vmatpush.bf16.msra.mxu3 %v5071_v40  ;;  %1468 = vmatpush.bf16.msra.mxu0 %v4655_v45  ;;  %v5123_v40 = vor.u32 %v6699_v31, %v5120_v32  ;;  %v4707_v45 = vor.u32 %v6595_v35, %v4704_v36  ;;  %v6655_v3 = vld [vmem:[#allocation11 + $0x26c] sm:$0xf]  ;;  %v4784_v12 = vld [vmem:[#allocation11 + $0x138] sm:$0xf0]  ;;  %v6736_v31 = vld [vmem:[#allocation14 + $0xec] sm:$0xf0] }
  0xfb   :  { %1482 = vmatpush.bf16.msra.mxu1 %v4783_v46  ;;  %v4835_v46 = vor.u32 %v6627_v37, %v4832_v38  ;;  %v6687_v5 = vld [vmem:[#allocation11 + $0x36c] sm:$0xf]  ;;  %v4947_v13 = vor.u32 %v6655_v3, %v4944_v4  ;;  %v4928_v16 = vld [vmem:[#allocation11 + $0x258] sm:$0xf0]  ;;  %v5382_v32 = vld [vmem:[#allocation14 + $0x1e0] sm:$0xf] }
  0xfc   :  { %v6583_v9 = vld [vmem:[#allocation11 + $0x2c] sm:$0xf]  ;;  %v4640_v22 = vld [vmem:[#allocation11 + $0x18] sm:$0xf0]  ;;  %v5174_v3 = vld [vmem:[#allocation14 + $0x40] sm:$0xf] }
  0xfd   :  { %1495 = vmatpush.bf16.msra.mxu2 %v4927_v53  ;;  %v6659_v53 = vld [vmem:[#allocation11 + $0x28c] sm:$0xf]  ;;  %v4659_v19 = vor.u32 %v6583_v9, %v4656_v10  ;;  %v4768_v24 = vld [vmem:[#allocation11 + $0x118] sm:$0xf0]  ;;  %v6716_v4 = vld [vmem:[#allocation14 + $0x4c] sm:$0xf0] }
  0xfe   :  { %1509 = vmatpush.bf16.msra.mxu3 %v5055_v54  ;;  %1469 = vmatpush.bf16.msra.mxu0 %v4639_v63  ;;  %v4960_v54 = vld [vmem:[#allocation11 + $0x298] sm:$0xf0]  ;;  %v6619_v63 = vld [vmem:[#allocation11 + $0x14c] sm:$0xf]  ;;  %v5142_v9 = vld [vmem:[#allocation14] sm:$0xf] }
  0xff   :  { %1483 = vmatpush.bf16.msra.mxu1 %v4767_v0  ;;  %v4800_v0 = vld [vmem:[#allocation11 + $0x158] sm:$0xf0]  ;;  %v6615_v11 = vld [vmem:[#allocation11 + $0x12c] sm:$0xf]  ;;  %v5334_v10 = vld [vmem:[#allocation14 + $0x180] sm:$0xf] }
 0x100   :  { %v4803_v8 = vor.u32 %v6619_v63, %v4800_v0  ;;  %v6651_v15 = vld [vmem:[#allocation11 + $0x24c] sm:$0xf]  ;;  %v5040_v36 = vld [vmem:[#allocation11 + $0x338] sm:$0xf0]  ;;  %v5206_v63 = vld [vmem:[#allocation14 + $0x80] sm:$0xf] }
 0x101   :  { %1496 = vmatpush.bf16.msra.mxu2 %v4911_v6  ;;  %1470 = vmatmul.bf16.vlgmr.msra.gmra.mxu0 %v7514_v28  ;;  %v5072_v6 = vld [vmem:[#allocation11 + $0x378] sm:$0xf0]  ;;  %v6611_v23 = vld [vmem:[#allocation11 + $0x10c] sm:$0xf]  ;;  %v4931_v27 = vor.u32 %v6651_v15, %v4928_v16  ;;  %v6724_v0 = vld [vmem:[#allocation14 + $0x8c] sm:$0xf0] }
 0x102   :  { %1518 = vmatpush.bf16.msrb.mxu0 %v4755_v1  ;;  %1510 = vmatpush.bf16.msra.mxu3 %v5039_v7  ;;  %v4963_v1 = vor.u32 %v6659_v53, %v4960_v54  ;;  %v4675_v7 = vor.u32 %v6587_v61, %v4672_v62  ;;  %v5075_v14 = vor.u32 %v6687_v5, %v5072_v6  ;;  %v6679_v35 = vld [vmem:[#allocation11 + $0x32c] sm:$0xf]  ;;  %v4896_v48 = vld [vmem:[#allocation11 + $0x218] sm:$0xf0]  ;;  %v5158_v6 = vld [vmem:[#allocation14 + $0x20] sm:$0xf] }
 0x103   :  { %1532 = vmatpush.bf16.msrb.mxu1 %v4883_v2  ;;  %v5091_v2 = vor.u32 %v6691_v55, %v5088_v58  ;;  %v4771_v38 = vor.u32 %v6611_v23, %v4768_v24  ;;  %v5043_v44 = vor.u32 %v6679_v35, %v5040_v36  ;;  %v6675_v49 = vld [vmem:[#allocation11 + $0x30c] sm:$0xf]  ;;  %v5024_v50 = vld [vmem:[#allocation11 + $0x318] sm:$0xf0]  ;;  %v5222_v55 = vld [vmem:[#allocation14 + $0xa0] sm:$0xf]  ;;  %v5175_v5 = vor.u32 %v6716_v4, %v5174_v3 }
 0x104   :  { %1484 = vmatmul.bf16.vlgmr.msra.gmra.mxu1 %v7516_v29  ;;  %v5027_v54 = vor.u32 %v6675_v49, %v5024_v50  ;;  %v6728_v58 = vld [vmem:[#allocation14 + $0xac] sm:$0xf0]  ;;  %v5318_v16 = vld [vmem:[#allocation14 + $0x160] sm:$0xf]  ;;  %v6718_v50 = vld [vmem:[#allocation14 + $0x64] sm:$0xf] }
 0x105   :  { %1497 = vmatpush.bf16.msra.mxu2 %v4895_v20  ;;  %v4787_v20 = vor.u32 %v6615_v11, %v4784_v12  ;;  %v5223_v61 = vor.u32 %v6728_v58, %v5222_v55  ;;  %v6756_v11 = vld [vmem:[#allocation14 + $0x18c] sm:$0xf0]  ;;  %v6734_v12 = vld [vmem:[#allocation14 + $0xe4] sm:$0xf]  ;;  %v5286_v36 = vld [vmem:[#allocation14 + $0x120] sm:$0xf] }
 0x106   :  { %1519 = vmatpush.bf16.msrb.mxu0 %v4739_v17  ;;  %1511 = vmatpush.bf16.msra.mxu3 %v5023_v21  ;;  %v6683_v17 = vld [vmem:[#allocation11 + $0x34c] sm:$0xf]  ;;  %v6788_v49 = vld [vmem:[#allocation14 + $0x28c] sm:$0xf0]  ;;  %v5384_v55 = vld [vmem:[#allocation14 + $0x1f0] sm:$0xf0] }
 0x107   :  { %1533 = vmatpush.bf16.msrb.mxu1 %v4867_v18  ;;  %v5056_v18 = vld [vmem:[#allocation11 + $0x358] sm:$0xf0]  ;;  %v6579_v21 = vld [vmem:[#allocation11 + $0xc] sm:$0xf]  ;;  %v6780_v3 = vld [vmem:[#allocation14 + $0x24c] sm:$0xf0] }
 0x108   :  { %1498 = vmatmul.bf16.vlgmr.msra.gmra.mxu2 %v7520_v56  ;;  %v5059_v30 = vor.u32 %v6683_v17, %v5056_v18  ;;  %v4643_v37 = vor.u32 %v6579_v21, %v4640_v22  ;;  %v6752_v17 = vld [vmem:[#allocation14 + $0x16c] sm:$0xf0]  ;;  %v5510_v18 = vld [vmem:[#allocation14 + $0x2e0] sm:$0xf]  ;;  %v6730_v21 = vld [vmem:[#allocation14 + $0xc4] sm:$0xf] }
 0x109   :  { %1546 = vmatpush.bf16.msrb.mxu2 %v5011_v25  ;;  %1512 = vmatmul.bf16.vlgmr.msra.gmra.mxu3 %v7522_v57  ;;  %v6647_v25 = vld [vmem:[#allocation11 + $0x22c] sm:$0xf]  ;;  %v5240_v22 = vld [vmem:[#allocation14 + $0xd0] sm:$0xf0] }
 0x10a   :  { %1560 = vmatpush.bf16.msrb.mxu3 %v5139_v26  ;;  %1520 = vmatpush.bf16.msrb.mxu0 %v4723_v33  ;;  %v5254_v26 = vld [vmem:[#allocation14 + $0xe0] sm:$0xf]  ;;  %v6768_v33 = vld [vmem:[#allocation14 + $0x1ec] sm:$0xf0]  ;;  %v5243_v24 = vor.u32 %v6730_v21, %v5240_v22 }
 0x10b   :  { %1534 = vmatpush.bf16.msrb.mxu1 %v4851_v34  ;;  %v4912_v34 = vld [vmem:[#allocation11 + $0x238] sm:$0xf0]  ;;  %v5383_v42 = vor.u32 %v6768_v33, %v5382_v32  ;;  %v6726_v32 = vld [vmem:[#allocation14 + $0xa4] sm:$0xf]  ;;  %v5224_v33 = vld [vmem:[#allocation14 + $0xb0] sm:$0xf0] }
 0x10c   :  { %v4915_v43 = vor.u32 %v6647_v25, %v4912_v34  ;;  %v5302_v25 = vld [vmem:[#allocation14 + $0x140] sm:$0xf]  ;;  %v5227_v35 = vor.u32 %v6726_v32, %v5224_v33 }
 0x10d   :  { %1547 = vmatpush.bf16.msrb.mxu2 %v4995_v39  ;;  %v6643_v39 = vld [vmem:[#allocation11 + $0x20c] sm:$0xf] }
 0x10e   :  { %1561 = vmatpush.bf16.msrb.mxu3 %v5123_v40  ;;  %1521 = vmatpush.bf16.msrb.mxu0 %v4707_v45  ;;  %v5255_v40 = vor.u32 %v6736_v31, %v5254_v26  ;;  %v6732_v45 = vld [vmem:[#allocation14 + $0xcc] sm:$0xf0]  ;;  %v4899_v53 = vor.u32 %v6643_v39, %v4896_v48 }
 0x10f   :  { %1535 = vmatpush.bf16.msrb.mxu1 %v4835_v46  ;;  %v5366_v46 = vld [vmem:[#allocation14 + $0x1c0] sm:$0xf]  ;;  %v6748_v26 = vld [vmem:[#allocation14 + $0x14c] sm:$0xf0] }
 0x110   :  { %v6796_v31 = vld [vmem:[#allocation14 + $0x2cc] sm:$0xf0] }
 0x111   :  { %1548 = vmatpush.bf16.msrb.mxu2 %v4979_v51  ;;  %v5239_v51 = vor.u32 %v6732_v45, %v5238_v41  ;;  %v6722_v41 = vld [vmem:[#allocation14 + $0x84] sm:$0xf]  ;;  %v5270_v45 = vld [vmem:[#allocation14 + $0x100] sm:$0xf] }
 0x112   :  { %1562 = vmatpush.bf16.msrb.mxu3 %v5107_v52  ;;  %1522 = vmatpush.bf16.msrb.mxu0 %v4691_v59  ;;  %v5367_v52 = vor.u32 %v6764_v47, %v5366_v46  ;;  %v5350_v59 = vld [vmem:[#allocation14 + $0x1a0] sm:$0xf]  ;;  %v6740_v46 = vld [vmem:[#allocation14 + $0x10c] sm:$0xf0] }
 0x113   :  { %1536 = vmatpush.bf16.msrb.mxu1 %v4819_v60  ;;  %v6760_v60 = vld [vmem:[#allocation14 + $0x1ac] sm:$0xf0]  ;;  %v5462_v47 = vld [vmem:[#allocation14 + $0x280] sm:$0xf]  ;;  %v5271_v48 = vor.u32 %v6740_v46, %v5270_v45 }
 0x114   :  { %v5351_v62 = vor.u32 %v6760_v60, %v5350_v59  ;;  %v5446_v59 = vld [vmem:[#allocation14 + $0x260] sm:$0xf]  ;;  %v6784_v60 = vld [vmem:[#allocation14 + $0x26c] sm:$0xf0] }
 0x115   :  { %1549 = vmatpush.bf16.msrb.mxu2 %v4963_v1  ;;  %v5207_v1 = vor.u32 %v6724_v0, %v5206_v63  ;;  %v5176_v63 = vld [vmem:[#allocation14 + $0x50] sm:$0xf0]  ;;  %v6762_v0 = vld [vmem:[#allocation14 + $0x1c4] sm:$0xf]  ;;  %v5606_v45 = vld [vmem:[#allocation14 + $0x3a0] sm:$0xf] }
 0x116   :  { %1563 = vmatpush.bf16.msrb.mxu3 %v5091_v2  ;;  %1523 = vmatpush.bf16.msrb.mxu0 %v4675_v7  ;;  %v6712_v7 = vld [vmem:[#allocation14 + $0x2c] sm:$0xf0] }
 0x117   :  { %1537 = vmatpush.bf16.msrb.mxu1 %v4803_v8  ;;  %v5159_v8 = vor.u32 %v6712_v7, %v5158_v6  ;;  %v5160_v6 = vld [vmem:[#allocation14 + $0x30] sm:$0xf0]  ;;  %v6758_v7 = vld [vmem:[#allocation14 + $0x1a4] sm:$0xf]  ;;  %v6824_v46 = vld [vmem:[#allocation14 + $0x3ac] sm:$0xf0] }
 0x119   :  { %1550 = vmatpush.bf16.msrb.mxu2 %v4947_v13  ;;  %v5256_v13 = vld [vmem:[#allocation14 + $0xf0] sm:$0xf0] }
 0x11a   :  { %1564 = vmatpush.bf16.msrb.mxu3 %v5075_v14  ;;  %1524 = vmatpush.bf16.msrb.mxu0 %v4659_v19  ;;  %v5335_v14 = vor.u32 %v6756_v11, %v5334_v10  ;;  %v5259_v15 = vor.u32 %v6734_v12, %v5256_v13  ;;  %v5319_v19 = vor.u32 %v6752_v17, %v5318_v16  ;;  %v5414_v10 = vld [vmem:[#allocation14 + $0x220] sm:$0xf]  ;;  %v6706_v12 = vld [vmem:[#allocation14 + $0x4] sm:$0xf]  ;;  %v5144_v13 = vld [vmem:[#allocation14 + $0x10] sm:$0xf0] }
 0x11b   :  { %1538 = vmatpush.bf16.msrb.mxu1 %v4787_v20  ;;  %v6800_v20 = vld [vmem:[#allocation14 + $0x2ec] sm:$0xf0]  ;;  %v5336_v16 = vld [vmem:[#allocation14 + $0x190] sm:$0xf0] }
 0x11c   :  { %v5511_v23 = vor.u32 %v6800_v20, %v5510_v18  ;;  %v5398_v18 = vld [vmem:[#allocation14 + $0x200] sm:$0xf] }
 0x11d   :  { %1551 = vmatpush.bf16.msrb.mxu2 %v4931_v27  ;;  %v5494_v27 = vld [vmem:[#allocation14 + $0x2c0] sm:$0xf] }
 0x11e   :  { %1565 = vmatpush.bf16.msrb.mxu3 %v5059_v30  ;;  %1525 = vmatpush.bf16.msrb.mxu0 %v4643_v37  ;;  %v5303_v30 = vor.u32 %v6748_v26, %v5302_v25  ;;  %v5495_v34 = vor.u32 %v6796_v31, %v5494_v27  ;;  %v6744_v37 = vld [vmem:[#allocation14 + $0x12c] sm:$0xf0]  ;;  %v5638_v20 = vld [vmem:[#allocation14 + $0x3e0] sm:$0xf]  ;;  %v5320_v25 = vld [vmem:[#allocation14 + $0x170] sm:$0xf0] }
 0x11f   :  { %1539 = vmatpush.bf16.msrb.mxu1 %v4771_v38  ;;  %v5478_v38 = vld [vmem:[#allocation14 + $0x2a0] sm:$0xf]  ;;  %v5287_v39 = vor.u32 %v6744_v37, %v5286_v36  ;;  %v5512_v31 = vld [vmem:[#allocation14 + $0x2f0] sm:$0xf0]  ;;  %v6828_v36 = vld [vmem:[#allocation14 + $0x3cc] sm:$0xf0] }
 0x121   :  { %1552 = vmatpush.bf16.msrb.mxu2 %v4915_v43  ;;  %1526 = vmatmul.bf16.vlgmr.msrb.gmra.mxu0 %v7514_v28  ;;  %v5190_v28 = vld [vmem:[#allocation14 + $0x60] sm:$0xf] }
 0x122   :  { %2380 = vmatpush.bf16.msra.mxu0 %v5255_v40  ;;  %1566 = vmatpush.bf16.msrb.mxu3 %v5043_v44  ;;  %v6792_v40 = vld [vmem:[#allocation14 + $0x2ac] sm:$0xf0] }
 0x123   :  { %2394 = vmatpush.bf16.msra.mxu1 %v5383_v42  ;;  %v5208_v42 = vld [vmem:[#allocation14 + $0x90] sm:$0xf0]  ;;  %v5479_v43 = vor.u32 %v6792_v40, %v5478_v38  ;;  %v6746_v38 = vld [vmem:[#allocation14 + $0x144] sm:$0xf] }
 0x124   :  { %1540 = vmatmul.bf16.vlgmr.msrb.gmra.mxu1 %v7516_v29  ;;  %v6720_v29 = vld [vmem:[#allocation14 + $0x6c] sm:$0xf0]  ;;  %v5211_v44 = vor.u32 %v6722_v41, %v5208_v42  ;;  %v6794_v40 = vld [vmem:[#allocation14 + $0x2c4] sm:$0xf]  ;;  %v5496_v42 = vld [vmem:[#allocation14 + $0x2d0] sm:$0xf0] }
 0x125   :  { %1553 = vmatpush.bf16.msrb.mxu2 %v4899_v53  ;;  %v5191_v2 = vor.u32 %v6720_v29, %v5190_v28  ;;  %v5368_v28 = vld [vmem:[#allocation14 + $0x1d0] sm:$0xf0] }
 0x126   :  { %2381 = vmatpush.bf16.msra.mxu0 %v5239_v51  ;;  %1567 = vmatpush.bf16.msrb.mxu3 %v5027_v54  ;;  %v5192_v51 = vld [vmem:[#allocation14 + $0x70] sm:$0xf0]  ;;  %v6766_v54 = vld [vmem:[#allocation14 + $0x1e4] sm:$0xf]  ;;  %v5371_v29 = vor.u32 %v6762_v0, %v5368_v28 }
 0x127   :  { %2395 = vmatpush.bf16.msra.mxu1 %v5367_v52  ;;  %v5463_v52 = vor.u32 %v6788_v49, %v5462_v47  ;;  %v5195_v53 = vor.u32 %v6718_v50, %v5192_v51  ;;  %v5387_v58 = vor.u32 %v6766_v54, %v5384_v55  ;;  %v6742_v49 = vld [vmem:[#allocation14 + $0x124] sm:$0xf]  ;;  %v5288_v50 = vld [vmem:[#allocation14 + $0x130] sm:$0xf0] }
 0x128   :  { %1554 = vmatmul.bf16.vlgmr.msrb.gmra.mxu2 %v7520_v56  ;;  %v6708_v56 = vld [vmem:[#allocation14 + $0xc] sm:$0xf0]  ;;  %v6790_v51 = vld [vmem:[#allocation14 + $0x2a4] sm:$0xf] }
 0x129   :  { %1568 = vmatmul.bf16.vlgmr.msrb.gmra.mxu3 %v7522_v57  ;;  %v5143_v57 = vor.u32 %v6708_v56, %v5142_v9  ;;  %2408 = vmatpush.bf16.msra.mxu2 %v5511_v23  ;;  %v5352_v9 = vld [vmem:[#allocation14 + $0x1b0] sm:$0xf0]  ;;  %v6832_v23 = vld [vmem:[#allocation14 + $0x3ec] sm:$0xf0]  ;;  %v6786_v0 = vld [vmem:[#allocation14 + $0x284] sm:$0xf] }
 0x12a   :  { %2382 = vmatpush.bf16.msra.mxu0 %v5223_v61  ;;  %v5447_v61 = vor.u32 %v6784_v60, %v5446_v59  ;;  %v5355_v56 = vor.u32 %v6758_v7, %v5352_v9  ;;  %v5639_v26 = vor.u32 %v6832_v23, %v5638_v20  ;;  %v6820_v59 = vld [vmem:[#allocation14 + $0x38c] sm:$0xf0] }
 0x12b   :  { %2396 = vmatpush.bf16.msra.mxu1 %v5351_v62  ;;  %v6714_v62 = vld [vmem:[#allocation14 + $0x44] sm:$0xf] }
 0x12c   :  { %2422 = vmatpush.bf16.msra.mxu3 %v5639_v26  ;;  %v6808_v26 = vld [vmem:[#allocation14 + $0x32c] sm:$0xf0] }
 0x12d   :  { %2409 = vmatpush.bf16.msra.mxu2 %v5495_v34  ;;  %v7538_v34 = vld [vmem:[#allocation13] sm:$0xf] }
 0x12e   :  { %2383 = vmatpush.bf16.msra.mxu0 %v5207_v1  ;;  %v5179_v1 = vor.u32 %v6714_v62, %v5176_v63  ;;  %v6738_v62 = vld [vmem:[#allocation14 + $0x104] sm:$0xf]  ;;  %v5272_v63 = vld [vmem:[#allocation14 + $0x110] sm:$0xf0] }
 0x12f   :  { %2397 = vmatpush.bf16.msra.mxu1 %v5335_v14  ;;  %v6754_v14 = vld [vmem:[#allocation14 + $0x184] sm:$0xf] }
 0x130   :  { %v5339_v17 = vor.u32 %v6754_v14, %v5336_v16 }
 0x131   :  { %2410 = vmatpush.bf16.msra.mxu2 %v5479_v43  ;;  %v702_v43 = vperm.slane %v7538_v34, 0 }
 0x132   :  { %2384 = vmatpush.bf16.msra.mxu0 %v5191_v2  ;;  %v5430_v2 = vld [vmem:[#allocation14 + $0x240] sm:$0xf] }
 0x133   :  { %2398 = vmatpush.bf16.msra.mxu1 %v5319_v19  ;;  %v5431_v4 = vor.u32 %v6780_v3, %v5430_v2  ;;  %v6772_v19 = vld [vmem:[#allocation14 + $0x20c] sm:$0xf0]  ;;  %v5464_v2 = vld [vmem:[#allocation14 + $0x290] sm:$0xf0] }
 0x134   :  { %v5399_v22 = vor.u32 %v6772_v19, %v5398_v18  ;;  %v5432_v18 = vld [vmem:[#allocation14 + $0x250] sm:$0xf0] }
 0x135   :  { %2411 = vmatpush.bf16.msra.mxu2 %v5463_v52  ;;  %v5291_v52 = vor.u32 %v6742_v49, %v5288_v50 }
 0x136   :  { %2385 = vmatpush.bf16.msra.mxu0 %v5175_v5  ;;  %v6710_v5 = vld [vmem:[#allocation14 + $0x24] sm:$0xf] }
 0x137   :  { %2399 = vmatpush.bf16.msra.mxu1 %v5303_v30  ;;  %v6798_v30 = vld [vmem:[#allocation14 + $0x2e4] sm:$0xf] }
 0x138   :  { %v5515_v33 = vor.u32 %v6798_v30, %v5512_v31 }
 0x139   :  { %2412 = vmatpush.bf16.msra.mxu2 %v5447_v61 }
 0x13a   :  { %2386 = vmatpush.bf16.msra.mxu0 %v5159_v8  ;;  %v5163_v8 = vor.u32 %v6710_v5, %v5160_v6  ;;  %v5574_v5 = vld [vmem:[#allocation14 + $0x360] sm:$0xf]  ;;  %v6816_v6 = vld [vmem:[#allocation14 + $0x36c] sm:$0xf0] }
 0x13b   :  { %2400 = vmatpush.bf16.msra.mxu1 %v5287_v39  ;;  %v5304_v39 = vld [vmem:[#allocation14 + $0x150] sm:$0xf0]  ;;  %v5575_v9 = vor.u32 %v6816_v6, %v5574_v5 }
 0x13c   :  { %v5307_v41 = vor.u32 %v6746_v38, %v5304_v39 }
 0x13d   :  { %2413 = vmatpush.bf16.msra.mxu2 %v5431_v4  ;;  %v5467_v4 = vor.u32 %v6786_v0, %v5464_v2  ;;  %v5624_v2 = vld [vmem:[#allocation14 + $0x3d0] sm:$0xf0] }
 0x13e   :  { %2387 = vmatpush.bf16.msra.mxu0 %v5143_v57  ;;  %v6776_v57 = vld [vmem:[#allocation14 + $0x22c] sm:$0xf0] }
 0x13f   :  { %2401 = vmatpush.bf16.msra.mxu1 %v5271_v48  ;;  %v5415_v11 = vor.u32 %v6776_v57, %v5414_v10  ;;  %v5607_v48 = vor.u32 %v6824_v46, %v5606_v45  ;;  %v5448_v10 = vld [vmem:[#allocation14 + $0x270] sm:$0xf0]  ;;  %v6804_v46 = vld [vmem:[#allocation14 + $0x30c] sm:$0xf0] }
 0x141   :  { %2414 = vmatpush.bf16.msra.mxu2 %v5415_v11 }
 0x142   :  { %2436 = vmatpush.bf16.msrb.mxu0 %v5259_v15  ;;  %v5147_v15 = vor.u32 %v6706_v12, %v5144_v13  ;;  %v5558_v12 = vld [vmem:[#allocation14 + $0x340] sm:$0xf]  ;;  %v6812_v13 = vld [vmem:[#allocation14 + $0x34c] sm:$0xf0] }
 0x143   :  { %2450 = vmatpush.bf16.msrb.mxu1 %v5387_v58  ;;  %v5590_v58 = vld [vmem:[#allocation14 + $0x380] sm:$0xf]  ;;  %v5559_v16 = vor.u32 %v6812_v13, %v5558_v12 }
 0x144   :  { %v5591_v61 = vor.u32 %v6820_v59, %v5590_v58  ;;  %v5640_v58 = vld [vmem:[#allocation14 + $0x3f0] sm:$0xf0] }
 0x145   :  { %2415 = vmatpush.bf16.msra.mxu2 %v5399_v22  ;;  %v703_v22 = vperm.slane %v7538_v34, 1 }
 0x146   :  { %2437 = vmatpush.bf16.msrb.mxu0 %v5243_v24  ;;  %v6750_v24 = vld [vmem:[#allocation14 + $0x164] sm:$0xf] }
 0x147   :  { %2451 = vmatpush.bf16.msrb.mxu1 %v5371_v29  ;;  %v5323_v27 = vor.u32 %v6750_v24, %v5320_v25  ;;  %v5275_v29 = vor.u32 %v6738_v62, %v5272_v63  ;;  %v5542_v25 = vld [vmem:[#allocation14 + $0x320] sm:$0xf] }
 0x148   :  { %v5543_v31 = vor.u32 %v6808_v26, %v5542_v25 }
 0x149   :  { %2464 = vmatpush.bf16.msrb.mxu2 %v5515_v33  ;;  %v5416_v33 = vld [vmem:[#allocation14 + $0x230] sm:$0xf0] }
 0x14a   :  { %2438 = vmatpush.bf16.msrb.mxu0 %v5227_v35  ;;  %v5622_v35 = vld [vmem:[#allocation14 + $0x3c0] sm:$0xf] }
 0x14b   :  { %2452 = vmatpush.bf16.msrb.mxu1 %v5355_v56  ;;  %v5623_v37 = vor.u32 %v6828_v36, %v5622_v35  ;;  %v6782_v56 = vld [vmem:[#allocation14 + $0x264] sm:$0xf]  ;;  %v5262_v36 = vld [vmem:[#allocation14 + $0xe8] sm:$0xf] }
 0x14c   :  { %v5451_v11 = vor.u32 %v6782_v56, %v5448_v10  ;;  %v6725_v10 = vld [vmem:[#allocation14 + $0x94] sm:$0xf0] }
 0x14d   :  { %2423 = vmatpush.bf16.msra.mxu3 %v5623_v37  ;;  %v6737_v37 = vld [vmem:[#allocation14 + $0xf4] sm:$0xf0] }
 0x14e   :  { %2439 = vmatpush.bf16.msrb.mxu0 %v5211_v44  ;;  %v5499_v44 = vor.u32 %v6794_v40, %v5496_v42  ;;  %v5526_v42 = vld [vmem:[#allocation14 + $0x300] sm:$0xf]  ;;  %v5263_v45 = vor.u32 %v6737_v37, %v5262_v36  ;;  %v6717_v36 = vld [vmem:[#allocation14 + $0x54] sm:$0xf0]  ;;  %v5374_v37 = vld [vmem:[#allocation14 + $0x1c8] sm:$0xf] }
 0x14f   :  { %2453 = vmatpush.bf16.msrb.mxu1 %v5339_v17  ;;  %v6778_v17 = vld [vmem:[#allocation14 + $0x244] sm:$0xf] }
 0x150   :  { %2465 = vmatpush.bf16.msrb.mxu2 %v5499_v44 }
 0x151   :  { %2424 = vmatpush.bf16.msra.mxu3 %v5607_v48  ;;  %v5400_v48 = vld [vmem:[#allocation14 + $0x210] sm:$0xf0] }
 0x152   :  { %2440 = vmatpush.bf16.msrb.mxu0 %v5195_v53  ;;  %v5480_v53 = vld [vmem:[#allocation14 + $0x2b0] sm:$0xf0] }
 0x153   :  { %2454 = vmatpush.bf16.msrb.mxu1 %v5323_v27  ;;  %v5483_v55 = vor.u32 %v6790_v51, %v5480_v53  ;;  %v5527_v53 = vor.u32 %v6804_v46, %v5526_v42  ;;  %v5576_v42 = vld [vmem:[#allocation14 + $0x370] sm:$0xf0] }
 0x155   :  { %2466 = vmatpush.bf16.msrb.mxu2 %v5483_v55  ;;  %2425 = vmatpush.bf16.msra.mxu3 %v5591_v61  ;;  %v6830_v55 = vld [vmem:[#allocation14 + $0x3e4] sm:$0xf] }
 0x156   :  { %2441 = vmatpush.bf16.msrb.mxu0 %v5179_v1 }
 0x157   :  { %2455 = vmatpush.bf16.msrb.mxu1 %v5307_v41  ;;  %v5246_v41 = vld [vmem:[#allocation14 + $0xc8] sm:$0xf] }
 0x159   :  { %2467 = vmatpush.bf16.msrb.mxu2 %v5467_v4  ;;  %2426 = vmatpush.bf16.msra.mxu3 %v5575_v9 }
 0x15a   :  { %2442 = vmatpush.bf16.msrb.mxu0 %v5163_v8 }
 0x15b   :  { %2456 = vmatpush.bf16.msrb.mxu1 %v5291_v52  ;;  %v6733_v52 = vld [vmem:[#allocation14 + $0xd4] sm:$0xf0] }
 0x15c   :  { %v5247_v0 = vor.u32 %v6733_v52, %v5246_v41  ;;  %v6814_v41 = vld [vmem:[#allocation14 + $0x364] sm:$0xf]  ;;  %v5358_v52 = vld [vmem:[#allocation14 + $0x1a8] sm:$0xf] }
 0x15d   :  { %v1359_v21 = vpop.f32.mrf.mxu0  ;;  %2468 = vmatpush.bf16.msrb.mxu2 %v5451_v11  ;;  %2427 = vmatpush.bf16.msra.mxu3 %v5559_v16  ;;  %v5608_v11 = vld [vmem:[#allocation14 + $0x3b0] sm:$0xf0]  ;;  %v6721_v16 = vld [vmem:[#allocation14 + $0x74] sm:$0xf0] }
 0x15e   :  { %2443 = vmatpush.bf16.msrb.mxu0 %v5147_v15  ;;  %v1373_v32 = vpop.f32.mrf.mxu1  ;;  %v1360_v54 = vadd.f32 %v1359_v21, %v702_v43  ;;  %v5435_v21 = vor.u32 %v6778_v17, %v5432_v18 }
 0x15f   :  { %2457 = vmatpush.bf16.msrb.mxu1 %v5275_v29  ;;  %v6826_v29 = vld [vmem:[#allocation14 + $0x3c4] sm:$0xf] }
 0x160   :  { %v1374_v3 = vadd.f32 %v1373_v32, %v1360_v54  ;;  %v6774_v32 = vld [vmem:[#allocation14 + $0x224] sm:$0xf] }
 0x161   :  { %2469 = vmatpush.bf16.msrb.mxu2 %v5435_v21  ;;  %v5419_v38 = vor.u32 %v6774_v32, %v5416_v33  ;;  %2428 = vmatpush.bf16.msra.mxu3 %v5543_v31  ;;  %v6769_v21 = vld [vmem:[#allocation14 + $0x1f4] sm:$0xf0] }
 0x165   :  { %v1361_v47 = vpop.f32.mrf.mxu0  ;;  %2470 = vmatpush.bf16.msrb.mxu2 %v5419_v38  ;;  %2429 = vmatpush.bf16.msra.mxu3 %v5527_v53 }
 0x166   :  { %v1375_v60 = vpop.f32.mrf.mxu1  ;;  %v1362_v7 = vadd.f32 %v1361_v47, %v702_v43  ;;  %v6770_v47 = vld [vmem:[#allocation14 + $0x204] sm:$0xf] }
 0x167   :  { %v5403_v54 = vor.u32 %v6770_v47, %v5400_v48 }
 0x168   :  { %v1376_v14 = vadd.f32 %v1375_v60, %v1362_v7  ;;  %v5643_v60 = vor.u32 %v6830_v55, %v5640_v58  ;;  %v6761_v55 = vld [vmem:[#allocation14 + $0x1b4] sm:$0xf0]  ;;  %v6810_v58 = vld [vmem:[#allocation14 + $0x344] sm:$0xf] }
 0x169   :  { %2471 = vmatpush.bf16.msrb.mxu2 %v5403_v54 }
 0x16a   :  { %2478 = vmatpush.bf16.msrb.mxu3 %v5643_v60 }
 0x16b   :  { %v1387_v1 = vpop.f32.mrf.mxu2 }
 0x16c   :  { %v1401_v28 = vpop.f32.mrf.mxu3  ;;  %v1388_v8 = vadd.f32 %v1387_v1, %v1374_v3  ;;  %v5230_v1 = vld [vmem:[#allocation14 + $0xa8] sm:$0xf]  ;;  %v5627_v3 = vor.u32 %v6826_v29, %v5624_v2 }
 0x16d   :  { %v1415_v57 = vpop.f32.mrf.mxu0 }
 0x16e   :  { %v1402_v15 = vadd.f32 %v1401_v28, %v1388_v8  ;;  %v1429_v23 = vpop.f32.mrf.mxu1  ;;  %v1416_v39 = vadd.f32 %v1415_v57, %v703_v22  ;;  %v6729_v28 = vld [vmem:[#allocation14 + $0xb4] sm:$0xf0]  ;;  %v5214_v8 = vld [vmem:[#allocation14 + $0x88] sm:$0xf]  ;;  %2479 = vmatpush.bf16.msrb.mxu3 %v5627_v3  ;;  %v6822_v57 = vld [vmem:[#allocation14 + $0x3a4] sm:$0xf] }
 0x16f   :  { %v5231_v7 = vor.u32 %v6729_v28, %v5230_v1  ;;  %v5611_v13 = vor.u32 %v6822_v57, %v5608_v11  ;;  %v6709_v1 = vld [vmem:[#allocation14 + $0x14] sm:$0xf0]  ;;  %v5342_v28 = vld [vmem:[#allocation14 + $0x188] sm:$0xf] }
 0x170   :  { %v1582_v27 = vmul.f32 0.2, %v1402_v15  ;;  %vm1574_vm12 = vcmp.gt.f32.partialorder %v1402_v15, 0.0  ;;  %v1430_v59 = vadd.f32 %v1429_v23, %v1416_v39  ;;  %v5592_v23 = vld [vmem:[#allocation14 + $0x390] sm:$0xf0] }
 0x171   :  { %v6757_v3 = vld [vmem:[#allocation14 + $0x194] sm:$0xf0] }
 0x172   :  { %v1590_v43 = vsel %vm1574_vm12, %v1402_v15, %v1582_v27  ;;  %v5198_v15 = vld [vmem:[#allocation14 + $0x68] sm:$0xf]  ;;  %2480 = vmatpush.bf16.msrb.mxu3 %v5611_v13  ;;  %v6753_v13 = vld [vmem:[#allocation14 + $0x174] sm:$0xf0] }
 0x173   :  { %v1389_v19 = vpop.f32.mrf.mxu2  ;;  %v5199_v32 = vor.u32 %v6721_v16, %v5198_v15  ;;  %v6801_v15 = vld [vmem:[#allocation14 + $0x2f4] sm:$0xf0] }
 0x174   :  { %v1403_v20 = vpop.f32.mrf.mxu3  ;;  %v1390_v24 = vadd.f32 %v1389_v19, %v1376_v14  ;;  %v704_v14 = vperm.slane %v7538_v34, 2  ;;  %v5215_v19 = vor.u32 %v6725_v10, %v5214_v8  ;;  %v5264_v8 = vld [vmem:[#allocation14 + $0xf8] sm:$0xf0]  ;;  %v5326_v10 = vld [vmem:[#allocation14 + $0x168] sm:$0xf] }
 0x175   :  { %v1417_v35 = vpop.f32.mrf.mxu0 }
 0x176   :  { %v1404_v30 = vadd.f32 %v1403_v20, %v1390_v24  ;;  %v1418_v61 = vadd.f32 %v1417_v35, %v703_v22  ;;  %v1431_v62 = vpop.f32.mrf.mxu1  ;;  %v5390_v20 = vld [vmem:[#allocation14 + $0x1e8] sm:$0xf]  ;;  %v6818_v22 = vld [vmem:[#allocation14 + $0x384] sm:$0xf] }
 0x177   :  { %v5595_v26 = vor.u32 %v6818_v22, %v5592_v23  ;;  %v5391_v33 = vor.u32 %v6769_v21, %v5390_v20  ;;  %v5182_v35 = vld [vmem:[#allocation14 + $0x48] sm:$0xf]  ;;  %v5528_v20 = vld [vmem:[#allocation14 + $0x310] sm:$0xf0]  ;;  %v6731_v21 = vld [vmem:[#allocation14 + $0xcc] sm:$0xf] }
 0x178   :  { %vm1578_vm13 = vcmp.gt.f32.partialorder %v1404_v30, 0.0  ;;  %v1586_v40 = vmul.f32 0.2, %v1404_v30  ;;  %v1432_v5 = vadd.f32 %v1431_v62, %v1418_v61  ;;  %v5183_v47 = vor.u32 %v6717_v36, %v5182_v35  ;;  %v5248_v22 = vld [vmem:[#allocation14 + $0xd8] sm:$0xf0] }
 0x179   :  { %2481 = vmatpush.bf16.msrb.mxu3 %v5595_v26  ;;  %v5502_v35 = vld [vmem:[#allocation14 + $0x2c8] sm:$0xf] }
 0x17a   :  { %v1594_v44 = vsel %vm1578_vm13, %v1404_v30, %v1586_v40  ;;  %v6765_v40 = vld [vmem:[#allocation14 + $0x1d4] sm:$0xf0] }
 0x17b   :  { %v7542_v49 = vpack.c.bf16 %v1594_v44, %v1590_v43  ;;  %v1443_v50 = vpop.f32.mrf.mxu2  ;;  %v5375_v48 = vor.u32 %v6765_v40, %v5374_v37  ;;  %v6797_v37 = vld [vmem:[#allocation14 + $0x2d4] sm:$0xf0]  ;;  %v5232_v40 = vld [vmem:[#allocation14 + $0xb8] sm:$0xf0] }
 0x17c   :  { %v1457_v51 = vpop.f32.mrf.mxu3  ;;  %v1444_v63 = vadd.f32 %v1443_v50, %v1430_v59  ;;  %v5166_v50 = vld [vmem:[#allocation14 + $0x28] sm:$0xf]  ;;  %v5560_v59 = vld [vmem:[#allocation14 + $0x350] sm:$0xf0] }
 0x17d   :  { %2388 = vmatmul.bf16.vlgmr.msra.gmra.mxu0 %v7542_v49  ;;  %v5563_v60 = vor.u32 %v6810_v58, %v5560_v59  ;;  %v5278_v58 = vld [vmem:[#allocation14 + $0x108] sm:$0xf]  ;;  %v6741_v59 = vld [vmem:[#allocation14 + $0x114] sm:$0xf0] }
 0x17e   :  { %2492 = vmatpush.bf16.msra.mxu0 %v5263_v45  ;;  %v1471_v4 = vpop.f32.mrf.mxu0  ;;  %v1458_v6 = vadd.f32 %v1457_v51, %v1444_v63  ;;  %v5579_v45 = vor.u32 %v6814_v41, %v5576_v42  ;;  %v6713_v51 = vld [vmem:[#allocation14 + $0x34] sm:$0xf0]  ;;  %v5359_v63 = vor.u32 %v6761_v55, %v5358_v52  ;;  %v705_v52 = vperm.slane %v7538_v34, 3 }
 0x17f   :  { %v1472_v27 = vadd.f32 %v1471_v4, %v704_v14  ;;  %v5167_v62 = vor.u32 %v6713_v51, %v5166_v50  ;;  %v6806_v4 = vld [vmem:[#allocation14 + $0x324] sm:$0xf]  ;;  %v6723_v50 = vld [vmem:[#allocation14 + $0x8c] sm:$0xf]  ;;  %v5216_v51 = vld [vmem:[#allocation14 + $0x98] sm:$0xf0] }
 0x180   :  { %v1583_v17 = vmul.f32 0.2, %v1458_v6  ;;  %vm1575_vm14 = vcmp.gt.f32.partialorder %v1458_v6, 0.0  ;;  %2482 = vmatpush.bf16.msrb.mxu3 %v5579_v45  ;;  %v5294_v45 = vld [vmem:[#allocation14 + $0x128] sm:$0xf]  ;;  %v5219_v55 = vor.u32 %v6723_v50, %v5216_v51 }
 0x181   :  { %v1485_v24 = vpop.f32.mrf.mxu1 }
 0x182   :  { %2493 = vmatpush.bf16.msra.mxu0 %v5247_v0  ;;  %v1591_v30 = vsel %vm1575_vm14, %v1458_v6, %v1583_v17  ;;  %v1486_v46 = vadd.f32 %v1485_v24, %v1472_v27  ;;  %v5150_v0 = vld [vmem:[#allocation14 + $0x8] sm:$0xf] }
 0x183   :  { %v1445_v9 = vpop.f32.mrf.mxu2  ;;  %v5151_v11 = vor.u32 %v6709_v1, %v5150_v0  ;;  %v5200_v0 = vld [vmem:[#allocation14 + $0x78] sm:$0xf0] }
 0x184   :  { %v1459_v56 = vpop.f32.mrf.mxu3  ;;  %v1446_v12 = vadd.f32 %v1445_v9, %v1432_v5  ;;  %2483 = vmatpush.bf16.msrb.mxu3 %v5563_v60  ;;  %v5544_v5 = vld [vmem:[#allocation14 + $0x330] sm:$0xf0]  ;;  %v5470_v60 = vld [vmem:[#allocation14 + $0x288] sm:$0xf] }
 0x185   :  { %v5547_v9 = vor.u32 %v6806_v4, %v5544_v5  ;;  %v5454_v5 = vld [vmem:[#allocation14 + $0x268] sm:$0xf] }
 0x186   :  { %v1460_v18 = vadd.f32 %v1459_v56, %v1446_v12  ;;  %2494 = vmatpush.bf16.msra.mxu0 %v5231_v7  ;;  %v1473_v39 = vpop.f32.mrf.mxu0  ;;  %v6735_v7 = vld [vmem:[#allocation14 + $0xec] sm:$0xf]  ;;  %v5343_v12 = vor.u32 %v6757_v3, %v5342_v28 }
 0x187   :  { %v1474_v53 = vadd.f32 %v1473_v39, %v704_v14  ;;  %v5518_v14 = vld [vmem:[#allocation14 + $0x2e8] sm:$0xf]  ;;  %v6727_v39 = vld [vmem:[#allocation14 + $0xac] sm:$0xf] }
 0x188   :  { %vm1579_vm15 = vcmp.gt.f32.partialorder %v1460_v18, 0.0  ;;  %v1587_v25 = vmul.f32 0.2, %v1460_v18  ;;  %2484 = vmatpush.bf16.msrb.mxu3 %v5547_v9  ;;  %v5519_v26 = vor.u32 %v6801_v15, %v5518_v14  ;;  %v6767_v28 = vld [vmem:[#allocation14 + $0x1ec] sm:$0xf] }
 0x189   :  { %v1487_v61 = vpop.f32.mrf.mxu1 }
 0x18a   :  { %v1595_v31 = vsel %vm1579_vm15, %v1460_v18, %v1587_v25  ;;  %2495 = vmatpush.bf16.msra.mxu0 %v5215_v19  ;;  %v1488_v29 = vadd.f32 %v1487_v61, %v1474_v53  ;;  %v5267_v18 = vor.u32 %v6735_v7, %v5264_v8  ;;  %v6802_v19 = vld [vmem:[#allocation14 + $0x304] sm:$0xf]  ;;  %v5327_v25 = vor.u32 %v6753_v13, %v5326_v10  ;;  %v5184_v10 = vld [vmem:[#allocation14 + $0x58] sm:$0xf0] }
 0x18b   :  { %v7546_v38 = vpack.c.bf16 %v1595_v31, %v1591_v30  ;;  %v1499_v43 = vpop.f32.mrf.mxu2  ;;  %v5531_v23 = vor.u32 %v6802_v19, %v5528_v20  ;;  %v5251_v31 = vor.u32 %v6731_v21, %v5248_v22  ;;  %v6711_v20 = vld [vmem:[#allocation14 + $0x2c] sm:$0xf]  ;;  %v5168_v21 = vld [vmem:[#allocation14 + $0x38] sm:$0xf0] }
 0x18c   :  { %v1513_v44 = vpop.f32.mrf.mxu3  ;;  %v1500_v54 = vadd.f32 %v1499_v43, %v1486_v46  ;;  %v5503_v43 = vor.u32 %v6797_v37, %v5502_v35  ;;  %v6745_v46 = vld [vmem:[#allocation14 + $0x134] sm:$0xf0]  ;;  %v6759_v22 = vld [vmem:[#allocation14 + $0x1ac] sm:$0xf] }
 0x18d   :  { %2402 = vmatmul.bf16.vlgmr.msra.gmra.mxu1 %v7546_v38  ;;  %2444 = vmatmul.bf16.vlgmr.msrb.gmra.mxu0 %v7542_v49  ;;  %v5295_v53 = vor.u32 %v6745_v46, %v5294_v45  ;;  %v6777_v35 = vld [vmem:[#allocation14 + $0x234] sm:$0xf0]  ;;  %v6707_v37 = vld [vmem:[#allocation14 + $0xc] sm:$0xf]  ;;  %v5646_v46 = vld [vmem:[#allocation14 + $0x3e8] sm:$0xf] }
 0x18e   :  { %2496 = vmatpush.bf16.msra.mxu0 %v5199_v32  ;;  %2506 = vmatpush.bf16.msra.mxu1 %v5391_v33  ;;  %v1514_v2 = vadd.f32 %v1513_v44, %v1500_v54  ;;  %v5310_v32 = vld [vmem:[#allocation14 + $0x148] sm:$0xf]  ;;  %v6749_v33 = vld [vmem:[#allocation14 + $0x154] sm:$0xf0]  ;;  %v5235_v44 = vor.u32 %v6727_v39, %v5232_v40  ;;  %v5152_v39 = vld [vmem:[#allocation14 + $0x18] sm:$0xf0] }
 0x18f   :  { %2485 = vmatpush.bf16.msrb.mxu3 %v5531_v23  ;;  %v5311_v42 = vor.u32 %v6749_v33, %v5310_v32  ;;  %v5360_v23 = vld [vmem:[#allocation14 + $0x1b8] sm:$0xf0]  ;;  %v6773_v45 = vld [vmem:[#allocation14 + $0x214] sm:$0xf0]  ;;  %v5155_v51 = vor.u32 %v6707_v37, %v5152_v39  ;;  %v6779_v37 = vld [vmem:[#allocation14 + $0x24c] sm:$0xf] }
 0x190   :  { %v1584_v16 = vmul.f32 0.2, %v1514_v2  ;;  %vm1576_vm0 = vcmp.gt.f32.partialorder %v1514_v2, 0.0  ;;  %v5363_v33 = vor.u32 %v6759_v22, %v5360_v23  ;;  %v5440_v39 = vld [vmem:[#allocation14 + $0x258] sm:$0xf0] }
 0x192   :  { %2497 = vmatpush.bf16.msra.mxu0 %v5183_v47  ;;  %2507 = vmatpush.bf16.msra.mxu1 %v5375_v48  ;;  %v1592_v27 = vsel %vm1576_vm0, %v1514_v2, %v1584_v16  ;;  %v5486_v47 = vld [vmem:[#allocation14 + $0x2a8] sm:$0xf]  ;;  %v6793_v48 = vld [vmem:[#allocation14 + $0x2b4] sm:$0xf0]  ;;  %v5279_v2 = vor.u32 %v6741_v59, %v5278_v58  ;;  %v6799_v58 = vld [vmem:[#allocation14 + $0x2ec] sm:$0xf] }
 0x193   :  { %v1501_v6 = vpop.f32.mrf.mxu2  ;;  %v5487_v54 = vor.u32 %v6793_v48, %v5486_v47 }
 0x194   :  { %v1502_v56 = vadd.f32 %v1501_v6, %v1488_v29  ;;  %v1515_v57 = vpop.f32.mrf.mxu3  ;;  %v5392_v29 = vld [vmem:[#allocation14 + $0x1f8] sm:$0xf0]  ;;  %v6785_v6 = vld [vmem:[#allocation14 + $0x274] sm:$0xf0] }
 0x195   :  { %v5395_v9 = vor.u32 %v6767_v28, %v5392_v29  ;;  %v5455_v13 = vor.u32 %v6785_v6, %v5454_v5  ;;  %v6795_v5 = vld [vmem:[#allocation14 + $0x2cc] sm:$0xf]  ;;  %v5504_v6 = vld [vmem:[#allocation14 + $0x2d8] sm:$0xf0] }
 0x196   :  { %2498 = vmatpush.bf16.msra.mxu0 %v5167_v62  ;;  %2508 = vmatpush.bf16.msra.mxu1 %v5359_v63  ;;  %v1516_v17 = vadd.f32 %v1515_v57, %v1502_v56  ;;  %v6789_v62 = vld [vmem:[#allocation14 + $0x294] sm:$0xf0]  ;;  %v6719_v63 = vld [vmem:[#allocation14 + $0x6c] sm:$0xf] }
 0x197   :  { %v5471_v34 = vor.u32 %v6789_v62, %v5470_v60  ;;  %v5203_v4 = vor.u32 %v6719_v63, %v5200_v0  ;;  %v6715_v56 = vld [vmem:[#allocation14 + $0x4c] sm:$0xf]  ;;  %v5520_v60 = vld [vmem:[#allocation14 + $0x2f8] sm:$0xf0] }
 0x198   :  { %vm1580_vm1 = vcmp.gt.f32.partialorder %v1516_v17, 0.0  ;;  %v1588_v24 = vmul.f32 0.2, %v1516_v17  ;;  %v5187_v16 = vor.u32 %v6715_v56, %v5184_v10  ;;  %v5523_v29 = vor.u32 %v6799_v58, %v5520_v60  ;;  %v5614_v56 = vld [vmem:[#allocation14 + $0x3a8] sm:$0xf] }
 0x199   :  { %v6825_v10 = vld [vmem:[#allocation14 + $0x3b4] sm:$0xf0]  ;;  %v5632_v60 = vld [vmem:[#allocation14 + $0x3d8] sm:$0xf0] }
 0x19a   :  { %2499 = vmatpush.bf16.msra.mxu0 %v5151_v11  ;;  %2509 = vmatpush.bf16.msra.mxu1 %v5343_v12  ;;  %v1596_v30 = vsel %vm1580_vm1, %v1516_v17, %v1588_v24  ;;  %v6763_v11 = vld [vmem:[#allocation14 + $0x1cc] sm:$0xf]  ;;  %v5376_v12 = vld [vmem:[#allocation14 + $0x1d8] sm:$0xf0]  ;;  %v5438_v17 = vld [vmem:[#allocation14 + $0x248] sm:$0xf] }
 0x19b   :  { %v7550_v36 = vpack.c.bf16 %v1596_v30, %v1592_v27  ;;  %v5379_v19 = vor.u32 %v6763_v11, %v5376_v12  ;;  %v5171_v30 = vor.u32 %v6711_v20, %v5168_v21  ;;  %v5296_v11 = vld [vmem:[#allocation14 + $0x138] sm:$0xf0]  ;;  %v6791_v12 = vld [vmem:[#allocation14 + $0x2ac] sm:$0xf] }
 0x19c   :  { %v6787_v20 = vld [vmem:[#allocation14 + $0x28c] sm:$0xf]  ;;  %v5472_v21 = vld [vmem:[#allocation14 + $0x298] sm:$0xf0] }
 0x19d   :  { %2458 = vmatmul.bf16.vlgmr.msrb.gmra.mxu1 %v7546_v38  ;;  %2500 = vmatmul.bf16.vlgmr.msra.gmra.mxu0 %v7542_v49 }
 0x19e   :  { %2548 = vmatpush.bf16.msrb.mxu0 %v5267_v18  ;;  %v1527_v41 = vpop.f32.mrf.mxu0  ;;  %2416 = vmatmul.bf16.vlgmr.msra.gmra.mxu2 %v7550_v36  ;;  %v6781_v18 = vld [vmem:[#allocation14 + $0x254] sm:$0xf0] }
 0x19f   :  { %2510 = vmatpush.bf16.msra.mxu1 %v5327_v25  ;;  %2520 = vmatpush.bf16.msra.mxu2 %v5519_v26  ;;  %v1528_v1 = vadd.f32 %v1527_v41, %v705_v52  ;;  %v5439_v25 = vor.u32 %v6781_v18, %v5438_v17  ;;  %v6755_v41 = vld [vmem:[#allocation14 + $0x18c] sm:$0xf]  ;;  %v6821_v17 = vld [vmem:[#allocation14 + $0x394] sm:$0xf0] }
 0x1a0   :  { %v6739_v18 = vld [vmem:[#allocation14 + $0x10c] sm:$0xf] }
 0x1a1   :  { %v1541_v61 = vpop.f32.mrf.mxu1 }
 0x1a2   :  { %2549 = vmatpush.bf16.msrb.mxu0 %v5251_v31  ;;  %v1542_v57 = vadd.f32 %v1541_v61, %v1528_v1  ;;  %v5422_v31 = vld [vmem:[#allocation14 + $0x228] sm:$0xf] }
 0x1a3   :  { %2511 = vmatpush.bf16.msra.mxu1 %v5311_v42  ;;  %2521 = vmatpush.bf16.msra.mxu2 %v5503_v43  ;;  %v5344_v42 = vld [vmem:[#allocation14 + $0x198] sm:$0xf0]  ;;  %v5423_v50 = vor.u32 %v6777_v35, %v5422_v31  ;;  %v6813_v35 = vld [vmem:[#allocation14 + $0x354] sm:$0xf0] }
 0x1a6   :  { %2550 = vmatpush.bf16.msrb.mxu0 %v5235_v44  ;;  %v1529_v3 = vpop.f32.mrf.mxu0  ;;  %v5406_v44 = vld [vmem:[#allocation14 + $0x208] sm:$0xf] }
 0x1a7   :  { %2512 = vmatpush.bf16.msra.mxu1 %v5295_v53  ;;  %2522 = vmatpush.bf16.msra.mxu2 %v5487_v54  ;;  %v1530_v14 = vadd.f32 %v1529_v3, %v705_v52  ;;  %v6833_v52 = vld [vmem:[#allocation14 + $0x3f4] sm:$0xf0]  ;;  %v6751_v53 = vld [vmem:[#allocation14 + $0x16c] sm:$0xf]  ;;  %v5347_v54 = vor.u32 %v6755_v41, %v5344_v42  ;;  %v5407_v61 = vor.u32 %v6773_v45, %v5406_v44  ;;  %v5550_v42 = vld [vmem:[#allocation14 + $0x328] sm:$0xf] }
 0x1a8   :  { %v5647_v0 = vor.u32 %v6833_v52, %v5646_v46  ;;  %v6829_v3 = vld [vmem:[#allocation14 + $0x3d4] sm:$0xf0]  ;;  %v5443_v41 = vor.u32 %v6779_v37, %v5440_v39  ;;  %v6775_v44 = vld [vmem:[#allocation14 + $0x22c] sm:$0xf]  ;;  %v5424_v45 = vld [vmem:[#allocation14 + $0x238] sm:$0xf0] }
 0x1a9   :  { %v1543_v24 = vpop.f32.mrf.mxu1  ;;  %v5408_v52 = vld [vmem:[#allocation14 + $0x218] sm:$0xf0]  ;;  %v6844_v39 = vld [vmem:[#allocation17 + $0x50] sm:$0xf0] }
 0x1aa   :  { %2551 = vmatpush.bf16.msrb.mxu0 %v5219_v55  ;;  %v1544_v26 = vadd.f32 %v1543_v24, %v1530_v14  ;;  %v5328_v55 = vld [vmem:[#allocation14 + $0x178] sm:$0xf0]  ;;  %v5615_v14 = vor.u32 %v6825_v10, %v5614_v56  ;;  %v5475_v24 = vor.u32 %v6787_v20, %v5472_v21  ;;  %v6803_v10 = vld [vmem:[#allocation14 + $0x30c] sm:$0xf]  ;;  %v6865_v20 = vld [vmem:[#allocation17 + $0xf8] sm:$0xf0] }
 0x1ab   :  { %v1555_v7 = vpop.f32.mrf.mxu2  ;;  %2513 = vmatpush.bf16.msra.mxu1 %v5279_v2  ;;  %2523 = vmatpush.bf16.msra.mxu2 %v5471_v34  ;;  %v5331_v28 = vor.u32 %v6751_v53, %v5328_v55  ;;  %v5630_v2 = vld [vmem:[#allocation14 + $0x3c8] sm:$0xf]  ;;  %v6747_v34 = vld [vmem:[#allocation14 + $0x14c] sm:$0xf]  ;;  %v5682_v37 = vld [vmem:[#allocation17 + $0x38] sm:$0xf] }
 0x1ac   :  { %v1569_v8 = vpop.f32.mrf.mxu3  ;;  %v1556_v15 = vadd.f32 %v1555_v7, %v1542_v57  ;;  %v5631_v7 = vor.u32 %v6829_v3, %v5630_v2  ;;  %v6743_v57 = vld [vmem:[#allocation14 + $0x12c] sm:$0xf] }
 0x1ad   :  { %v6831_v53 = vld [vmem:[#allocation14 + $0x3ec] sm:$0xf] }
 0x1ae   :  { %2552 = vmatpush.bf16.msrb.mxu0 %v5203_v4  ;;  %2514 = vmatmul.bf16.vlgmr.msra.gmra.mxu1 %v7546_v38  ;;  %v1570_v27 = vadd.f32 %v1569_v8, %v1556_v15  ;;  %v5312_v4 = vld [vmem:[#allocation14 + $0x158] sm:$0xf0]  ;;  %v6815_v3 = vld [vmem:[#allocation14 + $0x36c] sm:$0xf] }
 0x1af   :  { %2562 = vmatpush.bf16.msrb.mxu1 %v5395_v9  ;;  %2472 = vmatmul.bf16.vlgmr.msrb.gmra.mxu2 %v7550_v36  ;;  %v5315_v8 = vor.u32 %v6747_v34, %v5312_v4  ;;  %v5507_v9 = vor.u32 %v6795_v5, %v5504_v6  ;;  %v5584_v34 = vld [vmem:[#allocation14 + $0x378] sm:$0xf0]  ;;  %v6811_v5 = vld [vmem:[#allocation14 + $0x34c] sm:$0xf] }
 0x1b0   :  { %2524 = vmatpush.bf16.msra.mxu2 %v5455_v13  ;;  %v1585_v47 = vmul.f32 0.2, %v1570_v27  ;;  %vm1577_vm2 = vcmp.gt.f32.partialorder %v1570_v27, 0.0  ;;  %v5488_v13 = vld [vmem:[#allocation14 + $0x2b8] sm:$0xf0]  ;;  %v5587_v4 = vor.u32 %v6815_v3, %v5584_v34 }
 0x1b1   :  { %v5491_v15 = vor.u32 %v6791_v12, %v5488_v13  ;;  %v5568_v6 = vld [vmem:[#allocation14 + $0x358] sm:$0xf0]  ;;  %v6886_v12 = vld [vmem:[#allocation17 + $0x1a0] sm:$0xf0]  ;;  %v6991_v3 = vld [vmem:[#allocation17 + $0x4e8] sm:$0xf0] }
 0x1b2   :  { %2553 = vmatpush.bf16.msrb.mxu0 %v5187_v16  ;;  %v1593_v62 = vsel %vm1577_vm2, %v1570_v27, %v1585_v47  ;;  %v5598_v16 = vld [vmem:[#allocation14 + $0x388] sm:$0xf]  ;;  %v6783_v27 = vld [vmem:[#allocation14 + $0x26c] sm:$0xf]  ;;  %v5427_v47 = vor.u32 %v6775_v44, %v5424_v45  ;;  %v5654_v44 = vld [vmem:[#allocation17] sm:$0xf] }
 0x1b3   :  { %2563 = vmatpush.bf16.msrb.mxu1 %v5379_v19  ;;  %v1557_v32 = vpop.f32.mrf.mxu2  ;;  %v5280_v19 = vld [vmem:[#allocation14 + $0x118] sm:$0xf0]  ;;  %v5599_v22 = vor.u32 %v6821_v17, %v5598_v16  ;;  %v6872_v17 = vld [vmem:[#allocation17 + $0x130] sm:$0xf0]  ;;  %v6837_v45 = vld [vmem:[#allocation17 + $0x18] sm:$0xf0] }
 0x1b4   :  { %v1558_v40 = vadd.f32 %v1557_v32, %v1544_v26  ;;  %v1571_v43 = vpop.f32.mrf.mxu3  ;;  %2525 = vmatpush.bf16.msra.mxu2 %v5439_v25  ;;  %v5283_v23 = vor.u32 %v6739_v18, %v5280_v19  ;;  %v5582_v25 = vld [vmem:[#allocation14 + $0x368] sm:$0xf]  ;;  %v6817_v26 = vld [vmem:[#allocation14 + $0x374] sm:$0xf0]  ;;  %v5794_v16 = vld [vmem:[#allocation17 + $0x118] sm:$0xf] }
 0x1b5   :  { %v5583_v31 = vor.u32 %v6817_v26, %v5582_v25  ;;  %v5795_v18 = vor.u32 %v6872_v17, %v5794_v16  ;;  %v5766_v19 = vld [vmem:[#allocation17 + $0xe0] sm:$0xf]  ;;  %v6942_v26 = vld [vmem:[#allocation17 + $0x360] sm:$0xf0]  ;;  %v6869_v34 = vld [vmem:[#allocation17 + $0x11c] sm:$0xf] }
 0x1b6   :  { %v1572_v48 = vadd.f32 %v1571_v43, %v1558_v40  ;;  %2554 = vmatpush.bf16.msrb.mxu0 %v5171_v30  ;;  %v5456_v30 = vld [vmem:[#allocation14 + $0x278] sm:$0xf0]  ;;  %v6809_v43 = vld [vmem:[#allocation14 + $0x334] sm:$0xf0]  ;;  %v5767_v21 = vor.u32 %v6865_v20, %v5766_v19  ;;  %v6977_v16 = vld [vmem:[#allocation17 + $0x478] sm:$0xf0] }
 0x1b7   :  { %2564 = vmatpush.bf16.msrb.mxu1 %v5363_v33  ;;  %v5459_v32 = vor.u32 %v6783_v27, %v5456_v30  ;;  %v5566_v33 = vld [vmem:[#allocation14 + $0x348] sm:$0xf]  ;;  %v5551_v46 = vor.u32 %v6809_v43, %v5550_v42  ;;  %v5710_v30 = vld [vmem:[#allocation17 + $0x70] sm:$0xf]  ;;  %v6928_v42 = vld [vmem:[#allocation17 + $0x2f0] sm:$0xf0] }
 0x1b8   :  { %vm1581_vm3 = vcmp.gt.f32.partialorder %v1572_v48, 0.0  ;;  %v1589_v59 = vmul.f32 0.2, %v1572_v48  ;;  %2526 = vmatpush.bf16.msra.mxu2 %v5423_v50  ;;  %v5567_v40 = vor.u32 %v6813_v35, %v5566_v33  ;;  %v6805_v50 = vld [vmem:[#allocation14 + $0x314] sm:$0xf0] }
 0x1b9   :  { %v6935_v33 = vld [vmem:[#allocation17 + $0x328] sm:$0xf0] }
 0x1ba   :  { %v1597_v63 = vsel %vm1581_vm3, %v1572_v48, %v1589_v59  ;;  %2555 = vmatpush.bf16.msrb.mxu0 %v5155_v51  ;;  %v5534_v48 = vld [vmem:[#allocation14 + $0x308] sm:$0xf]  ;;  %v6771_v51 = vld [vmem:[#allocation14 + $0x20c] sm:$0xf]  ;;  %v6855_v17 = vld [vmem:[#allocation17 + $0xac] sm:$0xf] }
 0x1bb   :  { %v7558_v1 = vpack.c.bf16 %v1597_v63, %v1593_v62  ;;  %2565 = vmatpush.bf16.msrb.mxu1 %v5347_v54  ;;  %v5648_v54 = vld [vmem:[#allocation14 + $0x3f8] sm:$0xf0]  ;;  %v5535_v55 = vor.u32 %v6805_v50, %v5534_v48  ;;  %v6827_v59 = vld [vmem:[#allocation14 + $0x3cc] sm:$0xf]  ;;  %v6921_v48 = vld [vmem:[#allocation17 + $0x2b8] sm:$0xf0] }
 0x1bc   :  { %2527 = vmatpush.bf16.msra.mxu2 %v5407_v61  ;;  %v5651_v58 = vor.u32 %v6831_v53, %v5648_v54  ;;  %v5635_v61 = vor.u32 %v6827_v59, %v5632_v60  ;;  %v6823_v62 = vld [vmem:[#allocation14 + $0x3ac] sm:$0xf]  ;;  %v5616_v63 = vld [vmem:[#allocation14 + $0x3b8] sm:$0xf0]  ;;  %v6883_v50 = vld [vmem:[#allocation17 + $0x18c] sm:$0xf] }
 0x1bd   :  { %2430 = vmatmul.bf16.vlgmr.msra.gmra.mxu3 %v7558_v1  ;;  %2556 = vmatmul.bf16.vlgmr.msrb.gmra.mxu0 %v7542_v49  ;;  %v5299_v49 = vor.u32 %v6743_v57, %v5296_v11  ;;  %v5850_v11 = vld [vmem:[#allocation17 + $0x188] sm:$0xf]  ;;  %v6998_v59 = vld [vmem:[#allocation17 + $0x520] sm:$0xf0]  ;;  %v6876_v60 = vld [vmem:[#allocation17 + $0x154] sm:$0xf] }
 0x1be   :  { %2534 = vmatpush.bf16.msra.mxu3 %v5647_v0  ;;  %v5619_v0 = vor.u32 %v6823_v62, %v5616_v63  ;;  %v5851_v13 = vor.u32 %v6886_v12, %v5850_v11  ;;  %v5962_v54 = vld [vmem:[#allocation17 + $0x268] sm:$0xf] }
 0x1bf   :  { %2566 = vmatpush.bf16.msrb.mxu1 %v5331_v28  ;;  %2528 = vmatmul.bf16.vlgmr.msra.gmra.mxu2 %v7550_v36  ;;  %v6819_v28 = vld [vmem:[#allocation14 + $0x38c] sm:$0xf] }
 0x1c0   :  { %2576 = vmatpush.bf16.msrb.mxu2 %v5523_v29  ;;  %v5600_v29 = vld [vmem:[#allocation14 + $0x398] sm:$0xf0]  ;;  %4056 = vmatpush.bf16.msra.mxu0 %v5851_v13  ;;  %v5878_v13 = vld [vmem:[#allocation17 + $0x1c0] sm:$0xf] }
 0x1c1   :  { %v5603_v2 = vor.u32 %v6819_v28, %v5600_v29  ;;  %v6907_v28 = vld [vmem:[#allocation17 + $0x248] sm:$0xf0]  ;;  %v6270_v29 = vld [vmem:[#allocation17 + $0x4d0] sm:$0xf] }
 0x1c2   :  { %2535 = vmatpush.bf16.msra.mxu3 %v5631_v7  ;;  %v5571_v7 = vor.u32 %v6811_v5, %v5568_v6  ;;  %v6271_v5 = vor.u32 %v6991_v3, %v6270_v29 }
 0x1c3   :  { %2567 = vmatpush.bf16.msrb.mxu1 %v5315_v8  ;;  %v6807_v8 = vld [vmem:[#allocation14 + $0x32c] sm:$0xf] }
 0x1c4   :  { %2577 = vmatpush.bf16.msrb.mxu2 %v5507_v9  ;;  %v5552_v9 = vld [vmem:[#allocation14 + $0x338] sm:$0xf0] }
 0x1c5   :  { %v5555_v56 = vor.u32 %v6807_v8, %v5552_v9  ;;  %v6900_v8 = vld [vmem:[#allocation17 + $0x210] sm:$0xf0]  ;;  %v6242_v9 = vld [vmem:[#allocation17 + $0x498] sm:$0xf] }
 0x1c6   :  { %2536 = vmatpush.bf16.msra.mxu3 %v5615_v14  ;;  %v5822_v14 = vld [vmem:[#allocation17 + $0x150] sm:$0xf] }
 0x1c7   :  { %2568 = vmatpush.bf16.msrb.mxu1 %v5299_v49  ;;  %v6879_v49 = vld [vmem:[#allocation17 + $0x168] sm:$0xf0] }
 0x1c8   :  { %2578 = vmatpush.bf16.msrb.mxu2 %v5491_v15  ;;  %v5823_v15 = vor.u32 %v6879_v49, %v5822_v14  ;;  %v6893_v14 = vld [vmem:[#allocation17 + $0x1d8] sm:$0xf0]  ;;  %v6214_v49 = vld [vmem:[#allocation17 + $0x460] sm:$0xf] }
 0x1c9   :  { %v6215_v19 = vor.u32 %v6977_v16, %v6214_v49  ;;  %v7040_v49 = vld [vmem:[#allocation17 + $0x670] sm:$0xf0] }
 0x1ca   :  { %2537 = vmatpush.bf16.msra.mxu3 %v5599_v22  ;;  %4057 = vmatpush.bf16.msra.mxu0 %v5823_v15  ;;  %v5738_v22 = vld [vmem:[#allocation17 + $0xa8] sm:$0xf]  ;;  %v5879_v15 = vor.u32 %v6893_v14, %v5878_v13  ;;  %v7574_v13 = vld [vmem:[#allocation16] sm:$0xf]  ;;  %v6466_v14 = vld [vmem:[#allocation17 + $0x658] sm:$0xf] }
 0x1cb   :  { %2569 = vmatpush.bf16.msrb.mxu1 %v5283_v23  ;;  %v6858_v23 = vld [vmem:[#allocation17 + $0xc0] sm:$0xf0]  ;;  %v6467_v16 = vor.u32 %v7040_v49, %v6466_v14  ;;  %v7005_v49 = vld [vmem:[#allocation17 + $0x558] sm:$0xf0] }
 0x1cc   :  { %2579 = vmatpush.bf16.msrb.mxu2 %v5475_v24  ;;  %v6074_v24 = vld [vmem:[#allocation17 + $0x348] sm:$0xf]  ;;  %v5739_v25 = vor.u32 %v6858_v23, %v5738_v22 }
 0x1cd   :  { %2486 = vmatmul.bf16.vlgmr.msrb.gmra.mxu3 %v7558_v1  ;;  %v6075_v27 = vor.u32 %v6942_v26, %v6074_v24  ;;  %v6076_v22 = vld [vmem:[#allocation17 + $0x364] sm:$0xf0] }
 0x1ce   :  { %2538 = vmatpush.bf16.msra.mxu3 %v5583_v31  ;;  %2570 = vmatmul.bf16.vlgmr.msrb.gmra.mxu1 %v7546_v38  ;;  %v5411_v38 = vor.u32 %v6771_v51, %v5408_v52  ;;  %v6851_v31 = vld [vmem:[#allocation17 + $0x88] sm:$0xf0]  ;;  %v5852_v51 = vld [vmem:[#allocation17 + $0x1a4] sm:$0xf0] }
 0x1cf   :  { %4058 = vmatpush.bf16.msra.mxu0 %v5795_v18  ;;  %4070 = vmatpush.bf16.msra.mxu1 %v6075_v27  ;;  %v5855_v53 = vor.u32 %v6883_v50, %v5852_v51  ;;  %v5740_v18 = vld [vmem:[#allocation17 + $0xc4] sm:$0xf0]  ;;  %v6848_v27 = vld [vmem:[#allocation17 + $0x74] sm:$0xf]  ;;  %v6834_v51 = vld [vmem:[#allocation17 + $0x4] sm:$0xf] }
 0x1d0   :  { %2580 = vmatpush.bf16.msrb.mxu2 %v5459_v32  ;;  %v6046_v32 = vld [vmem:[#allocation17 + $0x310] sm:$0xf]  ;;  %v5743_v20 = vor.u32 %v6855_v17, %v5740_v18  ;;  %v6186_v24 = vld [vmem:[#allocation17 + $0x428] sm:$0xf]  ;;  %v6897_v17 = vld [vmem:[#allocation17 + $0x1fc] sm:$0xf] }
 0x1d1   :  { %v6047_v35 = vor.u32 %v6935_v33, %v6046_v32  ;;  %v5908_v18 = vld [vmem:[#allocation17 + $0x214] sm:$0xf0] }
 0x1d2   :  { %2539 = vmatpush.bf16.msra.mxu3 %v5567_v40  ;;  %v6018_v40 = vld [vmem:[#allocation17 + $0x2d8] sm:$0xf] }
 0x1d3   :  { %4059 = vmatpush.bf16.msra.mxu0 %v5767_v21  ;;  %4071 = vmatpush.bf16.msra.mxu1 %v6047_v35  ;;  %v6019_v43 = vor.u32 %v6928_v42, %v6018_v40  ;;  %v6939_v21 = vld [vmem:[#allocation17 + $0x34c] sm:$0xf]  ;;  %v6158_v35 = vld [vmem:[#allocation17 + $0x3f0] sm:$0xf]  ;;  %v6841_v40 = vld [vmem:[#allocation17 + $0x3c] sm:$0xf] }
 0x1d4   :  { %2581 = vmatpush.bf16.msrb.mxu2 %v5443_v41  ;;  %v5683_v41 = vor.u32 %v6844_v39, %v5682_v37  ;;  %v6079_v23 = vor.u32 %v6939_v21, %v6076_v22  ;;  %v6963_v37 = vld [vmem:[#allocation17 + $0x408] sm:$0xf0]  ;;  %v6925_v42 = vld [vmem:[#allocation17 + $0x2dc] sm:$0xf]  ;;  %v6244_v21 = vld [vmem:[#allocation17 + $0x4b4] sm:$0xf0] }
 0x1d5   :  { %v6159_v39 = vor.u32 %v6963_v37, %v6158_v35  ;;  %v1732_v22 = vperm.slane %v7574_v13, 0 }
 0x1d6   :  { %2540 = vmatpush.bf16.msra.mxu3 %v5551_v46  ;;  %v5990_v46 = vld [vmem:[#allocation17 + $0x2a0] sm:$0xf] }
 0x1d7   :  { %4060 = vmatpush.bf16.msra.mxu0 %v5739_v25  ;;  %4072 = vmatpush.bf16.msra.mxu1 %v6019_v43  ;;  %v5991_v52 = vor.u32 %v6921_v48, %v5990_v46  ;;  %v6970_v25 = vld [vmem:[#allocation17 + $0x440] sm:$0xf0]  ;;  %v6130_v46 = vld [vmem:[#allocation17 + $0x3b8] sm:$0xf] }
 0x1d8   :  { %2582 = vmatpush.bf16.msrb.mxu2 %v5427_v47  ;;  %v5655_v47 = vor.u32 %v6837_v45, %v5654_v44  ;;  %v6187_v26 = vor.u32 %v6970_v25, %v6186_v24  ;;  %v6020_v44 = vld [vmem:[#allocation17 + $0x2f4] sm:$0xf0]  ;;  %v6438_v25 = vld [vmem:[#allocation17 + $0x620] sm:$0xf] }
 0x1d9   :  { %v6023_v45 = vor.u32 %v6925_v42, %v6020_v44 }
 0x1da   :  { %2541 = vmatpush.bf16.msra.mxu3 %v5535_v55  ;;  %v6914_v55 = vld [vmem:[#allocation17 + $0x280] sm:$0xf0] }
 0x1db   :  { %4073 = vmatpush.bf16.msra.mxu1 %v5991_v52  ;;  %v5656_v52 = vld [vmem:[#allocation17 + $0x1c] sm:$0xf0] }
 0x1dc   :  { %2583 = vmatpush.bf16.msrb.mxu2 %v5411_v38  ;;  %v6298_v38 = vld [vmem:[#allocation17 + $0x508] sm:$0xf] }
 0x1dd   :  { %2542 = vmatmul.bf16.vlgmr.msra.gmra.mxu3 %v7558_v1  ;;  %v6299_v62 = vor.u32 %v6998_v59, %v6298_v38  ;;  %v6102_v59 = vld [vmem:[#allocation17 + $0x380] sm:$0xf] }
 0x1de   :  { %2590 = vmatpush.bf16.msrb.mxu3 %v5651_v58  ;;  %v5963_v58 = vor.u32 %v6914_v55, %v5962_v54  ;;  %v5659_v54 = vor.u32 %v6834_v51, %v5656_v52  ;;  %v5992_v55 = vld [vmem:[#allocation17 + $0x2bc] sm:$0xf0] }
 0x1df   :  { %2584 = vmatmul.bf16.vlgmr.msrb.gmra.mxu2 %v7550_v36  ;;  %v5536_v36 = vld [vmem:[#allocation14 + $0x318] sm:$0xf0] }
 0x1e0   :  { %v5539_v57 = vor.u32 %v6803_v10, %v5536_v36  ;;  %4074 = vmatpush.bf16.msra.mxu1 %v5963_v58  ;;  %4084 = vmatpush.bf16.msra.mxu2 %v6299_v62  ;;  %v6984_v10 = vld [vmem:[#allocation17 + $0x4b0] sm:$0xf0]  ;;  %v6862_v36 = vld [vmem:[#allocation17 + $0xe4] sm:$0xf] }
 0x1e1   :  { %v6243_v11 = vor.u32 %v6984_v10, %v6242_v9  ;;  %v6904_v9 = vld [vmem:[#allocation17 + $0x234] sm:$0xf] }
 0x1e2   :  { %2591 = vmatpush.bf16.msrb.mxu3 %v5635_v61  ;;  %v5824_v61 = vld [vmem:[#allocation17 + $0x16c] sm:$0xf0]  ;;  %v6988_v10 = vld [vmem:[#allocation17 + $0x4d4] sm:$0xf] }
 0x1e3   :  { %v5827_v63 = vor.u32 %v6876_v60, %v5824_v61  ;;  %v6949_v60 = vld [vmem:[#allocation17 + $0x398] sm:$0xf0]  ;;  %v6522_v61 = vld [vmem:[#allocation17 + $0x6c8] sm:$0xf] }
 0x1e4   :  { %4085 = vmatpush.bf16.msra.mxu2 %v6271_v5  ;;  %v6103_v62 = vor.u32 %v6949_v60, %v6102_v59  ;;  %v6960_v59 = vld [vmem:[#allocation17 + $0x3f4] sm:$0xf] }
 0x1e6   :  { %2592 = vmatpush.bf16.msrb.mxu3 %v5619_v0  ;;  %v5934_v0 = vld [vmem:[#allocation17 + $0x230] sm:$0xf] }
 0x1e8   :  { %4086 = vmatpush.bf16.msra.mxu2 %v6243_v11 }
 0x1ea   :  { %2593 = vmatpush.bf16.msrb.mxu3 %v5603_v2  ;;  %v5935_v2 = vor.u32 %v6907_v28, %v5934_v0  ;;  %v6911_v0 = vld [vmem:[#allocation17 + $0x26c] sm:$0xf]  ;;  %v5964_v28 = vld [vmem:[#allocation17 + $0x284] sm:$0xf0] }
 0x1eb   :  { %v5967_v3 = vor.u32 %v6911_v0, %v5964_v28  ;;  %v6354_v0 = vld [vmem:[#allocation17 + $0x578] sm:$0xf]  ;;  %v7012_v28 = vld [vmem:[#allocation17 + $0x590] sm:$0xf0] }
 0x1ec   :  { %4075 = vmatpush.bf16.msra.mxu1 %v5935_v2  ;;  %4087 = vmatpush.bf16.msra.mxu2 %v6215_v19  ;;  %v6981_v19 = vld [vmem:[#allocation17 + $0x49c] sm:$0xf] }
 0x1ee   :  { %2594 = vmatpush.bf16.msrb.mxu3 %v5587_v4  ;;  %v5796_v4 = vld [vmem:[#allocation17 + $0x134] sm:$0xf0] }
 0x1ef   :  { %v5799_v6 = vor.u32 %v6869_v34, %v5796_v4  ;;  %v6995_v34 = vld [vmem:[#allocation17 + $0x50c] sm:$0xf]  ;;  %v6300_v4 = vld [vmem:[#allocation17 + $0x524] sm:$0xf0] }
 0x1f0   :  { %4088 = vmatpush.bf16.msra.mxu2 %v6187_v26  ;;  %v6303_v5 = vor.u32 %v6995_v34, %v6300_v4  ;;  %v7033_v26 = vld [vmem:[#allocation17 + $0x638] sm:$0xf0]  ;;  %v6132_v4 = vld [vmem:[#allocation17 + $0x3d4] sm:$0xf0] }
 0x1f1   :  { %v6953_v34 = vld [vmem:[#allocation17 + $0x3bc] sm:$0xf] }
 0x1f2   :  { %2595 = vmatpush.bf16.msrb.mxu3 %v5571_v7  ;;  %v5906_v7 = vld [vmem:[#allocation17 + $0x1f8] sm:$0xf] }
 0x1f4   :  { %4089 = vmatpush.bf16.msra.mxu2 %v6159_v39 }
 0x1f6   :  { %2596 = vmatpush.bf16.msrb.mxu3 %v5555_v56  ;;  %v5907_v56 = vor.u32 %v6900_v8, %v5906_v7  ;;  %v7047_v7 = vld [vmem:[#allocation17 + $0x6a8] sm:$0xf0] }
 0x1f8   :  { %4076 = vmatpush.bf16.msra.mxu1 %v5907_v56  ;;  %v5936_v56 = vld [vmem:[#allocation17 + $0x24c] sm:$0xf0] }
 0x1fa   :  { %2597 = vmatpush.bf16.msrb.mxu3 %v5539_v57  ;;  %v5768_v57 = vld [vmem:[#allocation17 + $0xfc] sm:$0xf0]  ;;  %v7568_v48 = vpop.f32.mrf.mxu0 }
 0x1fb   :  { %v5771_v12 = vor.u32 %v6862_v36, %v5768_v57  ;;  %v5939_v36 = vor.u32 %v6904_v9, %v5936_v56  ;;  %v6272_v57 = vld [vmem:[#allocation17 + $0x4ec] sm:$0xf0]  ;;  %v2390_v35 = vadd.f32 %v7568_v48, %v1732_v22 }
 0x1fc   :  { %4077 = vmatpush.bf16.msra.mxu1 %v5879_v15  ;;  %v6382_v48 = vld [vmem:[#allocation17 + $0x5b0] sm:$0xf] }
 0x1fd   :  { %2598 = vmatmul.bf16.vlgmr.msrb.gmra.mxu3 %v7558_v1  ;;  %v5711_v1 = vor.u32 %v6851_v31, %v5710_v30  ;;  %v5712_v30 = vld [vmem:[#allocation17 + $0x8c] sm:$0xf0]  ;;  %v6932_v31 = vld [vmem:[#allocation17 + $0x314] sm:$0xf] }
 0x1fe   :  { %v5715_v32 = vor.u32 %v6848_v27, %v5712_v30  ;;  %v6439_v27 = vor.u32 %v7033_v26, %v6438_v25  ;;  %v6890_v30 = vld [vmem:[#allocation17 + $0x1c4] sm:$0xf] }
 0x1ff   :  { %4061 = vmatpush.bf16.msra.mxu0 %v5711_v1  ;;  %v6048_v1 = vld [vmem:[#allocation17 + $0x32c] sm:$0xf0] }
 0x200   :  { %4126 = vmatpush.bf16.msrb.mxu1 %v6079_v23  ;;  %v6051_v33 = vor.u32 %v6932_v31, %v6048_v1  ;;  %v6247_v23 = vor.u32 %v6981_v19, %v6244_v21  ;;  %v5880_v31 = vld [vmem:[#allocation17 + $0x1dc] sm:$0xf0]  ;;  %v7051_v21 = vld [vmem:[#allocation17 + $0x6cc] sm:$0xf] }
 0x201   :  { %v5883_v1 = vor.u32 %v6890_v30, %v5880_v31  ;;  %v5802_v31 = vld [vmem:[#allocation17 + $0x120] sm:$0xf] }
 0x202   :  { %v2391_v11 = vpop.f32.mrf.mxu0 }
 0x203   :  { %4062 = vmatpush.bf16.msra.mxu0 %v5683_v41  ;;  %v5684_v41 = vld [vmem:[#allocation17 + $0x54] sm:$0xf0] }
 0x204   :  { %4127 = vmatpush.bf16.msrb.mxu1 %v6051_v33  ;;  %v5687_v43 = vor.u32 %v6841_v40, %v5684_v41  ;;  %v6216_v33 = vld [vmem:[#allocation17 + $0x47c] sm:$0xf0]  ;;  %v6410_v40 = vld [vmem:[#allocation17 + $0x5e8] sm:$0xf]  ;;  %v7026_v41 = vld [vmem:[#allocation17 + $0x600] sm:$0xf0] }
 0x205   :  { %v6411_v44 = vor.u32 %v7026_v41, %v6410_v40 }
 0x207   :  { %4063 = vmatpush.bf16.msra.mxu0 %v5655_v47  ;;  %v6956_v47 = vld [vmem:[#allocation17 + $0x3d0] sm:$0xf0] }
 0x208   :  { %4128 = vmatpush.bf16.msrb.mxu1 %v6023_v45  ;;  %v6131_v50 = vor.u32 %v6956_v47, %v6130_v46  ;;  %v6967_v45 = vld [vmem:[#allocation17 + $0x42c] sm:$0xf]  ;;  %v6188_v46 = vld [vmem:[#allocation17 + $0x444] sm:$0xf0] }
 0x209   :  { %v6191_v47 = vor.u32 %v6967_v45, %v6188_v46  ;;  %v6866_v45 = vld [vmem:[#allocation17 + $0x100] sm:$0xf0]  ;;  %v7037_v46 = vld [vmem:[#allocation17 + $0x65c] sm:$0xf] }
 0x20a   :  { %v7570_v38 = vpop.f32.mrf.mxu1  ;;  %4090 = vmatpush.bf16.msra.mxu2 %v6131_v50  ;;  %v2392_v50 = vadd.f32 %v2391_v11, %v1732_v22  ;;  %v6524_v22 = vld [vmem:[#allocation17 + $0x6e4] sm:$0xf0] }
 0x20b   :  { %4112 = vmatpush.bf16.msrb.mxu0 %v5855_v53  ;;  %v6918_v53 = vld [vmem:[#allocation17 + $0x2a4] sm:$0xf]  ;;  %v2404_v42 = vadd.f32 %v7570_v38, %v2390_v35  ;;  %v6160_v38 = vld [vmem:[#allocation17 + $0x40c] sm:$0xf0] }
 0x20c   :  { %v5995_v58 = vor.u32 %v6918_v53, %v5992_v55  ;;  %v7019_v53 = vld [vmem:[#allocation17 + $0x5c8] sm:$0xf0] }
 0x20e   :  { %4129 = vmatpush.bf16.msrb.mxu1 %v5995_v58  ;;  %4091 = vmatpush.bf16.msra.mxu2 %v6103_v62  ;;  %v6383_v58 = vor.u32 %v7019_v53, %v6382_v48  ;;  %v5746_v53 = vld [vmem:[#allocation17 + $0xb0] sm:$0xf] }
 0x20f   :  { %4113 = vmatpush.bf16.msrb.mxu0 %v5827_v63  ;;  %v7054_v63 = vld [vmem:[#allocation17 + $0x6e0] sm:$0xf0] }
 0x210   :  { %v6523_v2 = vor.u32 %v7054_v63, %v6522_v61  ;;  %v6163_v61 = vor.u32 %v6960_v59, %v6160_v38  ;;  %v6082_v38 = vld [vmem:[#allocation17 + $0x350] sm:$0xf] }
 0x212   :  { %4098 = vmatpush.bf16.msra.mxu3 %v6523_v2  ;;  %4130 = vmatpush.bf16.msrb.mxu1 %v5967_v3  ;;  %v2405_v15 = vpop.f32.mrf.mxu1 }
 0x213   :  { %4114 = vmatpush.bf16.msrb.mxu0 %v5799_v6  ;;  %v6494_v6 = vld [vmem:[#allocation17 + $0x690] sm:$0xf]  ;;  %4140 = vmatpush.bf16.msrb.mxu2 %v6303_v5 }
 0x214   :  { %v6495_v8 = vor.u32 %v7047_v7, %v6494_v6  ;;  %v5858_v5 = vld [vmem:[#allocation17 + $0x190] sm:$0xf]  ;;  %v6887_v6 = vld [vmem:[#allocation17 + $0x1a8] sm:$0xf0]  ;;  %v6135_v7 = vor.u32 %v6953_v34, %v6132_v4 }
 0x215   :  { %v5859_v14 = vor.u32 %v6887_v6, %v5858_v5  ;;  %v5718_v5 = vld [vmem:[#allocation17 + $0x78] sm:$0xf]  ;;  %v6852_v6 = vld [vmem:[#allocation17 + $0x90] sm:$0xf0] }
 0x216   :  { %4099 = vmatpush.bf16.msra.mxu3 %v6495_v8  ;;  %4131 = vmatpush.bf16.msrb.mxu1 %v5939_v36  ;;  %v1733_v8 = vperm.slane %v7574_v13, 1  ;;  %v6326_v36 = vld [vmem:[#allocation17 + $0x540] sm:$0xf] }
 0x217   :  { %4115 = vmatpush.bf16.msrb.mxu0 %v5771_v12  ;;  %v6275_v12 = vor.u32 %v6988_v10, %v6272_v57  ;;  %v5830_v10 = vld [vmem:[#allocation17 + $0x158] sm:$0xf]  ;;  %v6327_v19 = vor.u32 %v7005_v49, %v6326_v36 }
 0x219   :  { %4141 = vmatpush.bf16.msrb.mxu2 %v6275_v12 }
 0x21a   :  { %4100 = vmatpush.bf16.msra.mxu3 %v6467_v16  ;;  %v2459_v51 = vpop.f32.mrf.mxu1  ;;  %v6104_v16 = vld [vmem:[#allocation17 + $0x39c] sm:$0xf0] }
 0x21b   :  { %4116 = vmatpush.bf16.msrb.mxu0 %v5743_v20  ;;  %v5911_v20 = vor.u32 %v6897_v17, %v5908_v18  ;;  %v6880_v18 = vld [vmem:[#allocation17 + $0x170] sm:$0xf0] }
 0x21c   :  { %v5831_v30 = vor.u32 %v6880_v18, %v5830_v10  ;;  %v6412_v10 = vld [vmem:[#allocation17 + $0x604] sm:$0xf0]  ;;  %v5690_v18 = vld [vmem:[#allocation17 + $0x40] sm:$0xf] }
 0x21d   :  { %4132 = vmatpush.bf16.msrb.mxu1 %v5911_v20  ;;  %4142 = vmatpush.bf16.msrb.mxu2 %v6247_v23 }
 0x21e   :  { %4101 = vmatpush.bf16.msra.mxu3 %v6439_v27 }
 0x21f   :  { %4117 = vmatpush.bf16.msrb.mxu0 %v5715_v32  ;;  %v6974_v32 = vld [vmem:[#allocation17 + $0x464] sm:$0xf] }
 0x220   :  { %v6219_v37 = vor.u32 %v6974_v32, %v6216_v33  ;;  %v6873_v32 = vld [vmem:[#allocation17 + $0x138] sm:$0xf0]  ;;  %v6496_v33 = vld [vmem:[#allocation17 + $0x6ac] sm:$0xf0] }
 0x221   :  { %v7572_v29 = vpop.f32.mrf.mxu2  ;;  %4133 = vmatpush.bf16.msrb.mxu1 %v5883_v1  ;;  %v7044_v1 = vld [vmem:[#allocation17 + $0x694] sm:$0xf] }
 0x222   :  { %4143 = vmatpush.bf16.msrb.mxu2 %v6219_v37  ;;  %v2418_v52 = vadd.f32 %v7572_v29, %v2404_v42  ;;  %4102 = vmatpush.bf16.msra.mxu3 %v6411_v44  ;;  %v6355_v29 = vor.u32 %v7012_v28, %v6354_v0  ;;  %v2461_v57 = vpop.f32.mrf.mxu1  ;;  %v5774_v44 = vld [vmem:[#allocation17 + $0xe8] sm:$0xf]  ;;  %v1734_v0 = vperm.slane %v7574_v13, 2 }
 0x223   :  { %4118 = vmatpush.bf16.msrb.mxu0 %v5687_v43  ;;  %v2445_v43 = vpop.f32.mrf.mxu0  ;;  %v5775_v59 = vor.u32 %v6866_v45, %v5774_v44  ;;  %v5860_v44 = vld [vmem:[#allocation17 + $0x1ac] sm:$0xf0] }
 0x224   :  { %v2446_v23 = vadd.f32 %v2445_v43, %v1733_v8  ;;  %v5803_v43 = vor.u32 %v6873_v32, %v5802_v31 }
 0x226   :  { %4144 = vmatpush.bf16.msrb.mxu2 %v6191_v47  ;;  %4103 = vmatpush.bf16.msra.mxu3 %v6383_v58  ;;  %v2460_v27 = vadd.f32 %v2459_v51, %v2446_v23  ;;  %v6468_v47 = vld [vmem:[#allocation17 + $0x674] sm:$0xf0]  ;;  %v7016_v23 = vld [vmem:[#allocation17 + $0x5b4] sm:$0xf] }
 0x227   :  { %4119 = vmatpush.bf16.msrb.mxu0 %v5659_v54  ;;  %v2406_v54 = vadd.f32 %v2405_v15, %v2392_v50  ;;  %v6946_v15 = vld [vmem:[#allocation17 + $0x384] sm:$0xf] }
 0x228   :  { %v6107_v20 = vor.u32 %v6946_v15, %v6104_v16  ;;  %v5719_v15 = vor.u32 %v6852_v6, %v5718_v5  ;;  %v6908_v5 = vld [vmem:[#allocation17 + $0x250] sm:$0xf0]  ;;  %v6278_v6 = vld [vmem:[#allocation17 + $0x4d8] sm:$0xf] }
 0x229   :  { %v2419_v24 = vpop.f32.mrf.mxu2 }
 0x22a   :  { %v2420_v62 = vadd.f32 %v2419_v24, %v2406_v54  ;;  %4145 = vmatpush.bf16.msrb.mxu2 %v6163_v61  ;;  %4104 = vmatpush.bf16.msra.mxu3 %v6355_v29  ;;  %v6527_v24 = vor.u32 %v7051_v21, %v6524_v22  ;;  %v6859_v54 = vld [vmem:[#allocation17 + $0xc8] sm:$0xf0]  ;;  %v6929_v22 = vld [vmem:[#allocation17 + $0x2f8] sm:$0xf0] }
 0x22b   :  { %v2447_v9 = vpop.f32.mrf.mxu0  ;;  %v2515_v50 = vpop.f32.mrf.mxu1  ;;  %v5747_v34 = vor.u32 %v6859_v54, %v5746_v53  ;;  %v6306_v54 = vld [vmem:[#allocation17 + $0x510] sm:$0xf] }
 0x22c   :  { %v2448_v35 = vadd.f32 %v2447_v9, %v1733_v8  ;;  %v6936_v9 = vld [vmem:[#allocation17 + $0x330] sm:$0xf0] }
 0x22e   :  { %4146 = vmatpush.bf16.msrb.mxu2 %v6135_v7  ;;  %4105 = vmatpush.bf16.msra.mxu3 %v6327_v19  ;;  %v2462_v41 = vadd.f32 %v2461_v57, %v2448_v35  ;;  %v6054_v7 = vld [vmem:[#allocation17 + $0x318] sm:$0xf]  ;;  %v6845_v19 = vld [vmem:[#allocation17 + $0x58] sm:$0xf0]  ;;  %v6838_v35 = vld [vmem:[#allocation17 + $0x20] sm:$0xf0] }
 0x22f   :  { %v6055_v16 = vor.u32 %v6936_v9, %v6054_v7  ;;  %v5691_v32 = vor.u32 %v6845_v19, %v5690_v18  ;;  %v6992_v7 = vld [vmem:[#allocation17 + $0x4f0] sm:$0xf0]  ;;  %v6870_v9 = vld [vmem:[#allocation17 + $0x124] sm:$0xf]  ;;  %v5776_v18 = vld [vmem:[#allocation17 + $0x104] sm:$0xf0] }
 0x232   :  { %v2473_v60 = vpop.f32.mrf.mxu2  ;;  %4147 = vmatpush.bf16.msrb.mxu2 %v6107_v20  ;;  %4154 = vmatpush.bf16.msrb.mxu3 %v6527_v24  ;;  %v6026_v20 = vld [vmem:[#allocation17 + $0x2e0] sm:$0xf]  ;;  %v6384_v24 = vld [vmem:[#allocation17 + $0x5cc] sm:$0xf0] }
 0x233   :  { %v2474_v37 = vadd.f32 %v2473_v60, %v2460_v27  ;;  %v2501_v40 = vpop.f32.mrf.mxu0  ;;  %v6943_v60 = vld [vmem:[#allocation17 + $0x368] sm:$0xf0]  ;;  %v2517_v49 = vpop.f32.mrf.mxu1 }
 0x234   :  { %v6083_v4 = vor.u32 %v6943_v60, %v6082_v38  ;;  %v2502_v36 = vadd.f32 %v2501_v40, %v1734_v0  ;;  %v7009_v40 = vld [vmem:[#allocation17 + $0x57c] sm:$0xf]  ;;  %v7002_v38 = vld [vmem:[#allocation17 + $0x544] sm:$0xf]  ;;  %v6328_v60 = vld [vmem:[#allocation17 + $0x55c] sm:$0xf0] }
 0x23a   :  { %v2475_v25 = vpop.f32.mrf.mxu2 }
 0x23b   :  { %v2476_v51 = vadd.f32 %v2475_v25, %v2462_v41  ;;  %v2503_v57 = vpop.f32.mrf.mxu0  ;;  %v6356_v41 = vld [vmem:[#allocation17 + $0x594] sm:$0xf0] }
 0x23c   :  { %v2504_v21 = vadd.f32 %v2503_v57, %v1734_v0  ;;  %v6359_v45 = vor.u32 %v7009_v40, %v6356_v41  ;;  %v6279_v57 = vor.u32 %v6992_v7, %v6278_v6  ;;  %v6194_v40 = vld [vmem:[#allocation17 + $0x430] sm:$0xf]  ;;  %v6835_v7 = vld [vmem:[#allocation17 + $0xc] sm:$0xf] }
 0x23e   :  { %v2518_v27 = vadd.f32 %v2517_v49, %v2504_v21  ;;  %v6250_v49 = vld [vmem:[#allocation17 + $0x4a0] sm:$0xf] }
 0x240   :  { %v2431_v39 = vpop.f32.mrf.mxu3 }
 0x241   :  { %v2432_v55 = vadd.f32 %v2431_v39, %v2418_v52  ;;  %v6499_v39 = vor.u32 %v7044_v1, %v6496_v33  ;;  %v6471_v52 = vor.u32 %v7037_v46, %v6468_v47  ;;  %v6027_v1 = vor.u32 %v6929_v22, %v6026_v20  ;;  %v5662_v33 = vld [vmem:[#allocation17 + $0x8] sm:$0xf]  ;;  %v5970_v47 = vld [vmem:[#allocation17 + $0x270] sm:$0xf] }
 0x242   :  { %v2529_v61 = vpop.f32.mrf.mxu2 }
 0x243   :  { %v2612_v2 = vmul.f32 0.2, %v2432_v55  ;;  %vm2604_vm4 = vcmp.gt.f32.partialorder %v2432_v55, 0.0  ;;  %4155 = vmatpush.bf16.msrb.mxu3 %v6499_v39  ;;  %v6922_v39 = vld [vmem:[#allocation17 + $0x2c0] sm:$0xf0] }
 0x245   :  { %v2620_v11 = vsel %vm2604_vm4, %v2432_v55, %v2612_v2 }
 0x247   :  { %4156 = vmatpush.bf16.msrb.mxu3 %v6471_v52 }
 0x248   :  { %v2433_v63 = vpop.f32.mrf.mxu3 }
 0x249   :  { %v2434_v3 = vadd.f32 %v2433_v63, %v2420_v62  ;;  %v7030_v62 = vld [vmem:[#allocation17 + $0x624] sm:$0xf]  ;;  %v6440_v63 = vld [vmem:[#allocation17 + $0x63c] sm:$0xf0] }
 0x24a   :  { %v6443_v2 = vor.u32 %v7030_v62, %v6440_v63  ;;  %v5832_v62 = vld [vmem:[#allocation17 + $0x174] sm:$0xf0]  ;;  %v6331_v63 = vor.u32 %v7002_v38, %v6328_v60  ;;  %v6842_v38 = vld [vmem:[#allocation17 + $0x44] sm:$0xf]  ;;  %v5692_v60 = vld [vmem:[#allocation17 + $0x5c] sm:$0xf0] }
 0x24b   :  { %vm2608_vm5 = vcmp.gt.f32.partialorder %v2434_v3, 0.0  ;;  %v2616_v56 = vmul.f32 0.2, %v2434_v3  ;;  %v2571_v19 = vpop.f32.mrf.mxu1 }
 0x24c   :  { %4157 = vmatpush.bf16.msrb.mxu3 %v6443_v2 }
 0x24d   :  { %v2624_v12 = vsel %vm2608_vm5, %v2434_v3, %v2616_v56  ;;  %v7023_v56 = vld [vmem:[#allocation17 + $0x5ec] sm:$0xf] }
 0x24e   :  { %v7581_v17 = vpack.c.bf16 %v2624_v12, %v2620_v11  ;;  %v6415_v11 = vor.u32 %v7023_v56, %v6412_v10  ;;  %v5804_v56 = vld [vmem:[#allocation17 + $0x13c] sm:$0xf0] }
 0x250   :  { %v2487_v26 = vpop.f32.mrf.mxu3  ;;  %4064 = vmatmul.bf16.vlgmr.msra.gmra.mxu0 %v7581_v17  ;;  %4158 = vmatpush.bf16.msrb.mxu3 %v6415_v11  ;;  %v5807_v11 = vor.u32 %v6870_v9, %v5804_v56  ;;  %v5664_v9 = vld [vmem:[#allocation17 + $0x24] sm:$0xf0]  ;;  %v6919_v56 = vld [vmem:[#allocation17 + $0x2ac] sm:$0xf] }
 0x251   :  { %4168 = vmatpush.bf16.msra.mxu0 %v5859_v14  ;;  %v2488_v42 = vadd.f32 %v2487_v26, %v2474_v37  ;;  %v2516_v14 = vadd.f32 %v2515_v50, %v2502_v36  ;;  %v6387_v26 = vor.u32 %v7016_v23, %v6384_v24  ;;  %v5998_v37 = vld [vmem:[#allocation17 + $0x2a8] sm:$0xf]  ;;  %v6915_v50 = vld [vmem:[#allocation17 + $0x288] sm:$0xf0]  ;;  %v2557_v36 = vpop.f32.mrf.mxu0  ;;  %v6894_v24 = vld [vmem:[#allocation17 + $0x1e0] sm:$0xf0] }
 0x252   :  { %v5999_v53 = vor.u32 %v6922_v39, %v5998_v37  ;;  %v5971_v2 = vor.u32 %v6915_v50, %v5970_v47  ;;  %v5886_v23 = vld [vmem:[#allocation17 + $0x1c8] sm:$0xf]  ;;  %v6933_v47 = vld [vmem:[#allocation17 + $0x31c] sm:$0xf]  ;;  %v6056_v50 = vld [vmem:[#allocation17 + $0x334] sm:$0xf0] }
 0x253   :  { %v2613_v55 = vmul.f32 0.2, %v2488_v42  ;;  %vm2605_vm6 = vcmp.gt.f32.partialorder %v2488_v42, 0.0  ;;  %v2530_v25 = vadd.f32 %v2529_v61, %v2516_v14  ;;  %v6901_v14 = vld [vmem:[#allocation17 + $0x218] sm:$0xf0] }
 0x254   :  { %4159 = vmatpush.bf16.msrb.mxu3 %v6387_v26 }
 0x255   :  { %4169 = vmatpush.bf16.msra.mxu0 %v5831_v30  ;;  %v2621_v3 = vsel %vm2605_vm6, %v2488_v42, %v2613_v55  ;;  %v2531_v30 = vpop.f32.mrf.mxu2  ;;  %v6999_v55 = vld [vmem:[#allocation17 + $0x528] sm:$0xf0] }
 0x256   :  { %v2532_v42 = vadd.f32 %v2531_v30, %v2518_v27  ;;  %v6978_v27 = vld [vmem:[#allocation17 + $0x480] sm:$0xf0]  ;;  %v6856_v30 = vld [vmem:[#allocation17 + $0xb4] sm:$0xf] }
 0x258   :  { %v2489_v48 = vpop.f32.mrf.mxu3  ;;  %4160 = vmatpush.bf16.msrb.mxu3 %v6359_v45 }
 0x259   :  { %v2490_v58 = vadd.f32 %v2489_v48, %v2476_v51  ;;  %4170 = vmatpush.bf16.msra.mxu0 %v5803_v43  ;;  %v6884_v43 = vld [vmem:[#allocation17 + $0x194] sm:$0xf]  ;;  %v5663_v48 = vor.u32 %v6838_v35, %v5662_v33  ;;  %v6084_v33 = vld [vmem:[#allocation17 + $0x36c] sm:$0xf0]  ;;  %v5887_v35 = vor.u32 %v6894_v24, %v5886_v23 }
 0x25b   :  { %vm2609_vm7 = vcmp.gt.f32.partialorder %v2490_v58, 0.0  ;;  %v2617_v28 = vmul.f32 0.2, %v2490_v58 }
 0x25c   :  { %4161 = vmatpush.bf16.msrb.mxu3 %v6331_v63  ;;  %v6028_v63 = vld [vmem:[#allocation17 + $0x2fc] sm:$0xf0] }
 0x25d   :  { %v2625_v29 = vsel %vm2609_vm7, %v2490_v58, %v2617_v28  ;;  %4171 = vmatpush.bf16.msra.mxu0 %v5775_v59  ;;  %v6877_v58 = vld [vmem:[#allocation17 + $0x15c] sm:$0xf]  ;;  %v5863_v59 = vor.u32 %v6884_v43, %v5860_v44  ;;  %v5720_v44 = vld [vmem:[#allocation17 + $0x94] sm:$0xf0] }
 0x25e   :  { %v7585_v8 = vpack.c.bf16 %v2625_v29, %v2621_v3  ;;  %v6307_v29 = vor.u32 %v6999_v55, %v6306_v54  ;;  %v6849_v43 = vld [vmem:[#allocation17 + $0x7c] sm:$0xf]  ;;  %v6166_v54 = vld [vmem:[#allocation17 + $0x3f8] sm:$0xf] }
 0x260   :  { %v2543_v12 = vpop.f32.mrf.mxu3  ;;  %4078 = vmatmul.bf16.vlgmr.msra.gmra.mxu1 %v7585_v8  ;;  %4120 = vmatmul.bf16.vlgmr.msrb.gmra.mxu0 %v7581_v17 }
 0x261   :  { %4172 = vmatpush.bf16.msra.mxu0 %v5747_v34  ;;  %4182 = vmatpush.bf16.msra.mxu1 %v6083_v4  ;;  %v2544_v31 = vadd.f32 %v2543_v12, %v2530_v25  ;;  %v5835_v34 = vor.u32 %v6877_v58, %v5832_v62  ;;  %v5942_v4 = vld [vmem:[#allocation17 + $0x238] sm:$0xf]  ;;  %v5914_v12 = vld [vmem:[#allocation17 + $0x200] sm:$0xf]  ;;  %v6222_v25 = vld [vmem:[#allocation17 + $0x468] sm:$0xf]  ;;  %v6059_v58 = vor.u32 %v6933_v47, %v6056_v50 }
 0x262   :  { %v5943_v10 = vor.u32 %v6908_v5, %v5942_v4  ;;  %v5915_v20 = vor.u32 %v6901_v14, %v5914_v12  ;;  %v2585_v26 = vpop.f32.mrf.mxu2  ;;  %v6223_v37 = vor.u32 %v6978_v27, %v6222_v25  ;;  %v6926_v62 = vld [vmem:[#allocation17 + $0x2e4] sm:$0xf]  ;;  %v6138_v4 = vld [vmem:[#allocation17 + $0x3c0] sm:$0xf]  ;;  %v6957_v5 = vld [vmem:[#allocation17 + $0x3d8] sm:$0xf0] }
 0x263   :  { %v2614_v51 = vmul.f32 0.2, %v2544_v31  ;;  %vm2606_vm8 = vcmp.gt.f32.partialorder %v2544_v31, 0.0  ;;  %v6031_v6 = vor.u32 %v6926_v62, %v6028_v63  ;;  %v6110_v14 = vld [vmem:[#allocation17 + $0x388] sm:$0xf] }
 0x264   :  { %v5972_v25 = vld [vmem:[#allocation17 + $0x28c] sm:$0xf0]  ;;  %v6989_v47 = vld [vmem:[#allocation17 + $0x4dc] sm:$0xf]  ;;  %v6280_v50 = vld [vmem:[#allocation17 + $0x4f4] sm:$0xf0] }
 0x265   :  { %4173 = vmatpush.bf16.msra.mxu0 %v5719_v15  ;;  %4183 = vmatpush.bf16.msra.mxu1 %v6055_v16  ;;  %v2622_v0 = vsel %vm2606_vm8, %v2544_v31, %v2614_v51  ;;  %v6985_v15 = vld [vmem:[#allocation17 + $0x4b8] sm:$0xf0]  ;;  %v6863_v16 = vld [vmem:[#allocation17 + $0xec] sm:$0xf]  ;;  %v5748_v31 = vld [vmem:[#allocation17 + $0xcc] sm:$0xf0] }
 0x266   :  { %v6251_v21 = vor.u32 %v6985_v15, %v6250_v49  ;;  %v5779_v22 = vor.u32 %v6863_v16, %v5776_v18  ;;  %v5751_v39 = vor.u32 %v6856_v30, %v5748_v31  ;;  %v6950_v49 = vld [vmem:[#allocation17 + $0x3a0] sm:$0xf0]  ;;  %v6530_v15 = vld [vmem:[#allocation17 + $0x6d0] sm:$0xf]  ;;  %v6867_v63 = vld [vmem:[#allocation17 + $0x108] sm:$0xf0] }
 0x267   :  { %v6308_v30 = vld [vmem:[#allocation17 + $0x52c] sm:$0xf0]  ;;  %v6111_v31 = vor.u32 %v6950_v49, %v6110_v14 }
 0x268   :  { %v2545_v46 = vpop.f32.mrf.mxu3  ;;  %v5782_v62 = vld [vmem:[#allocation17 + $0xf0] sm:$0xf] }
 0x269   :  { %v2546_v52 = vadd.f32 %v2545_v46, %v2532_v42  ;;  %4174 = vmatpush.bf16.msra.mxu0 %v5691_v32  ;;  %4184 = vmatpush.bf16.msra.mxu1 %v6027_v1  ;;  %v1735_v32 = vperm.slane %v7574_v13, 3  ;;  %v6940_v1 = vld [vmem:[#allocation17 + $0x354] sm:$0xf]  ;;  %v6971_v42 = vld [vmem:[#allocation17 + $0x448] sm:$0xf0]  ;;  %v2559_v46 = vpop.f32.mrf.mxu0 }
 0x26a   :  { %v6087_v41 = vor.u32 %v6940_v1, %v6084_v33  ;;  %v6881_v1 = vld [vmem:[#allocation17 + $0x178] sm:$0xf0]  ;;  %v6418_v49 = vld [vmem:[#allocation17 + $0x5f0] sm:$0xf] }
 0x26b   :  { %vm2610_vm9 = vcmp.gt.f32.partialorder %v2546_v52, 0.0  ;;  %v2618_v61 = vmul.f32 0.2, %v2546_v52  ;;  %v2558_v45 = vadd.f32 %v2557_v36, %v1735_v32  ;;  %v2560_v55 = vadd.f32 %v2559_v46, %v1735_v32  ;;  %v6000_v36 = vld [vmem:[#allocation17 + $0x2c4] sm:$0xf0] }
 0x26c   :  { %v6003_v23 = vor.u32 %v6919_v56, %v6000_v36  ;;  %v5838_v32 = vld [vmem:[#allocation17 + $0x160] sm:$0xf]  ;;  %v5944_v46 = vld [vmem:[#allocation17 + $0x254] sm:$0xf0] }
 0x26d   :  { %v2626_v28 = vsel %vm2610_vm9, %v2546_v52, %v2618_v61  ;;  %4175 = vmatpush.bf16.msra.mxu0 %v5663_v48  ;;  %4185 = vmatpush.bf16.msra.mxu1 %v5999_v53  ;;  %v2572_v13 = vadd.f32 %v2571_v19, %v2558_v45  ;;  %v2573_v52 = vpop.f32.mrf.mxu1  ;;  %v6195_v48 = vor.u32 %v6971_v42, %v6194_v40  ;;  %v6502_v42 = vld [vmem:[#allocation17 + $0x698] sm:$0xf] }
 0x26e   :  { %v7589_v3 = vpack.c.bf16 %v2626_v28, %v2622_v0  ;;  %v5723_v53 = vor.u32 %v6849_v43, %v5720_v44  ;;  %v2574_v0 = vadd.f32 %v2573_v52, %v2560_v55  ;;  %v2587_v28 = vpop.f32.mrf.mxu2  ;;  %v6139_v19 = vor.u32 %v6957_v5, %v6138_v4  ;;  %v7048_v43 = vld [vmem:[#allocation17 + $0x6b0] sm:$0xf0]  ;;  %v6905_v44 = vld [vmem:[#allocation17 + $0x23c] sm:$0xf]  ;;  %v6891_v4 = vld [vmem:[#allocation17 + $0x1cc] sm:$0xf] }
 0x26f   :  { %v2586_v61 = vadd.f32 %v2585_v26, %v2572_v13  ;;  %v6996_v26 = vld [vmem:[#allocation17 + $0x514] sm:$0xf]  ;;  %v5839_v45 = vor.u32 %v6881_v1, %v5838_v32  ;;  %v6874_v13 = vld [vmem:[#allocation17 + $0x140] sm:$0xf0]  ;;  %v6503_v52 = vor.u32 %v7048_v43, %v6502_v42  ;;  %v7041_v55 = vld [vmem:[#allocation17 + $0x678] sm:$0xf0] }
 0x270   :  { %4092 = vmatmul.bf16.vlgmr.msra.gmra.mxu2 %v7589_v3  ;;  %4134 = vmatmul.bf16.vlgmr.msrb.gmra.mxu1 %v7585_v8  ;;  %v5888_v5 = vld [vmem:[#allocation17 + $0x1e4] sm:$0xf0]  ;;  %v5754_v56 = vld [vmem:[#allocation17 + $0xb8] sm:$0xf]  ;;  %v6961_v1 = vld [vmem:[#allocation17 + $0x3fc] sm:$0xf] }
 0x271   :  { %4224 = vmatpush.bf16.msrb.mxu0 %v5863_v59  ;;  %4186 = vmatpush.bf16.msra.mxu1 %v5971_v2  ;;  %v6964_v59 = vld [vmem:[#allocation17 + $0x410] sm:$0xf0]  ;;  %v6090_v36 = vld [vmem:[#allocation17 + $0x358] sm:$0xf] }
 0x272   :  { %4176 = vmatmul.bf16.vlgmr.msra.gmra.mxu0 %v7581_v17  ;;  %4196 = vmatpush.bf16.msra.mxu2 %v6307_v29  ;;  %v6167_v29 = vor.u32 %v6964_v59, %v6166_v54  ;;  %v6474_v54 = vld [vmem:[#allocation17 + $0x660] sm:$0xf] }
 0x275   :  { %4225 = vmatpush.bf16.msrb.mxu0 %v5835_v34  ;;  %4187 = vmatpush.bf16.msra.mxu1 %v5943_v10  ;;  %v5695_v34 = vor.u32 %v6842_v38, %v5692_v60  ;;  %v2588_v10 = vadd.f32 %v2587_v28, %v2574_v0  ;;  %v5916_v38 = vld [vmem:[#allocation17 + $0x21c] sm:$0xf0]  ;;  %v6982_v60 = vld [vmem:[#allocation17 + $0x4a4] sm:$0xf]  ;;  %v6475_v0 = vor.u32 %v7041_v55, %v6474_v54  ;;  %v6446_v28 = vld [vmem:[#allocation17 + $0x628] sm:$0xf] }
 0x276   :  { %4197 = vmatpush.bf16.msra.mxu2 %v6279_v57  ;;  %v5866_v57 = vld [vmem:[#allocation17 + $0x198] sm:$0xf]  ;;  %v6885_v55 = vld [vmem:[#allocation17 + $0x19c] sm:$0xf] }
 0x279   :  { %4226 = vmatpush.bf16.msrb.mxu0 %v5807_v11  ;;  %4188 = vmatpush.bf16.msra.mxu1 %v5915_v20  ;;  %v6888_v11 = vld [vmem:[#allocation17 + $0x1b0] sm:$0xf0]  ;;  %v5667_v20 = vor.u32 %v6835_v7, %v5664_v9  ;;  %v6975_v7 = vld [vmem:[#allocation17 + $0x46c] sm:$0xf]  ;;  %v6224_v9 = vld [vmem:[#allocation17 + $0x484] sm:$0xf0] }
 0x27a   :  { %4198 = vmatpush.bf16.msra.mxu2 %v6251_v21  ;;  %v7055_v21 = vld [vmem:[#allocation17 + $0x6e8] sm:$0xf0]  ;;  %v5867_v24 = vor.u32 %v6888_v11, %v5866_v57  ;;  %v6944_v57 = vld [vmem:[#allocation17 + $0x370] sm:$0xf0]  ;;  %v6227_v14 = vor.u32 %v6975_v7, %v6224_v9  ;;  %v6878_v9 = vld [vmem:[#allocation17 + $0x164] sm:$0xf] }
 0x27b   :  { %v7000_v7 = vld [vmem:[#allocation17 + $0x530] sm:$0xf0] }
 0x27d   :  { %4227 = vmatpush.bf16.msrb.mxu0 %v5779_v22  ;;  %4189 = vmatpush.bf16.msra.mxu1 %v5887_v35  ;;  %v6912_v22 = vld [vmem:[#allocation17 + $0x274] sm:$0xf] }
 0x27e   :  { %4199 = vmatpush.bf16.msra.mxu2 %v6223_v37  ;;  %v6531_v37 = vor.u32 %v7055_v21, %v6530_v15  ;;  %v5975_v40 = vor.u32 %v6912_v22, %v5972_v25  ;;  %v7027_v15 = vld [vmem:[#allocation17 + $0x608] sm:$0xf0]  ;;  %v5726_v21 = vld [vmem:[#allocation17 + $0x80] sm:$0xf]  ;;  %v6853_v22 = vld [vmem:[#allocation17 + $0x98] sm:$0xf0] }
 0x27f   :  { %v6419_v25 = vor.u32 %v7027_v15, %v6418_v49  ;;  %v5950_v15 = vld [vmem:[#allocation17 + $0x240] sm:$0xf] }
 0x280   :  { %v2599_v51 = vpop.f32.mrf.mxu3  ;;  %4148 = vmatmul.bf16.vlgmr.msrb.gmra.mxu2 %v7589_v3  ;;  %4190 = vmatmul.bf16.vlgmr.msra.gmra.mxu1 %v7585_v8 }
 0x281   :  { %4228 = vmatpush.bf16.msrb.mxu0 %v5751_v39  ;;  %4238 = vmatpush.bf16.msrb.mxu1 %v6087_v41  ;;  %v2600_v2 = vadd.f32 %v2599_v51, %v2586_v61  ;;  %v6311_v41 = vor.u32 %v6996_v26, %v6308_v30  ;;  %v5810_v51 = vld [vmem:[#allocation17 + $0x128] sm:$0xf]  ;;  %v6252_v61 = vld [vmem:[#allocation17 + $0x4bc] sm:$0xf0]  ;;  %v7020_v30 = vld [vmem:[#allocation17 + $0x5d0] sm:$0xf0] }
 0x282   :  { %4200 = vmatpush.bf16.msra.mxu2 %v6195_v48  ;;  %v5947_v48 = vor.u32 %v6905_v44, %v5944_v46  ;;  %v5811_v59 = vor.u32 %v6874_v13, %v5810_v51  ;;  %v6362_v44 = vld [vmem:[#allocation17 + $0x580] sm:$0xf]  ;;  %v5670_v13 = vld [vmem:[#allocation17 + $0x10] sm:$0xf] }
 0x283   :  { %v2615_v16 = vmul.f32 0.2, %v2600_v2  ;;  %vm2607_vm10 = vcmp.gt.f32.partialorder %v2600_v2, 0.0  ;;  %v6140_v51 = vld [vmem:[#allocation17 + $0x3dc] sm:$0xf0] }
 0x285   :  { %4229 = vmatpush.bf16.msrb.mxu0 %v5723_v53  ;;  %4239 = vmatpush.bf16.msrb.mxu1 %v6059_v58  ;;  %v2623_v33 = vsel %vm2607_vm10, %v2600_v2, %v2615_v16  ;;  %v6283_v53 = vor.u32 %v6989_v47, %v6280_v50  ;;  %v6898_v58 = vld [vmem:[#allocation17 + $0x204] sm:$0xf] }
 0x286   :  { %4201 = vmatpush.bf16.msra.mxu2 %v6167_v29  ;;  %v5919_v2 = vor.u32 %v6898_v58, %v5916_v38  ;;  %v6255_v29 = vor.u32 %v6982_v60, %v6252_v61  ;;  %v6954_v50 = vld [vmem:[#allocation17 + $0x3c4] sm:$0xf]  ;;  %v5868_v58 = vld [vmem:[#allocation17 + $0x1b4] sm:$0xf0]  ;;  %v6334_v38 = vld [vmem:[#allocation17 + $0x548] sm:$0xf] }
 0x287   :  { %v7006_v60 = vld [vmem:[#allocation17 + $0x560] sm:$0xf0]  ;;  %v6947_v61 = vld [vmem:[#allocation17 + $0x38c] sm:$0xf] }
 0x288   :  { %v2601_v12 = vpop.f32.mrf.mxu3 }
 0x289   :  { %v2602_v18 = vadd.f32 %v2601_v12, %v2588_v10  ;;  %4230 = vmatpush.bf16.msrb.mxu0 %v5695_v34  ;;  %4240 = vmatpush.bf16.msrb.mxu1 %v6031_v6  ;;  %v7034_v34 = vld [vmem:[#allocation17 + $0x640] sm:$0xf0]  ;;  %v5783_v6 = vor.u32 %v6867_v63, %v5782_v62  ;;  %v6860_v10 = vld [vmem:[#allocation17 + $0xd0] sm:$0xf0]  ;;  %v5891_v12 = vor.u32 %v6891_v4, %v5888_v5  ;;  %v6314_v5 = vld [vmem:[#allocation17 + $0x518] sm:$0xf] }
 0x28a   :  { %4202 = vmatpush.bf16.msra.mxu2 %v6139_v19  ;;  %v6447_v11 = vor.u32 %v7034_v34, %v6446_v28  ;;  %v5755_v16 = vor.u32 %v6860_v10, %v5754_v56  ;;  %v6968_v19 = vld [vmem:[#allocation17 + $0x434] sm:$0xf]  ;;  %v5978_v34 = vld [vmem:[#allocation17 + $0x278] sm:$0xf]  ;;  %v5840_v56 = vld [vmem:[#allocation17 + $0x17c] sm:$0xf0] }
 0x28b   :  { %vm2611_vm11 = vcmp.gt.f32.partialorder %v2602_v18, 0.0  ;;  %v2619_v27 = vmul.f32 0.2, %v2602_v18  ;;  %v7052_v28 = vld [vmem:[#allocation17 + $0x6d4] sm:$0xf]  ;;  %v5843_v49 = vor.u32 %v6878_v9, %v5840_v56 }
 0x28c   :  { %v6916_v4 = vld [vmem:[#allocation17 + $0x290] sm:$0xf0]  ;;  %v6965_v56 = vld [vmem:[#allocation17 + $0x418] sm:$0xf0] }
 0x28d   :  { %v2627_v35 = vsel %vm2611_vm11, %v2602_v18, %v2619_v27  ;;  %4231 = vmatpush.bf16.msrb.mxu0 %v5667_v20  ;;  %4241 = vmatpush.bf16.msrb.mxu1 %v6003_v23  ;;  %v6091_v18 = vor.u32 %v6944_v57, %v6090_v36  ;;  %v6196_v20 = vld [vmem:[#allocation17 + $0x44c] sm:$0xf0]  ;;  %v6062_v23 = vld [vmem:[#allocation17 + $0x320] sm:$0xf]  ;;  %v6390_v27 = vld [vmem:[#allocation17 + $0x5b8] sm:$0xf]  ;;  %v5979_v57 = vor.u32 %v6916_v4, %v5978_v34 }
 0x28e   :  { %v7597_v39 = vpack.c.bf16 %v2627_v35, %v2623_v33  ;;  %4203 = vmatpush.bf16.msra.mxu2 %v6111_v31  ;;  %v6199_v26 = vor.u32 %v6968_v19, %v6196_v20  ;;  %v5727_v31 = vor.u32 %v6853_v22, %v5726_v21  ;;  %v6168_v33 = vld [vmem:[#allocation17 + $0x414] sm:$0xf0]  ;;  %v5698_v35 = vld [vmem:[#allocation17 + $0x48] sm:$0xf]  ;;  %v6391_v42 = vor.u32 %v7020_v30, %v6390_v27  ;;  %v6993_v19 = vld [vmem:[#allocation17 + $0x4f8] sm:$0xf0] }
 0x28f   :  { %v6171_v43 = vor.u32 %v6961_v1, %v6168_v33  ;;  %v6871_v20 = vld [vmem:[#allocation17 + $0x12c] sm:$0xf]  ;;  %v5812_v21 = vld [vmem:[#allocation17 + $0x144] sm:$0xf0]  ;;  %v6986_v1 = vld [vmem:[#allocation17 + $0x4c0] sm:$0xf0] }
 0x290   :  { %4106 = vmatmul.bf16.vlgmr.msra.gmra.mxu3 %v7597_v39  ;;  %4232 = vmatmul.bf16.vlgmr.msrb.gmra.mxu0 %v7581_v17  ;;  %v5815_v27 = vor.u32 %v6871_v20, %v5812_v21  ;;  %v5922_v30 = vld [vmem:[#allocation17 + $0x208] sm:$0xf]  ;;  %v6864_v33 = vld [vmem:[#allocation17 + $0xf4] sm:$0xf]  ;;  %v7017_v34 = vld [vmem:[#allocation17 + $0x5bc] sm:$0xf] }
 0x291   :  { %4280 = vmatpush.bf16.msra.mxu0 %v5867_v24  ;;  %4210 = vmatpush.bf16.msra.mxu3 %v6531_v37  ;;  %v6937_v24 = vld [vmem:[#allocation17 + $0x338] sm:$0xf0]  ;;  %v6846_v37 = vld [vmem:[#allocation17 + $0x60] sm:$0xf0]  ;;  %v6392_v4 = vld [vmem:[#allocation17 + $0x5d4] sm:$0xf0] }
 0x292   :  { %4242 = vmatpush.bf16.msrb.mxu1 %v5975_v40  ;;  %4252 = vmatpush.bf16.msrb.mxu2 %v6311_v41  ;;  %v6063_v32 = vor.u32 %v6937_v24, %v6062_v23  ;;  %v6034_v40 = vld [vmem:[#allocation17 + $0x2e8] sm:$0xf]  ;;  %v6930_v41 = vld [vmem:[#allocation17 + $0x300] sm:$0xf0]  ;;  %v5699_v46 = vor.u32 %v6846_v37, %v5698_v35  ;;  %v5784_v35 = vld [vmem:[#allocation17 + $0x10c] sm:$0xf0] }
 0x293   :  { %4204 = vmatmul.bf16.vlgmr.msra.gmra.mxu2 %v7589_v3  ;;  %v6035_v47 = vor.u32 %v6930_v41, %v6034_v40  ;;  %v7038_v24 = vld [vmem:[#allocation17 + $0x664] sm:$0xf]  ;;  %v7031_v41 = vld [vmem:[#allocation17 + $0x62c] sm:$0xf]  ;;  %v6836_v21 = vld [vmem:[#allocation17 + $0x14] sm:$0xf] }
 0x295   :  { %4281 = vmatpush.bf16.msra.mxu0 %v5839_v45  ;;  %4211 = vmatpush.bf16.msra.mxu3 %v6503_v52  ;;  %v7013_v45 = vld [vmem:[#allocation17 + $0x598] sm:$0xf0]  ;;  %v6839_v52 = vld [vmem:[#allocation17 + $0x28] sm:$0xf0] }
 0x296   :  { %4243 = vmatpush.bf16.msrb.mxu1 %v5947_v48  ;;  %4253 = vmatpush.bf16.msrb.mxu2 %v6283_v53  ;;  %v6006_v48 = vld [vmem:[#allocation17 + $0x2b0] sm:$0xf]  ;;  %v6923_v53 = vld [vmem:[#allocation17 + $0x2c8] sm:$0xf0]  ;;  %v6363_v54 = vor.u32 %v7013_v45, %v6362_v44  ;;  %v5671_v62 = vor.u32 %v6839_v52, %v5670_v13  ;;  %v5787_v44 = vor.u32 %v6864_v33, %v5784_v35  ;;  %v5756_v13 = vld [vmem:[#allocation17 + $0xd4] sm:$0xf0] }
 0x297   :  { %v6007_v63 = vor.u32 %v6923_v53, %v6006_v48  ;;  %v5894_v45 = vld [vmem:[#allocation17 + $0x1d0] sm:$0xf]  ;;  %v6941_v48 = vld [vmem:[#allocation17 + $0x35c] sm:$0xf]  ;;  %v6092_v53 = vld [vmem:[#allocation17 + $0x374] sm:$0xf0] }
 0x298   :  { %v6538_v33 = vld [vmem:[#allocation17 + $0x6d8] sm:$0xf]  ;;  %v7056_v35 = vld [vmem:[#allocation17 + $0x6f0] sm:$0xf0] }
 0x299   :  { %4282 = vmatpush.bf16.msra.mxu0 %v5811_v59  ;;  %4212 = vmatpush.bf16.msra.mxu3 %v6475_v0  ;;  %v6143_v59 = vor.u32 %v6954_v50, %v6140_v51  ;;  %v6112_v0 = vld [vmem:[#allocation17 + $0x3a4] sm:$0xf0]  ;;  %v6979_v50 = vld [vmem:[#allocation17 + $0x488] sm:$0xf0]  ;;  %v6857_v51 = vld [vmem:[#allocation17 + $0xbc] sm:$0xf] }
 0x29a   :  { %4244 = vmatpush.bf16.msrb.mxu1 %v5919_v2  ;;  %4254 = vmatpush.bf16.msrb.mxu2 %v6255_v29  ;;  %v6532_v2 = vld [vmem:[#allocation17 + $0x6ec] sm:$0xf0]  ;;  %v5871_v29 = vor.u32 %v6885_v55, %v5868_v58  ;;  %v6115_v10 = vor.u32 %v6947_v61, %v6112_v0  ;;  %v7024_v55 = vld [vmem:[#allocation17 + $0x5f4] sm:$0xf]  ;;  %v6095_v61 = vor.u32 %v6941_v48, %v6092_v53  ;;  %v5728_v0 = vld [vmem:[#allocation17 + $0x9c] sm:$0xf0] }
 0x29b   :  { %v6535_v36 = vor.u32 %v7052_v28, %v6532_v2  ;;  %v6420_v58 = vld [vmem:[#allocation17 + $0x60c] sm:$0xf0]  ;;  %v6934_v2 = vld [vmem:[#allocation17 + $0x324] sm:$0xf]  ;;  %v6510_v48 = vld [vmem:[#allocation17 + $0x6a0] sm:$0xf] }
 0x29c   :  { %v6423_v28 = vor.u32 %v7024_v55, %v6420_v58  ;;  %v7049_v53 = vld [vmem:[#allocation17 + $0x6b8] sm:$0xf0]  ;;  %v6906_v58 = vld [vmem:[#allocation17 + $0x244] sm:$0xf] }
 0x29d   :  { %4283 = vmatpush.bf16.msra.mxu0 %v5783_v6  ;;  %4213 = vmatpush.bf16.msra.mxu3 %v6447_v11  ;;  %v6335_v6 = vor.u32 %v7006_v60, %v6334_v38  ;;  %v7045_v11 = vld [vmem:[#allocation17 + $0x69c] sm:$0xf]  ;;  %v5759_v38 = vor.u32 %v6857_v51, %v5756_v13  ;;  %v6202_v60 = vld [vmem:[#allocation17 + $0x438] sm:$0xf]  ;;  %v5846_v51 = vld [vmem:[#allocation17 + $0x168] sm:$0xf] }
 0x29e   :  { %4245 = vmatpush.bf16.msrb.mxu1 %v5891_v12  ;;  %4255 = vmatpush.bf16.msrb.mxu2 %v6227_v14  ;;  %v6504_v12 = vld [vmem:[#allocation17 + $0x6b4] sm:$0xf0]  ;;  %v6315_v14 = vor.u32 %v7000_v7, %v6314_v5  ;;  %v6174_v7 = vld [vmem:[#allocation17 + $0x400] sm:$0xf]  ;;  %v6882_v13 = vld [vmem:[#allocation17 + $0x180] sm:$0xf0] }
 0x29f   :  { %v6507_v22 = vor.u32 %v7045_v11, %v6504_v12  ;;  %v6927_v11 = vld [vmem:[#allocation17 + $0x2ec] sm:$0xf]  ;;  %v6036_v12 = vld [vmem:[#allocation17 + $0x304] sm:$0xf0] }
 0x2a0   :  { %4162 = vmatmul.bf16.vlgmr.msrb.gmra.mxu3 %v7597_v39  ;;  %v6039_v20 = vor.u32 %v6927_v11, %v6036_v12  ;;  %v7035_v11 = vld [vmem:[#allocation17 + $0x648] sm:$0xf0] }
 0x2a1   :  { %4284 = vmatpush.bf16.msra.mxu0 %v5755_v16  ;;  %4214 = vmatpush.bf16.msra.mxu3 %v6419_v25  ;;  %v6909_v16 = vld [vmem:[#allocation17 + $0x258] sm:$0xf0]  ;;  %v6476_v25 = vld [vmem:[#allocation17 + $0x67c] sm:$0xf0] }
 0x2a2   :  { %4294 = vmatpush.bf16.msra.mxu1 %v6091_v18  ;;  %4256 = vmatpush.bf16.msrb.mxu2 %v6199_v26  ;;  %v6286_v18 = vld [vmem:[#allocation17 + $0x4e0] sm:$0xf]  ;;  %v5951_v23 = vor.u32 %v6909_v16, %v5950_v15  ;;  %v6479_v37 = vor.u32 %v7038_v24, %v6476_v25  ;;  %v6175_v15 = vor.u32 %v6965_v56, %v6174_v7  ;;  %v6008_v25 = vld [vmem:[#allocation17 + $0x2cc] sm:$0xf0]  ;;  %v6983_v7 = vld [vmem:[#allocation17 + $0x4ac] sm:$0xf] }
 0x2a3   :  { %4246 = vmatmul.bf16.vlgmr.msrb.gmra.mxu1 %v7585_v8  ;;  %v6287_v26 = vor.u32 %v6993_v19, %v6286_v18  ;;  %v6146_v18 = vld [vmem:[#allocation17 + $0x3c8] sm:$0xf]  ;;  %v6958_v19 = vld [vmem:[#allocation17 + $0x3e0] sm:$0xf0] }
 0x2a5   :  { %4285 = vmatpush.bf16.msra.mxu0 %v5727_v31  ;;  %4215 = vmatpush.bf16.msra.mxu3 %v6391_v42  ;;  %v6902_v31 = vld [vmem:[#allocation17 + $0x220] sm:$0xf0]  ;;  %v6448_v42 = vld [vmem:[#allocation17 + $0x644] sm:$0xf0] }
 0x2a6   :  { %4295 = vmatpush.bf16.msra.mxu1 %v6063_v32  ;;  %4257 = vmatpush.bf16.msrb.mxu2 %v6171_v43  ;;  %v6258_v32 = vld [vmem:[#allocation17 + $0x4a8] sm:$0xf]  ;;  %v5923_v40 = vor.u32 %v6902_v31, %v5922_v30  ;;  %v6451_v52 = vor.u32 %v7031_v41, %v6448_v42  ;;  %v7003_v30 = vld [vmem:[#allocation17 + $0x54c] sm:$0xf]  ;;  %v6118_v41 = vld [vmem:[#allocation17 + $0x390] sm:$0xf] }
 0x2a7   :  { %v6259_v43 = vor.u32 %v6986_v1, %v6258_v32  ;;  %v6336_v31 = vld [vmem:[#allocation17 + $0x564] sm:$0xf0]  ;;  %v6147_v32 = vor.u32 %v6958_v19, %v6146_v18  ;;  %v6951_v42 = vld [vmem:[#allocation17 + $0x3a8] sm:$0xf0]  ;;  %v6976_v18 = vld [vmem:[#allocation17 + $0x474] sm:$0xf] }
 0x2a8   :  { %v6232_v19 = vld [vmem:[#allocation17 + $0x48c] sm:$0xf0] }
 0x2a9   :  { %4286 = vmatpush.bf16.msra.mxu0 %v5699_v46  ;;  %4216 = vmatpush.bf16.msra.mxu3 %v6363_v54  ;;  %v6895_v46 = vld [vmem:[#allocation17 + $0x1e8] sm:$0xf0] }
 0x2aa   :  { %4296 = vmatpush.bf16.msra.mxu1 %v6035_v47  ;;  %4258 = vmatpush.bf16.msrb.mxu2 %v6143_v59  ;;  %v6230_v47 = vld [vmem:[#allocation17 + $0x470] sm:$0xf]  ;;  %v5895_v54 = vor.u32 %v6895_v46, %v5894_v45  ;;  %v5980_v45 = vld [vmem:[#allocation17 + $0x294] sm:$0xf0]  ;;  %v6997_v46 = vld [vmem:[#allocation17 + $0x51c] sm:$0xf] }
 0x2ab   :  { %v6231_v59 = vor.u32 %v6979_v50, %v6230_v47  ;;  %v6316_v47 = vld [vmem:[#allocation17 + $0x534] sm:$0xf0]  ;;  %v6539_v50 = vor.u32 %v7056_v35, %v6538_v33  ;;  %v5734_v35 = vld [vmem:[#allocation17 + $0x88] sm:$0xf] }
 0x2ac   :  { %v6319_v55 = vor.u32 %v6997_v46, %v6316_v47  ;;  %v6204_v33 = vld [vmem:[#allocation17 + $0x454] sm:$0xf0] }
 0x2ad   :  { %4287 = vmatpush.bf16.msra.mxu0 %v5671_v62  ;;  %4217 = vmatpush.bf16.msra.mxu3 %v6335_v6  ;;  %v6972_v62 = vld [vmem:[#allocation17 + $0x450] sm:$0xf0] }
 0x2ae   :  { %4297 = vmatpush.bf16.msra.mxu1 %v6007_v63  ;;  %4259 = vmatpush.bf16.msrb.mxu2 %v6115_v10  ;;  %v6850_v63 = vld [vmem:[#allocation17 + $0x84] sm:$0xf]  ;;  %v6203_v5 = vor.u32 %v6972_v62, %v6202_v60  ;;  %v6843_v10 = vld [vmem:[#allocation17 + $0x4c] sm:$0xf]  ;;  %v6511_v62 = vor.u32 %v7049_v53, %v6510_v48  ;;  %v6042_v53 = vld [vmem:[#allocation17 + $0x2f0] sm:$0xf] }
 0x2af   :  { %v5731_v6 = vor.u32 %v6850_v63, %v5728_v0  ;;  %v6990_v60 = vld [vmem:[#allocation17 + $0x4e4] sm:$0xf]  ;;  %v5818_v63 = vld [vmem:[#allocation17 + $0x130] sm:$0xf]  ;;  %v6875_v0 = vld [vmem:[#allocation17 + $0x148] sm:$0xf0] }
 0x2b0   :  { %4288 = vmatmul.bf16.vlgmr.msra.gmra.mxu0 %v7581_v17  ;;  %4218 = vmatmul.bf16.vlgmr.msra.gmra.mxu3 %v7597_v39  ;;  %v6847_v48 = vld [vmem:[#allocation17 + $0x68] sm:$0xf0] }
 0x2b1   :  { %4336 = vmatpush.bf16.msrb.mxu0 %v5871_v29  ;;  %4266 = vmatpush.bf16.msrb.mxu3 %v6535_v36  ;;  %v6064_v29 = vld [vmem:[#allocation17 + $0x33c] sm:$0xf0]  ;;  %v5700_v36 = vld [vmem:[#allocation17 + $0x64] sm:$0xf0] }
 0x2b2   :  { %4298 = vmatpush.bf16.msra.mxu1 %v5979_v57  ;;  %4308 = vmatpush.bf16.msra.mxu2 %v6315_v14  ;;  %v6067_v9 = vor.u32 %v6934_v2, %v6064_v29  ;;  %v6395_v57 = vor.u32 %v7017_v34, %v6392_v4  ;;  %v7010_v14 = vld [vmem:[#allocation17 + $0x584] sm:$0xf]  ;;  %v5703_v16 = vor.u32 %v6843_v10, %v5700_v36  ;;  %v6899_v4 = vld [vmem:[#allocation17 + $0x20c] sm:$0xf]  ;;  %v5790_v10 = vld [vmem:[#allocation17 + $0xf8] sm:$0xf] }
 0x2b3   :  { %4260 = vmatmul.bf16.vlgmr.msrb.gmra.mxu2 %v7589_v3  ;;  %v7042_v2 = vld [vmem:[#allocation17 + $0x680] sm:$0xf0]  ;;  %v6868_v36 = vld [vmem:[#allocation17 + $0x110] sm:$0xf0] }
 0x2b5   :  { %4337 = vmatpush.bf16.msrb.mxu0 %v5843_v49  ;;  %4267 = vmatpush.bf16.msrb.mxu3 %v6507_v22  ;;  %v6364_v49 = vld [vmem:[#allocation17 + $0x59c] sm:$0xf0]  ;;  %v5672_v22 = vld [vmem:[#allocation17 + $0x2c] sm:$0xf0] }
 0x2b6   :  { %4299 = vmatpush.bf16.msra.mxu1 %v5951_v23  ;;  %4309 = vmatpush.bf16.msra.mxu2 %v6287_v26  ;;  %v6920_v23 = vld [vmem:[#allocation17 + $0x2b4] sm:$0xf]  ;;  %v6367_v24 = vor.u32 %v7010_v14, %v6364_v49  ;;  %v5874_v26 = vld [vmem:[#allocation17 + $0x1a0] sm:$0xf]  ;;  %v5675_v1 = vor.u32 %v6836_v21, %v5672_v22  ;;  %v6861_v22 = vld [vmem:[#allocation17 + $0xd8] sm:$0xf0] }
 0x2b7   :  { %v6892_v49 = vld [vmem:[#allocation17 + $0x1d4] sm:$0xf] }
 0x2b9   :  { %4338 = vmatpush.bf16.msrb.mxu0 %v5815_v27  ;;  %4268 = vmatpush.bf16.msrb.mxu3 %v6479_v37  ;;  %v6889_v27 = vld [vmem:[#allocation17 + $0x1b8] sm:$0xf0]  ;;  %v6011_v37 = vor.u32 %v6920_v23, %v6008_v25  ;;  %v6098_v23 = vld [vmem:[#allocation17 + $0x360] sm:$0xf]  ;;  %v6426_v25 = vld [vmem:[#allocation17 + $0x5f8] sm:$0xf] }
 0x2ba   :  { %4300 = vmatpush.bf16.msra.mxu1 %v5923_v40  ;;  %4310 = vmatpush.bf16.msra.mxu2 %v6259_v43  ;;  %v5875_v40 = vor.u32 %v6889_v27, %v5874_v26  ;;  %v6913_v43 = vld [vmem:[#allocation17 + $0x27c] sm:$0xf]  ;;  %v7028_v26 = vld [vmem:[#allocation17 + $0x610] sm:$0xf0] }
 0x2bd   :  { %4339 = vmatpush.bf16.msrb.mxu0 %v5787_v44  ;;  %4269 = vmatpush.bf16.msrb.mxu3 %v6451_v52  ;;  %v6339_v44 = vor.u32 %v7003_v30, %v6336_v31  ;;  %v6119_v52 = vor.u32 %v6951_v42, %v6118_v41  ;;  %v6235_v30 = vor.u32 %v6976_v18, %v6232_v19  ;;  %v6070_v41 = vld [vmem:[#allocation17 + $0x328] sm:$0xf]  ;;  %v6938_v42 = vld [vmem:[#allocation17 + $0x340] sm:$0xf0]  ;;  %v6512_v19 = vld [vmem:[#allocation17 + $0x6bc] sm:$0xf0] }
 0x2be   :  { %4301 = vmatpush.bf16.msra.mxu1 %v5895_v54  ;;  %4311 = vmatpush.bf16.msra.mxu2 %v6231_v59  ;;  %v5983_v54 = vor.u32 %v6913_v43, %v5980_v45  ;;  %v5847_v59 = vor.u32 %v6882_v13, %v5846_v51  ;;  %v6398_v43 = vld [vmem:[#allocation17 + $0x5c0] sm:$0xf]  ;;  %v6071_v47 = vor.u32 %v6938_v42, %v6070_v41  ;;  %v5706_v13 = vld [vmem:[#allocation17 + $0x50] sm:$0xf]  ;;  %v7046_v18 = vld [vmem:[#allocation17 + $0x6a4] sm:$0xf] }
 0x2bf   :  { %v6176_v51 = vld [vmem:[#allocation17 + $0x41c] sm:$0xf0]  ;;  %v7032_v41 = vld [vmem:[#allocation17 + $0x634] sm:$0xf]  ;;  %v6456_v42 = vld [vmem:[#allocation17 + $0x64c] sm:$0xf0] }
 0x2c1   :  { %4340 = vmatpush.bf16.msrb.mxu0 %v5759_v38  ;;  %4270 = vmatpush.bf16.msrb.mxu3 %v6423_v28  ;;  %v5952_v38 = vld [vmem:[#allocation17 + $0x25c] sm:$0xf0]  ;;  %v6482_v28 = vld [vmem:[#allocation17 + $0x668] sm:$0xf] }
 0x2c2   :  { %4350 = vmatpush.bf16.msrb.mxu1 %v6095_v61  ;;  %4312 = vmatpush.bf16.msra.mxu2 %v6203_v5  ;;  %v6288_v61 = vld [vmem:[#allocation17 + $0x4fc] sm:$0xf0]  ;;  %v5955_v29 = vor.u32 %v6906_v58, %v5952_v38  ;;  %v5819_v5 = vor.u32 %v6875_v0, %v5818_v63  ;;  %v6483_v56 = vor.u32 %v7042_v2, %v6482_v28  ;;  %v7014_v58 = vld [vmem:[#allocation17 + $0x5a0] sm:$0xf0]  ;;  %v5678_v63 = vld [vmem:[#allocation17 + $0x18] sm:$0xf] }
 0x2c3   :  { %4302 = vmatmul.bf16.vlgmr.msra.gmra.mxu1 %v7585_v8  ;;  %v6291_v34 = vor.u32 %v6990_v60, %v6288_v61  ;;  %v5707_v38 = vor.u32 %v6847_v48, %v5706_v13  ;;  %v6955_v61 = vld [vmem:[#allocation17 + $0x3cc] sm:$0xf]  ;;  %v6840_v28 = vld [vmem:[#allocation17 + $0x30] sm:$0xf0]  ;;  %v6014_v2 = vld [vmem:[#allocation17 + $0x2b8] sm:$0xf] }
 0x2c4   :  { %v6428_v13 = vld [vmem:[#allocation17 + $0x614] sm:$0xf0] }
 0x2c5   :  { %4341 = vmatpush.bf16.msrb.mxu0 %v5731_v6  ;;  %4271 = vmatpush.bf16.msrb.mxu3 %v6395_v57  ;;  %v5924_v6 = vld [vmem:[#allocation17 + $0x224] sm:$0xf0]  ;;  %v6454_v57 = vld [vmem:[#allocation17 + $0x630] sm:$0xf] }
 0x2c6   :  { %4351 = vmatpush.bf16.msrb.mxu1 %v6067_v9  ;;  %4313 = vmatpush.bf16.msra.mxu2 %v6175_v15  ;;  %v6260_v9 = vld [vmem:[#allocation17 + $0x4c4] sm:$0xf0]  ;;  %v5927_v12 = vor.u32 %v6899_v4, %v5924_v6  ;;  %v5896_v15 = vld [vmem:[#allocation17 + $0x1ec] sm:$0xf0]  ;;  %v6455_v21 = vor.u32 %v7035_v11, %v6454_v57  ;;  %v7007_v4 = vld [vmem:[#allocation17 + $0x568] sm:$0xf0] }
 0x2c7   :  { %v6263_v14 = vor.u32 %v6983_v7, %v6260_v9  ;;  %v5899_v27 = vor.u32 %v6892_v49, %v5896_v15  ;;  %v7053_v6 = vld [vmem:[#allocation17 + $0x6dc] sm:$0xf]  ;;  %v6540_v7 = vld [vmem:[#allocation17 + $0x6f4] sm:$0xf0]  ;;  %v5679_v9 = vor.u32 %v6840_v28, %v5678_v63  ;;  %v5986_v57 = vld [vmem:[#allocation17 + $0x280] sm:$0xf] }
 0x2c8   :  { %v7001_v49 = vld [vmem:[#allocation17 + $0x538] sm:$0xf0]  ;;  %v6543_v15 = vor.u32 %v7053_v6, %v6540_v7  ;;  %v7011_v63 = vld [vmem:[#allocation17 + $0x58c] sm:$0xf]  ;;  %v6546_v7 = vld [vmem:[#allocation17 + $0x6e0] sm:$0xf] }
 0x2c9   :  { %4342 = vmatpush.bf16.msrb.mxu0 %v5703_v16  ;;  %4272 = vmatpush.bf16.msrb.mxu3 %v6367_v24  ;;  %v5791_v16 = vor.u32 %v6868_v36, %v5790_v10  ;;  %v6945_v24 = vld [vmem:[#allocation17 + $0x378] sm:$0xf0]  ;;  %v6948_v10 = vld [vmem:[#allocation17 + $0x394] sm:$0xf]  ;;  %v6120_v36 = vld [vmem:[#allocation17 + $0x3ac] sm:$0xf0] }
 0x2ca   :  { %4352 = vmatpush.bf16.msrb.mxu1 %v6039_v20  ;;  %4314 = vmatpush.bf16.msra.mxu2 %v6147_v32  ;;  %v5762_v20 = vld [vmem:[#allocation17 + $0xc0] sm:$0xf]  ;;  %v6099_v32 = vor.u32 %v6945_v24, %v6098_v23  ;;  %v6910_v23 = vld [vmem:[#allocation17 + $0x260] sm:$0xf0]  ;;  %v6294_v24 = vld [vmem:[#allocation17 + $0x4e8] sm:$0xf] }
 0x2cb   :  { %v5763_v31 = vor.u32 %v6861_v22, %v5762_v20  ;;  %v5958_v22 = vld [vmem:[#allocation17 + $0x248] sm:$0xf] }
 0x2cd   :  { %4343 = vmatpush.bf16.msrb.mxu0 %v5675_v1  ;;  %4273 = vmatpush.bf16.msrb.mxu3 %v6339_v44  ;;  %v6969_v1 = vld [vmem:[#allocation17 + $0x43c] sm:$0xf] }
 0x2ce   :  { %4353 = vmatpush.bf16.msrb.mxu1 %v6011_v37  ;;  %4315 = vmatpush.bf16.msra.mxu2 %v6119_v52  ;;  %v6427_v37 = vor.u32 %v7028_v26, %v6426_v25  ;;  %v7021_v44 = vld [vmem:[#allocation17 + $0x5d8] sm:$0xf0]  ;;  %v6207_v45 = vor.u32 %v6969_v1, %v6204_v33  ;;  %v6994_v25 = vld [vmem:[#allocation17 + $0x500] sm:$0xf0]  ;;  %v6515_v26 = vor.u32 %v7046_v18, %v6512_v19  ;;  %v5930_v1 = vld [vmem:[#allocation17 + $0x210] sm:$0xf] }
 0x2cf   :  { %v6399_v52 = vor.u32 %v7021_v44, %v6398_v43  ;;  %v6903_v33 = vld [vmem:[#allocation17 + $0x228] sm:$0xf0]  ;;  %v5902_v44 = vld [vmem:[#allocation17 + $0x1d8] sm:$0xf]  ;;  %v6490_v18 = vld [vmem:[#allocation17 + $0x670] sm:$0xf] }
 0x2d0   :  { %4344 = vmatmul.bf16.vlgmr.msrb.gmra.mxu0 %v7581_v17  ;;  %4274 = vmatmul.bf16.vlgmr.msrb.gmra.mxu3 %v7597_v39  ;;  %v7043_v19 = vld [vmem:[#allocation17 + $0x688] sm:$0xf0] }
 0x2d1   :  { %4392 = vmatpush.bf16.msra.mxu0 %v5875_v40  ;;  %4322 = vmatpush.bf16.msra.mxu3 %v6539_v50  ;;  %v6854_v40 = vld [vmem:[#allocation17 + $0xa0] sm:$0xf0] }
 0x2d2   :  { %4354 = vmatpush.bf16.msrb.mxu1 %v5983_v54  ;;  %4364 = vmatpush.bf16.msrb.mxu2 %v6319_v55  ;;  %v5735_v46 = vor.u32 %v6854_v40, %v5734_v35  ;;  %v6962_v50 = vld [vmem:[#allocation17 + $0x404] sm:$0xf]  ;;  %v6931_v54 = vld [vmem:[#allocation17 + $0x308] sm:$0xf0]  ;;  %v6370_v55 = vld [vmem:[#allocation17 + $0x588] sm:$0xf] }
 0x2d3   :  { %4316 = vmatmul.bf16.vlgmr.msra.gmra.mxu2 %v7589_v3  ;;  %v6043_v60 = vor.u32 %v6931_v54, %v6042_v53  ;;  %v6371_v0 = vor.u32 %v7014_v58, %v6370_v55  ;;  %v6266_v35 = vld [vmem:[#allocation17 + $0x4b0] sm:$0xf]  ;;  %v6210_v53 = vld [vmem:[#allocation17 + $0x440] sm:$0xf]  ;;  %v6973_v54 = vld [vmem:[#allocation17 + $0x458] sm:$0xf0] }
 0x2d4   :  { %v7018_v58 = vld [vmem:[#allocation17 + $0x5c4] sm:$0xf] }
 0x2d5   :  { %4393 = vmatpush.bf16.msra.mxu0 %v5847_v59  ;;  %4323 = vmatpush.bf16.msra.mxu3 %v6511_v62  ;;  %v6179_v59 = vor.u32 %v6962_v50, %v6176_v51  ;;  %v6148_v62 = vld [vmem:[#allocation17 + $0x3e4] sm:$0xf0]  ;;  %v6459_v50 = vor.u32 %v7032_v41, %v6456_v42  ;;  %v7025_v51 = vld [vmem:[#allocation17 + $0x5fc] sm:$0xf] }
 0x2d6   :  { %4355 = vmatpush.bf16.msrb.mxu1 %v5955_v29  ;;  %4365 = vmatpush.bf16.msrb.mxu2 %v6291_v34  ;;  %v6924_v29 = vld [vmem:[#allocation17 + $0x2d0] sm:$0xf0]  ;;  %v6342_v34 = vld [vmem:[#allocation17 + $0x550] sm:$0xf]  ;;  %v6431_v55 = vor.u32 %v7025_v51, %v6428_v13 }
 0x2d7   :  { %v6343_v11 = vor.u32 %v7007_v4, %v6342_v34  ;;  %v7004_v4 = vld [vmem:[#allocation17 + $0x554] sm:$0xf] }
 0x2d9   :  { %4394 = vmatpush.bf16.msra.mxu0 %v5819_v5  ;;  %4324 = vmatpush.bf16.msra.mxu3 %v6483_v56  ;;  %v6151_v5 = vor.u32 %v6955_v61, %v6148_v62  ;;  %v6015_v56 = vor.u32 %v6924_v29, %v6014_v2  ;;  %v6966_v61 = vld [vmem:[#allocation17 + $0x420] sm:$0xf0]  ;;  %v6154_v2 = vld [vmem:[#allocation17 + $0x3d0] sm:$0xf]  ;;  %v6959_v29 = vld [vmem:[#allocation17 + $0x3e8] sm:$0xf0] }
 0x2da   :  { %4356 = vmatpush.bf16.msrb.mxu1 %v5927_v12  ;;  %4366 = vmatpush.bf16.msrb.mxu2 %v6263_v14  ;;  %v6917_v12 = vld [vmem:[#allocation17 + $0x298] sm:$0xf0]  ;;  %v6322_v14 = vld [vmem:[#allocation17 + $0x520] sm:$0xf]  ;;  %v6155_v6 = vor.u32 %v6959_v29, %v6154_v2 }
 0x2db   :  { %v5987_v20 = vor.u32 %v6917_v12, %v5986_v57  ;;  %v6518_v12 = vld [vmem:[#allocation17 + $0x6a8] sm:$0xf] }
 0x2dd   :  { %4395 = vmatpush.bf16.msra.mxu0 %v5791_v16  ;;  %4325 = vmatpush.bf16.msra.mxu3 %v6455_v21  ;;  %v6123_v16 = vor.u32 %v6948_v10, %v6120_v36  ;;  %v6323_v21 = vor.u32 %v7001_v49, %v6322_v14  ;;  %v6952_v10 = vld [vmem:[#allocation17 + $0x3b0] sm:$0xf0]  ;;  %v7050_v14 = vld [vmem:[#allocation17 + $0x6c0] sm:$0xf0]  ;;  %v4079_v49 = vpop.f32.mrf.mxu1 }
 0x2de   :  { %4357 = vmatpush.bf16.msrb.mxu1 %v5899_v27  ;;  %4367 = vmatpush.bf16.msrb.mxu2 %v6235_v30  ;;  %v7039_v27 = vld [vmem:[#allocation17 + $0x66c] sm:$0xf]  ;;  %v6484_v30 = vld [vmem:[#allocation17 + $0x684] sm:$0xf0] }
 0x2df   :  { %v6487_v40 = vor.u32 %v7039_v27, %v6484_v30 }
 0x2e1   :  { %4396 = vmatpush.bf16.msra.mxu0 %v5763_v31  ;;  %4326 = vmatpush.bf16.msra.mxu3 %v6427_v37  ;;  %v5959_v31 = vor.u32 %v6910_v23, %v5958_v22  ;;  %v6987_v37 = vld [vmem:[#allocation17 + $0x4c8] sm:$0xf0]  ;;  %v6462_v23 = vld [vmem:[#allocation17 + $0x638] sm:$0xf] }
 0x2e2   :  { %4406 = vmatpush.bf16.msra.mxu1 %v6099_v32  ;;  %4368 = vmatpush.bf16.msrb.mxu2 %v6207_v45  ;;  %v6295_v32 = vor.u32 %v6994_v25, %v6294_v24  ;;  %v6267_v43 = vor.u32 %v6987_v37, %v6266_v35  ;;  %v6896_v45 = vld [vmem:[#allocation17 + $0x1f0] sm:$0xf0] }
 0x2e3   :  { %4358 = vmatmul.bf16.vlgmr.msrb.gmra.mxu1 %v7585_v8  ;;  %v7036_v24 = vld [vmem:[#allocation17 + $0x650] sm:$0xf0] }
 0x2e5   :  { %4397 = vmatpush.bf16.msra.mxu0 %v5735_v46  ;;  %4327 = vmatpush.bf16.msra.mxu3 %v6399_v52  ;;  %v6238_v46 = vld [vmem:[#allocation17 + $0x478] sm:$0xf]  ;;  %v5903_v52 = vor.u32 %v6896_v45, %v5902_v44  ;;  %v4081_v30 = vpop.f32.mrf.mxu1  ;;  %v6378_v45 = vld [vmem:[#allocation17 + $0x590] sm:$0xf] }
 0x2e6   :  { %4407 = vmatpush.bf16.msra.mxu1 %v6071_v47  ;;  %4369 = vmatpush.bf16.msrb.mxu2 %v6179_v59  ;;  %v6980_v47 = vld [vmem:[#allocation17 + $0x490] sm:$0xf0]  ;;  %v6400_v59 = vld [vmem:[#allocation17 + $0x5dc] sm:$0xf0] }
 0x2e7   :  { %v6239_v48 = vor.u32 %v6980_v47, %v6238_v46  ;;  %v6403_v62 = vor.u32 %v7018_v58, %v6400_v59  ;;  %v7015_v46 = vld [vmem:[#allocation17 + $0x5a8] sm:$0xf0] }
 0x2e8   :  { %v6379_v51 = vor.u32 %v7015_v46, %v6378_v45 }
 0x2e9   :  { %4398 = vmatpush.bf16.msra.mxu0 %v5707_v38  ;;  %4328 = vmatpush.bf16.msra.mxu3 %v6371_v0  ;;  %v6211_v38 = vor.u32 %v6973_v54, %v6210_v53  ;;  %v6372_v0 = vld [vmem:[#allocation17 + $0x5a4] sm:$0xf0]  ;;  %v6350_v53 = vld [vmem:[#allocation17 + $0x558] sm:$0xf]  ;;  %v7008_v54 = vld [vmem:[#allocation17 + $0x570] sm:$0xf0] }
 0x2ea   :  { %4408 = vmatpush.bf16.msra.mxu1 %v6043_v60  ;;  %4370 = vmatpush.bf16.msrb.mxu2 %v6151_v5  ;;  %v6182_v60 = vld [vmem:[#allocation17 + $0x408] sm:$0xf]  ;;  %v6375_v34 = vor.u32 %v7011_v63, %v6372_v0  ;;  %v6344_v5 = vld [vmem:[#allocation17 + $0x56c] sm:$0xf0] }
 0x2eb   :  { %v6183_v28 = vor.u32 %v6966_v61, %v6182_v60  ;;  %v6347_v36 = vor.u32 %v7004_v4, %v6344_v5 }
 0x2ed   :  { %4399 = vmatpush.bf16.msra.mxu0 %v5679_v9  ;;  %4329 = vmatpush.bf16.msra.mxu3 %v6343_v11  ;;  %v7057_v9 = vld [vmem:[#allocation17 + $0x6f8] sm:$0xf0] }
 0x2ee   :  { %4409 = vmatpush.bf16.msra.mxu1 %v6015_v56  ;;  %4371 = vmatpush.bf16.msrb.mxu2 %v6123_v16  ;;  %v6126_v56 = vld [vmem:[#allocation17 + $0x398] sm:$0xf]  ;;  %v6547_v57 = vor.u32 %v7057_v9, %v6546_v7 }
 0x2ef   :  { %v6127_v11 = vor.u32 %v6952_v10, %v6126_v56 }
 0x2f0   :  { %4400 = vmatmul.bf16.vlgmr.msra.gmra.mxu0 %v7581_v17  ;;  %4330 = vmatmul.bf16.vlgmr.msra.gmra.mxu3 %v7597_v39  ;;  %v5931_v17 = vor.u32 %v6903_v33, %v5930_v1 }
 0x2f1   :  { %4378 = vmatpush.bf16.msrb.mxu3 %v6543_v15  ;;  %4372 = vmatmul.bf16.vlgmr.msrb.gmra.mxu2 %v7589_v3  ;;  %v6519_v15 = vor.u32 %v7050_v14, %v6518_v12 }
 0x2f2   :  { %4410 = vmatpush.bf16.msra.mxu1 %v5987_v20  ;;  %4420 = vmatpush.bf16.msra.mxu2 %v6323_v21  ;;  %v7619_v20 = vld [vmem:[%s7644_s10] sm:$0xff]  ;;  %v6491_v21 = vor.u32 %v7043_v19, %v6490_v18  ;;  %s7399_s10 = smov [#allocation19]  }
 0x2f3   :  { %v4093_v16 = vpop.f32.mrf.mxu2  ;;  %v2890_v22 = vperm.slane %v7619_v20, 0  ;;  %v2891_v13 = vperm.slane %v7619_v20, 1  ;;  %v2892_v9 = vperm.slane %v7619_v20, 2  ;;  %s4480_s26 = sshll.u32 %s7399_s10, 4  ;;  %s4481_s26 = int_to_ptr.vmem [resolvable:$true] %s4480_s26 }
 0x2f5   :  { %4379 = vmatpush.bf16.msrb.mxu3 %v6515_v26  ;;  %v6463_v26 = vor.u32 %v7036_v24, %v6462_v23 }
 0x2f6   :  { %4411 = vmatpush.bf16.msra.mxu1 %v5959_v31  ;;  %4421 = vmatpush.bf16.msra.mxu2 %v6295_v32  ;;  %v6434_v31 = vld [vmem:[#allocation17 + $0x600] sm:$0xf]  ;;  %v7029_v32 = vld [vmem:[#allocation17 + $0x618] sm:$0xf0] }
 0x2f7   :  { %v6435_v35 = vor.u32 %v7029_v32, %v6434_v31  ;;  %v2893_v31 = vperm.slane %v7619_v20, 3 }
 0x2f9   :  { %4380 = vmatpush.bf16.msrb.mxu3 %v6487_v40  ;;  %v6406_v40 = vld [vmem:[#allocation17 + $0x5c8] sm:$0xf] }
 0x2fa   :  { %4412 = vmatpush.bf16.msra.mxu1 %v5931_v17  ;;  %4422 = vmatpush.bf16.msra.mxu2 %v6267_v43 }
 0x2fb   :  { %v4095_v33 = vpop.f32.mrf.mxu2 }
 0x2fd   :  { %4381 = vmatpush.bf16.msrb.mxu3 %v6459_v50  ;;  %v4135_v50 = vpop.f32.mrf.mxu1 }
 0x2fe   :  { %4413 = vmatpush.bf16.msra.mxu1 %v5903_v52  ;;  %4423 = vmatpush.bf16.msra.mxu2 %v6239_v48 }
 0x301   :  { %4382 = vmatpush.bf16.msrb.mxu3 %v6431_v55  ;;  %4414 = vmatmul.bf16.vlgmr.msra.gmra.mxu1 %v7585_v8  ;;  %v4065_v8 = vpop.f32.mrf.mxu0 }
 0x302   :  { %4424 = vmatpush.bf16.msra.mxu2 %v6211_v38  ;;  %v4066_v27 = vadd.f32 %v4065_v8, %v2890_v22  ;;  %v6351_v38 = vor.u32 %v7008_v54, %v6350_v53 }
 0x303   :  { %v4149_v48 = vpop.f32.mrf.mxu2 }
 0x304   :  { %v4080_v1 = vadd.f32 %v4079_v49, %v4066_v27 }
 0x305   :  { %4383 = vmatpush.bf16.msrb.mxu3 %v6403_v62  ;;  %v4137_v63 = vpop.f32.mrf.mxu1 }
 0x306   :  { %4425 = vmatpush.bf16.msra.mxu2 %v6183_v28  ;;  %v4094_v37 = vadd.f32 %v4093_v16, %v4080_v1 }
 0x309   :  { %4384 = vmatpush.bf16.msrb.mxu3 %v6375_v34  ;;  %v4067_v25 = vpop.f32.mrf.mxu0 }
 0x30a   :  { %4426 = vmatpush.bf16.msra.mxu2 %v6155_v6  ;;  %v4068_v43 = vadd.f32 %v4067_v25, %v2890_v22 }
 0x30b   :  { %v4151_v29 = vpop.f32.mrf.mxu2 }
 0x30c   :  { %v4082_v47 = vadd.f32 %v4081_v30, %v4068_v43 }
 0x30d   :  { %4385 = vmatpush.bf16.msrb.mxu3 %v6347_v36  ;;  %v4191_v36 = vpop.f32.mrf.mxu1 }
 0x30e   :  { %4427 = vmatpush.bf16.msra.mxu2 %v6127_v11  ;;  %v4096_v52 = vadd.f32 %v4095_v33, %v4082_v47 }
 0x310   :  { %4386 = vmatmul.bf16.vlgmr.msrb.gmra.mxu3 %v7597_v39 }
 0x311   :  { %4434 = vmatpush.bf16.msra.mxu3 %v6547_v57  ;;  %4428 = vmatmul.bf16.vlgmr.msra.gmra.mxu2 %v7589_v3  ;;  %v7022_v3 = vld [vmem:[#allocation17 + $0x5e0] sm:$0xf0]  ;;  %v4121_v44 = vpop.f32.mrf.mxu0 }
 0x312   :  { %v6407_v17 = vor.u32 %v7022_v3, %v6406_v40  ;;  %v4122_v60 = vadd.f32 %v4121_v44, %v2891_v13 }
 0x313   :  { %v4107_v41 = vpop.f32.mrf.mxu3 }
 0x314   :  { %v4108_v42 = vadd.f32 %v4107_v41, %v4094_v37  ;;  %v4136_v62 = vadd.f32 %v4135_v50, %v4122_v60 }
 0x315   :  { %4435 = vmatpush.bf16.msra.mxu3 %v6519_v15  ;;  %v4193_v18 = vpop.f32.mrf.mxu1 }
 0x316   :  { %7077 = vtanh.f32 %v4108_v42  ;;  %v4150_v0 = vadd.f32 %v4149_v48, %v4136_v62  ;;  %v4205_v8 = vpop.f32.mrf.mxu2 }
 0x319   :  { %4436 = vmatpush.bf16.msra.mxu3 %v6491_v21  ;;  %v4123_v61 = vpop.f32.mrf.mxu0 }
 0x31a   :  { %v4124_v4 = vadd.f32 %v4123_v61, %v2891_v13 }
 0x31b   :  { %v4109_v55 = vpop.f32.mrf.mxu3 }
 0x31c   :  { %v7078_v58 = vpop.eup %7077  ;;  %v4110_v59 = vadd.f32 %v4109_v55, %v4096_v52  ;;  %v4138_v5 = vadd.f32 %v4137_v63, %v4124_v4  ;;  %v2894_v52 = vperm.slane %v7619_v20, 4 }
 0x31d   :  { %4437 = vmatpush.bf16.msra.mxu3 %v6463_v26  ;;  %4462 = vst [vmem:[#allocation19] sm:$0xff] %v7078_v58 }
 0x31e   :  { %7079 = vtanh.f32 %v4110_v59  ;;  %v4152_v7 = vadd.f32 %v4151_v29, %v4138_v5  ;;  %v4207_v21 = vpop.f32.mrf.mxu2 }
 0x320   :  { %v4247_v32 = vpop.f32.mrf.mxu1 }
 0x321   :  { %4438 = vmatpush.bf16.msra.mxu3 %v6435_v35  ;;  %v4177_v6 = vpop.f32.mrf.mxu0 }
 0x322   :  { %v4178_v11 = vadd.f32 %v4177_v6, %v2892_v9  ;;  %v2895_v6 = vperm.slane %v7619_v20, 5 }
 0x323   :  { %v4163_v28 = vpop.f32.mrf.mxu3 }
 0x324   :  { %v7080_v2 = vpop.eup %7079  ;;  %v4164_v34 = vadd.f32 %v4163_v28, %v4150_v0  ;;  %v4192_v12 = vadd.f32 %v4191_v36, %v4178_v11 }
 0x325   :  { %4439 = vmatpush.bf16.msra.mxu3 %v6407_v17  ;;  %4469 = vst [vmem:[#allocation19 + $0x38] sm:$0xff] %v7080_v2 }
 0x326   :  { %7081 = vtanh.f32 %v4164_v34  ;;  %v4206_v14 = vadd.f32 %v4205_v8, %v4192_v12 }
 0x328   :  { %v4249_v42 = vpop.f32.mrf.mxu1 }
 0x329   :  { %4440 = vmatpush.bf16.msra.mxu3 %v6379_v51 }
 0x32b   :  { %v4165_v56 = vpop.f32.mrf.mxu3 }
 0x32c   :  { %v7082_v10 = vpop.eup %7081  ;;  %v4166_v57 = vadd.f32 %v4165_v56, %v4152_v7 }
 0x32d   :  { %4441 = vmatpush.bf16.msra.mxu3 %v6351_v38  ;;  %4463 = vst [vmem:[#allocation19 + $0x8] sm:$0xff] %v7082_v10 }
 0x32e   :  { %7083 = vtanh.f32 %v4166_v57 }
 0x330   :  { %4442 = vmatmul.bf16.vlgmr.msra.gmra.mxu3 %v7597_v39  ;;  %v4179_v39 = vpop.f32.mrf.mxu0 }
 0x331   :  { %v4180_v19 = vadd.f32 %v4179_v39, %v2892_v9 }
 0x333   :  { %v4219_v15 = vpop.f32.mrf.mxu3  ;;  %v4194_v22 = vadd.f32 %v4193_v18, %v4180_v19 }
 0x334   :  { %v7084_v49 = vpop.eup %7083  ;;  %v4220_v16 = vadd.f32 %v4219_v15, %v4206_v14 }
 0x335   :  { %4470 = vst [vmem:[#allocation19 + $0x40] sm:$0xff] %v7084_v49  ;;  %v4208_v23 = vadd.f32 %v4207_v21, %v4194_v22 }
 0x336   :  { %7085 = vtanh.f32 %v4220_v16  ;;  %v4261_v1 = vpop.f32.mrf.mxu2 }
 0x338   :  { %v4233_v30 = vpop.f32.mrf.mxu0 }
 0x339   :  { %v4234_v33 = vadd.f32 %v4233_v30, %v2893_v31 }
 0x33b   :  { %v4221_v24 = vpop.f32.mrf.mxu3  ;;  %v4248_v35 = vadd.f32 %v4247_v32, %v4234_v33 }
 0x33c   :  { %v7086_v25 = vpop.eup %7085  ;;  %v4222_v26 = vadd.f32 %v4221_v24, %v4208_v23  ;;  %v2896_v23 = vperm.slane %v7619_v20, 6 }
 0x33d   :  { %4464 = vst [vmem:[#allocation19 + $0x10] sm:$0xff] %v7086_v25  ;;  %v4262_v37 = vadd.f32 %v4261_v1, %v4248_v35 }
 0x33e   :  { %7087 = vtanh.f32 %v4222_v26  ;;  %v4263_v43 = vpop.f32.mrf.mxu2 }
 0x340   :  { %v4235_v40 = vpop.f32.mrf.mxu0  ;;  %v4303_v48 = vpop.f32.mrf.mxu1 }
 0x341   :  { %v4236_v17 = vadd.f32 %v4235_v40, %v2893_v31 }
 0x343   :  { %v4250_v44 = vadd.f32 %v4249_v42, %v4236_v17 }
 0x344   :  { %v7088_v27 = vpop.eup %7087 }
 0x345   :  { %4471 = vst [vmem:[#allocation19 + $0x48] sm:$0xff] %v7088_v27  ;;  %v4264_v45 = vadd.f32 %v4263_v43, %v4250_v44 }
 0x348   :  { %v4289_v13 = vpop.f32.mrf.mxu0  ;;  %v4305_v61 = vpop.f32.mrf.mxu1 }
 0x349   :  { %v4290_v54 = vadd.f32 %v4289_v13, %v2894_v52 }
 0x34b   :  { %v4304_v55 = vadd.f32 %v4303_v48, %v4290_v54 }
 0x350   :  { %v4291_v59 = vpop.f32.mrf.mxu0 }
 0x351   :  { %v4292_v62 = vadd.f32 %v4291_v59, %v2894_v52 }
 0x353   :  { %v4275_v3 = vpop.f32.mrf.mxu3  ;;  %v4306_v0 = vadd.f32 %v4305_v61, %v4292_v62 }
 0x354   :  { %v4276_v41 = vadd.f32 %v4275_v3, %v4262_v37 }
 0x356   :  { %7089 = vtanh.f32 %v4276_v41  ;;  %v4317_v53 = vpop.f32.mrf.mxu2 }
 0x357   :  { %v4318_v58 = vadd.f32 %v4317_v53, %v4304_v55 }
 0x358   :  { %v4345_v5 = vpop.f32.mrf.mxu0 }
 0x359   :  { %v4346_v56 = vadd.f32 %v4345_v5, %v2895_v6 }
 0x35b   :  { %v4277_v46 = vpop.f32.mrf.mxu3 }
 0x35c   :  { %v7090_v47 = vpop.eup %7089  ;;  %v4278_v50 = vadd.f32 %v4277_v46, %v4264_v45 }
 0x35d   :  { %4465 = vst [vmem:[#allocation19 + $0x18] sm:$0xff] %v7090_v47 }
 0x35e   :  { %7091 = vtanh.f32 %v4278_v50  ;;  %v4319_v63 = vpop.f32.mrf.mxu2 }
 0x35f   :  { %v4320_v28 = vadd.f32 %v4319_v63, %v4306_v0 }
 0x360   :  { %v4359_v7 = vpop.f32.mrf.mxu1  ;;  %v4347_v57 = vpop.f32.mrf.mxu0 }
 0x361   :  { %v4360_v10 = vadd.f32 %v4359_v7, %v4346_v56  ;;  %v4348_v14 = vadd.f32 %v4347_v57, %v2895_v6 }
 0x364   :  { %v7092_v51 = vpop.eup %7091 }
 0x365   :  { %4472 = vst [vmem:[#allocation19 + $0x50] sm:$0xff] %v7092_v51 }
 0x368   :  { %v4361_v12 = vpop.f32.mrf.mxu1 }
 0x369   :  { %v4362_v39 = vadd.f32 %v4361_v12, %v4348_v14 }
 0x36d   :  { %v4401_v22 = vpop.f32.mrf.mxu0 }
 0x36e   :  { %v4402_v26 = vadd.f32 %v4401_v22, %v2896_v23 }
 0x373   :  { %v4331_v38 = vpop.f32.mrf.mxu3 }
 0x374   :  { %v4332_v60 = vadd.f32 %v4331_v38, %v4318_v58  ;;  %v4373_v9 = vpop.f32.mrf.mxu2 }
 0x375   :  { %v4374_v36 = vadd.f32 %v4373_v9, %v4360_v10  ;;  %v4403_v31 = vpop.f32.mrf.mxu0 }
 0x376   :  { %7093 = vtanh.f32 %v4332_v60  ;;  %v4404_v35 = vadd.f32 %v4403_v31, %v2896_v23 }
 0x37b   :  { %v4333_v2 = vpop.f32.mrf.mxu3 }
 0x37c   :  { %v7094_v29 = vpop.eup %7093  ;;  %v4334_v34 = vadd.f32 %v4333_v2, %v4320_v28  ;;  %v4375_v49 = vpop.f32.mrf.mxu2 }
 0x37d   :  { %4466 = vst [vmem:[#allocation19 + $0x20] sm:$0xff] %v7094_v29  ;;  %v4376_v15 = vadd.f32 %v4375_v49, %v4362_v39 }
 0x37e   :  { %7095 = vtanh.f32 %v4334_v34  ;;  %v4415_v24 = vpop.f32.mrf.mxu1 }
 0x37f   :  { %v4416_v27 = vadd.f32 %v4415_v24, %v4402_v26 }
 0x384   :  { %v7096_v4 = vpop.eup %7095 }
 0x385   :  { %4473 = vst [vmem:[#allocation19 + $0x58] sm:$0xff] %v7096_v4 }
 0x386   :  { %v4417_v33 = vpop.f32.mrf.mxu1 }
 0x387   :  { %v4418_v40 = vadd.f32 %v4417_v33, %v4404_v35 }
 0x393   :  { %v4387_v8 = vpop.f32.mrf.mxu3 }
 0x394   :  { %v4388_v11 = vadd.f32 %v4387_v8, %v4374_v36  ;;  %v4429_v25 = vpop.f32.mrf.mxu2 }
 0x395   :  { %v4430_v30 = vadd.f32 %v4429_v25, %v4416_v27 }
 0x396   :  { %7097 = vtanh.f32 %v4388_v11 }
 0x39b   :  { %v4389_v16 = vpop.f32.mrf.mxu3 }
 0x39c   :  { %v7098_v18 = vpop.eup %7097  ;;  %v4390_v19 = vadd.f32 %v4389_v16, %v4376_v15  ;;  %v4431_v37 = vpop.f32.mrf.mxu2 }
 0x39d   :  { %4467 = vst [vmem:[#allocation19 + $0x28] sm:$0xff] %v7098_v18  ;;  %v4432_v3 = vadd.f32 %v4431_v37, %v4418_v40 }
 0x39e   :  { %7099 = vtanh.f32 %v4390_v19 }
 0x3a4   :  { %v7100_v21 = vpop.eup %7099 }
 0x3a5   :  { %4474 = vst [vmem:[#allocation19 + $0x60] sm:$0xff] %v7100_v21 }
 0x3b3   :  { %v4443_v32 = vpop.f32.mrf.mxu3 }
 0x3b4   :  { %v4444_v1 = vadd.f32 %v4443_v32, %v4430_v30 }
 0x3b6   :  { %7101 = vtanh.f32 %v4444_v1 }
 0x3bb   :  { %v4445_v41 = vpop.f32.mrf.mxu3 }
 0x3bc   :  { %v7102_v42 = vpop.eup %7101  ;;  %v4446_v17 = vadd.f32 %v4445_v41, %v4432_v3 }
 0x3bd   :  { %4468 = vst [vmem:[#allocation19 + $0x30] sm:$0xff] %v7102_v42 }
 0x3be   :  { %7103 = vtanh.f32 %v4446_v17 }
 0x3c4   :  { %v7104_v20 = vpop.eup %7103 }
 0x3c5   :  { %4475 = vst [vmem:[#allocation19 + $0x68] sm:$0xff] %v7104_v20 }
 0x3c6   :  { %4488 = dma.vmem_to_hbm [thread:$0]  %s4481_s26, 1792, %s4483_s28, [#allocation4], %s7400_s29, %s7400_s29, %s7401_s30  }
 0x3c7   :  { %7381 = dma.done.wait [#allocation4], 1792  }
 0x3c8   :  { %7382 = vsyncadd [#allocation4], 4294965504 }
 0x3c9   :  { %4493 = vsyncpa [#allocation3], 1 }
 0x3ca   :  { %4494 = vsyncpa [#allocation6], 1 }
 0x3cb   :  { %4495 = vsyncpa [#allocation9], 1 }
 0x3cc   :  { %4496 = vsyncpa [#allocation12], 1 }
 0x3cd   :  { %4497 = vsyncpa [#allocation15], 1 }
 0x3ce   :  { %4498 = vsyncpa [#allocation18], 1 }
 0x3cf   :  { %4499 = vsyncpa [#allocation4], 1 }

</bundles_post_ra>
